<compile_context>
chip_gen: v5e
topology: v5e:2x2
jax: 0.10.0
libtpu: 0.0.40
codegen_flags: <defaults>
</compile_context>

<pallas_src>
import math

import numpy as np
import jax
import jax.numpy as jnp
from jax.experimental import pallas as pl
from jax.experimental.pallas import tpu as pltpu


BINS = (1, 2, 3, 6)
NBINS = len(BINS)
CFEAT = 32                  # stem conv output channels
CRED = 8                    # per-bin reduction channels
CLASSES = 2
PSP_ROWS = sum(b * b for b in BINS)     # 50 pooled positions per image

_off, _acc = [], 0
for _b in BINS:
    _off.append(_acc)
    _acc += _b * _b
BIN_OFF = tuple(_off)


# ----------------------------------------------------------------------------
# Kernel 1: branch-batched stem conv (im2col matmul + bias + ReLU), bf16 MXU
# ----------------------------------------------------------------------------
def _conv_mm_kernel(a_ref, w_ref, b_ref, o_ref):
    acc = jnp.dot(a_ref[...], w_ref[...], preferred_element_type=jnp.float32)
    acc = jnp.maximum(acc + b_ref[...], 0.0)
    o_ref[...] = acc.astype(o_ref.dtype)


def _pick_tile(m):
    """Largest M-tile that divides M exactly (no padding copies)."""
    for t in (512, 256, 128, 64, 32, 16, 8):
        if m % t == 0:
            return t
    return m


def conv3x3_two_branch(a_stk, w_stk, b_stk):
    """a_stk: (2, M, K) bf16 im2col patches (branch-stacked), returns (2, M, CFEAT) bf16.

    TODO(synk): at real PSPNet channel counts (K = 9*2048) add K/N grid axes
    with an f32 accumulator scratch + pl.when init/finalize instead of a fully
    resident (K, N) weight block, so it also fits v7x's 64 MiB VMEM.
    """
    nb, M, K = a_stk.shape
    tm = _pick_tile(M)
    return pl.pallas_call(
        _conv_mm_kernel,
        out_shape=jax.ShapeDtypeStruct((nb, M, CFEAT), jnp.bfloat16),
        grid=(nb, M // tm),
        in_specs=[
            pl.BlockSpec((None, tm, K), lambda b, m: (b, m, 0)),
            pl.BlockSpec((None, K, CFEAT), lambda b, m: (b, 0, 0)),
            pl.BlockSpec((None, 1, CFEAT), lambda b, m: (b, 0, 0)),
        ],
        out_specs=pl.BlockSpec((None, tm, CFEAT), lambda b, m: (b, m, 0)),
        compiler_params=pltpu.CompilerParams(
            dimension_semantics=("parallel", "parallel")),
    )(a_stk, w_stk, b_stk)


# ----------------------------------------------------------------------------
# Kernel 2: fused PSP head (pool -> reduce -> classify -> upsample -> sum of
# both branches -> bias -> log_softmax), one grid step per batch element
# ----------------------------------------------------------------------------
def _head_kernel(feat_ref, q_ref, up_ref, wp_ref, bp_ref, wcb_ref, wcf_ref,
                 bias_ref, o_ref):
    hw = feat_ref.shape[1]
    q = q_ref[...]                                            # (PSP_ROWS, hw) f32
    logits = jnp.broadcast_to(bias_ref[...], (hw, CLASSES)).astype(jnp.float32)
    for b in range(2):                                        # rgb branch, flow branch
        f_bf = feat_ref[b]                                    # (hw, CFEAT) bf16
        # per-pixel classifier contribution (bf16 MXU, f32 accumulate)
        logits = logits + jnp.dot(f_bf, wcf_ref[b],
                                  preferred_element_type=jnp.float32)
        # adaptive pyramid pooling over ALL bins as one matmul
        pooled = jnp.dot(q, f_bf.astype(jnp.float32),
                         preferred_element_type=jnp.float32)              # (50, CFEAT)
        # the four per-bin 1x1 reduction convs collapsed into one matmul
        red = jnp.maximum(
            jnp.dot(pooled, wp_ref[b].astype(jnp.float32),
                    preferred_element_type=jnp.float32) + bp_ref[b], 0.0)  # (50, 32)
        # classifier at pooled resolution per bin (linearity), then a 0/1
        # matmul does the nearest upsample of the 2-channel logit contribution
        for bi in range(NBINS):
            lg = jnp.dot(red, wcb_ref[b * NBINS + bi],
                         preferred_element_type=jnp.float32)               # (50, 2)
            logits = logits + jnp.dot(up_ref[bi], lg,
                                      preferred_element_type=jnp.float32)  # (hw, 2)
    # fused log_softmax over the class axis: the 2-wide tensor never hits HBM
    # until this final (and unavoidable, it is the module output) store.
    m = jnp.max(logits, axis=-1, keepdims=True)
    lse = m + jnp.log(jnp.sum(jnp.exp(logits - m), axis=-1, keepdims=True))
    o_ref[...] = (logits - lse).astype(o_ref.dtype)


def psp_head(feat_stk, q, up, wp_stk, bp_stk, wcb, wcf_stk, bias_sum, n, hw):
    return pl.pallas_call(
        _head_kernel,
        out_shape=jax.ShapeDtypeStruct((n, hw, CLASSES), jnp.float32),
        grid=(n,),
        in_specs=[
            pl.BlockSpec((2, hw, CFEAT), lambda i: (0, i, 0)),
            pl.BlockSpec((PSP_ROWS, hw), lambda i: (0, 0)),
            pl.BlockSpec((NBINS, hw, PSP_ROWS), lambda i: (0, 0, 0)),
            pl.BlockSpec((2, CFEAT, NBINS * CRED), lambda i: (0, 0, 0)),
            pl.BlockSpec((2, 1, NBINS * CRED), lambda i: (0, 0, 0)),
            pl.BlockSpec((2 * NBINS, NBINS * CRED, CLASSES), lambda i: (0, 0, 0)),
            pl.BlockSpec((2, CFEAT, CLASSES), lambda i: (0, 0, 0)),
            pl.BlockSpec((1, CLASSES), lambda i: (0, 0)),
        ],
        out_specs=pl.BlockSpec((None, hw, CLASSES), lambda i: (i, 0, 0)),
        compiler_params=pltpu.CompilerParams(
            dimension_semantics=("parallel",)),
    )(feat_stk, q, up, wp_stk, bp_stk, wcb, wcf_stk, bias_sum)


# ----------------------------------------------------------------------------
# Static matrices (built once at trace time): adaptive pooling + nearest upsample
# ----------------------------------------------------------------------------
def _pool_bounds(n_out, n_in):
    starts = [int(math.floor(i * n_in / n_out)) for i in range(n_out)]
    ends = [int(math.ceil((i + 1) * n_in / n_out)) for i in range(n_out)]
    return starts, ends


def build_psp_matrices(H, W):
    """Q: (PSP_ROWS, H*W) torch-AdaptiveAvgPool2d averaging weights for all bins.
    UP: (NBINS, H*W, PSP_ROWS) 0/1 nearest-upsample selection, per bin."""
    HW = H * W
    q = np.zeros((PSP_ROWS, HW), np.float32)
    up = np.zeros((NBINS, HW, PSP_ROWS), np.float32)
    for bi, b in enumerate(BINS):
        hs, he = _pool_bounds(b, H)
        ws, we = _pool_bounds(b, W)
        for i in range(b):
            for j in range(b):
                r = BIN_OFF[bi] + i * b + j
                wgt = 1.0 / ((he[i] - hs[i]) * (we[j] - ws[j]))
                blk = np.zeros((H, W), np.float32)
                blk[hs[i]:he[i], ws[j]:we[j]] = wgt
                q[r] = blk.reshape(HW)
        hi = (np.arange(H) * b) // H
        wi = (np.arange(W) * b) // W
        for h in range(H):
            for w in range(W):
                up[bi, h * W + w, BIN_OFF[bi] + hi[h] * b + wi[w]] = 1.0
    return jnp.asarray(q), jnp.asarray(up)


# ----------------------------------------------------------------------------
# im2col (XLA layout plumbing; fine at 16x16)
# ----------------------------------------------------------------------------
def im2col_3x3(x):
    """x: (N,H,W,C), pad=1 -> (N*H*W, 9*C).
    TODO(synk): at PSPNet-scale H,W replace with in-kernel shifted-matmul
    accumulation (K grid axis + accumulator) to avoid the 9x HBM blow-up."""
    N, H, W, C = x.shape
    xp = jnp.pad(x, ((0, 0), (1, 1), (1, 1), (0, 0)))
    cols = [xp[:, dy:dy + H, dx:dx + W, :] for dy in range(3) for dx in range(3)]
    return jnp.concatenate(cols, axis=-1).reshape(N * H * W, 9 * C)


# ----------------------------------------------------------------------------
# Parameters (deterministic stand-in branches) and kernel-layout prep
# ----------------------------------------------------------------------------
def make_branch_params(key, in_ch):
    keys = jax.random.split(key, 2 + NBINS)
    k_in = 9 * in_ch
    c_cat = CFEAT + NBINS * CRED
    return {
        "w1": jax.random.normal(keys[0], (k_in, CFEAT), jnp.float32) / math.sqrt(k_in),
        "b1": jnp.zeros((CFEAT,), jnp.float32),
        "wp": [jax.random.normal(keys[1 + i], (CFEAT, CRED), jnp.float32) / math.sqrt(CFEAT)
               for i in range(NBINS)],
        "bp": [jnp.zeros((CRED,), jnp.float32) for _ in range(NBINS)],
        "wc": jax.random.normal(keys[-1], (c_cat, CLASSES), jnp.float32) / math.sqrt(c_cat),
        "bc": jnp.zeros((CLASSES,), jnp.float32),
    }


def _pad_conv_weight(w1, cmax):
    """(9*in_ch, CFEAT) -> (9*cmax, CFEAT) with zero rows for padded channels."""
    k_in, _ = w1.shape
    in_ch = k_in // 9
    if in_ch == cmax:
        return w1
    w = w1.reshape(9, in_ch, CFEAT)
    w = jnp.pad(w, ((0, 0), (0, cmax - in_ch), (0, 0)))
    return w.reshape(9 * cmax, CFEAT)


def prepare_params(params_rgb, params_flow, cmax):
    branches = (params_rgb, params_flow)
    w1 = jnp.stack([_pad_conv_weight(p["w1"], cmax).astype(jnp.bfloat16) for p in branches])
    b1 = jnp.stack([p["b1"].reshape(1, CFEAT) for p in branches])
    # four per-bin reduce convs collapsed into one (CFEAT, 4*CRED) weight
    wp = jnp.stack([jnp.concatenate(p["wp"], axis=1).astype(jnp.bfloat16) for p in branches])
    bp = jnp.stack([jnp.concatenate(p["bp"], axis=0).reshape(1, NBINS * CRED) for p in branches])
    # classifier split: rows acting on the stem features ...
    wcf = jnp.stack([p["wc"][:CFEAT].astype(jnp.bfloat16) for p in branches])
    # ... and per-bin rows, laid out to match the collapsed `red` column order
    wcb_rows = []
    for p in branches:
        for bi in range(NBINS):
            blk = jnp.zeros((NBINS * CRED, CLASSES), jnp.float32)
            blk = blk.at[bi * CRED:(bi + 1) * CRED].set(
                p["wc"][CFEAT + bi * CRED: CFEAT + (bi + 1) * CRED])
            wcb_rows.append(blk)
    wcb = jnp.stack(wcb_rows)                                   # (2*NBINS, 32, 2)
    bias_sum = (params_rgb["bc"] + params_flow["bc"]).reshape(1, CLASSES)
    return dict(w1=w1, b1=b1, wp=wp, bp=bp, wcf=wcf, wcb=wcb, bias=bias_sum)


# ----------------------------------------------------------------------------
# PSP2S forward
# ----------------------------------------------------------------------------
@jax.jit
def psp2s_forward(x_nchw, aug_mask_nchw, flow_nchw, params_rgb, params_flow):
    # NCHW (PyTorch convention) -> NHWC (kernel layout)
    x = jnp.transpose(x_nchw, (0, 2, 3, 1))
    flow = jnp.transpose(flow_nchw, (0, 2, 3, 1))
    mask = jnp.transpose(aug_mask_nchw, (0, 2, 3, 1))
    N, H, W, _ = x.shape
    HW = H * W

    inp_rgb = jnp.concatenate([x, mask], axis=-1)
    inp_flow = jnp.concatenate([flow, mask], axis=-1)
    cmax = max(inp_rgb.shape[-1], inp_flow.shape[-1])

    def _pad_c(t):
        pad = cmax - t.shape[-1]
        return t if pad == 0 else jnp.pad(t, ((0, 0),) * 3 + ((0, pad),))

    inp_rgb, inp_flow = _pad_c(inp_rgb), _pad_c(inp_flow)

    # branch-batched im2col patches, bf16 for the MXU
    a_stk = jnp.stack([im2col_3x3(inp_rgb.astype(jnp.bfloat16)),
                       im2col_3x3(inp_flow.astype(jnp.bfloat16))])   # (2, N*HW, 9*cmax)

    pp = prepare_params(params_rgb, params_flow, cmax)
    feat = conv3x3_two_branch(a_stk, pp["w1"], pp["b1"])             # (2, N*HW, 32) bf16

    q, up = build_psp_matrices(H, W)
    out = psp_head(feat, q, up, pp["wp"], pp["bp"], pp["wcb"], pp["wcf"],
                   pp["bias"], N, HW)                                # (N, HW, 2) f32
    out = out.reshape(N, H, W, CLASSES)
    # back to NCHW; log_softmax over the NHWC channel axis == dim=1 in NCHW
    return jnp.transpose(out, (0, 3, 1, 2))


if __name__ == "__main__":
    key = jax.random.PRNGKey(0)
    kx, kf, km, kp1, kp2 = jax.random.split(key, 5)

    N, H, W = 2, 16, 16
    x_nchw = jax.random.normal(kx, (N, 3, H, W), jnp.float32)         # rgb image
    flow_nchw = jax.random.normal(kf, (N, 2, H, W), jnp.float32)      # flow patch
    aug_mask_nchw = jax.random.normal(km, (N, 1, H, W), jnp.float32)  # aug mask

    params_rgb = make_branch_params(kp1, in_ch=3 + 1)
    params_flow = make_branch_params(kp2, in_ch=2 + 1)

    out = psp2s_forward(x_nchw, aug_mask_nchw, flow_nchw, params_rgb, params_flow)
    out = jax.block_until_ready(out)

    assert out.shape == (N, CLASSES, H, W)
    # sanity: log_softmax over channels -> exp sums to 1, and everything finite
    s = jnp.sum(jnp.exp(out), axis=1)
    assert bool(jnp.all(jnp.abs(s - 1.0) < 1e-4))
    assert bool(jnp.all(jnp.isfinite(out)))

    print("KERNEL_OK")
</pallas_src>

<mosaic_0001>
module attributes {stable_mosaic.version = 11 : i64} {
  func.func @_conv_mm_kernel(%arg0: i32, %arg1: i32, %arg2: memref<1x512x36xbf16, #tpu.memory_space<vmem>>, %arg3: memref<1x36x32xbf16, #tpu.memory_space<vmem>>, %arg4: memref<1x1x32xf32, #tpu.memory_space<vmem>>, %arg5: memref<1x512x32xbf16, #tpu.memory_space<vmem>>) attributes {dimension_semantics = [#tpu.dimension_semantics<parallel>, #tpu.dimension_semantics<parallel>], iteration_bounds = array<i64: 2, 1>, scalar_prefetch = 0 : i64, scratch_operands = 0 : i64, tpu.core_type = #tpu.core_type<tc>, window_params = [{transform_indices = @transform_0, window_bounds = array<i64: 1, 512, 36>}, {transform_indices = @transform_1, window_bounds = array<i64: 1, 36, 32>}, {transform_indices = @transform_2, window_bounds = array<i64: 1, 1, 32>}, {transform_indices = @transform_3, window_bounds = array<i64: 1, 512, 32>}]} {
    %c0 = arith.constant 0 : index
    %c0_0 = arith.constant 0 : index
    %c0_1 = arith.constant 0 : index
    %0 = vector.load %arg2[%c0, %c0_0, %c0_1] : memref<1x512x36xbf16, #tpu.memory_space<vmem>>, vector<1x512x36xbf16>
    %1 = vector.shape_cast %0 : vector<1x512x36xbf16> to vector<512x36xbf16>
    %c0_2 = arith.constant 0 : index
    %c0_3 = arith.constant 0 : index
    %c0_4 = arith.constant 0 : index
    %2 = vector.load %arg3[%c0_2, %c0_3, %c0_4] : memref<1x36x32xbf16, #tpu.memory_space<vmem>>, vector<1x36x32xbf16>
    %3 = vector.shape_cast %2 : vector<1x36x32xbf16> to vector<36x32xbf16>
    %cst = arith.constant dense<0.000000e+00> : vector<512x32xf32>
    %4 = tpu.matmul %1, %3, %cst {dimension_numbers = #tpu.dot_dimension_numbers<[1], [0], [0], [1], [0, 0, 1, 1], [], []>} : vector<512x36xbf16>, vector<36x32xbf16>, vector<512x32xf32> -> vector<512x32xf32>
    %c0_5 = arith.constant 0 : index
    %c0_6 = arith.constant 0 : index
    %c0_7 = arith.constant 0 : index
    %5 = vector.load %arg4[%c0_5, %c0_6, %c0_7] : memref<1x1x32xf32, #tpu.memory_space<vmem>>, vector<1x1x32xf32>
    %6 = vector.shape_cast %5 : vector<1x1x32xf32> to vector<1x32xf32>
    %7 = vector.broadcast %6 : vector<1x32xf32> to vector<512x32xf32>
    %8 = arith.addf %4, %7 : vector<512x32xf32>
    %cst_8 = arith.constant 0.000000e+00 : f32
    %9 = vector.broadcast %cst_8 : f32 to vector<512x32xf32>
    %10 = arith.maximumf %8, %9 : vector<512x32xf32>
    %11 = arith.truncf %10 : vector<512x32xf32> to vector<512x32xbf16>
    %c0_9 = arith.constant 0 : index
    %c0_10 = arith.constant 0 : index
    %c0_11 = arith.constant 0 : index
    %12 = vector.load %arg5[%c0_9, %c0_10, %c0_11] : memref<1x512x32xbf16, #tpu.memory_space<vmem>>, vector<1x512x32xbf16>
    %13 = vector.shape_cast %12 : vector<1x512x32xbf16> to vector<512x32xbf16>
    %14 = vector.shape_cast %11 : vector<512x32xbf16> to vector<1x512x32xbf16>
    tpu.vector_store %arg5[%c0_9, %c0_10, %c0_11], %14 {strides = array<i32>} : memref<1x512x32xbf16, #tpu.memory_space<vmem>>, vector<1x512x32xbf16>,
    return
  }
  func.func @transform_0(%arg0: i32, %arg1: i32) -> (i32, i32, i32) {
    %c0_i32 = arith.constant 0 : i32
    %c0_i32_0 = arith.constant 0 : i32
    return %arg0, %arg1, %c0_i32 : i32, i32, i32
  }
  func.func @transform_1(%arg0: i32, %arg1: i32) -> (i32, i32, i32) {
    %c0_i32 = arith.constant 0 : i32
    %c0_i32_0 = arith.constant 0 : i32
    %c0_i32_1 = arith.constant 0 : i32
    return %arg0, %c0_i32, %c0_i32_0 : i32, i32, i32
  }
  func.func @transform_2(%arg0: i32, %arg1: i32) -> (i32, i32, i32) {
    %c0_i32 = arith.constant 0 : i32
    %c0_i32_0 = arith.constant 0 : i32
    %c0_i32_1 = arith.constant 0 : i32
    return %arg0, %c0_i32, %c0_i32_0 : i32, i32, i32
  }
  func.func @transform_3(%arg0: i32, %arg1: i32) -> (i32, i32, i32) {
    %c0_i32 = arith.constant 0 : i32
    %c0_i32_0 = arith.constant 0 : i32
    return %arg0, %arg1, %c0_i32 : i32, i32, i32
  }
}

module attributes {stable_mosaic.version = 11 : i64} {
  func.func @_head_kernel(%arg0: i32, %arg1: memref<2x256x32xbf16, #tpu.memory_space<vmem>>, %arg2: memref<50x256xf32, #tpu.memory_space<vmem>>, %arg3: memref<4x256x50xf32, #tpu.memory_space<vmem>>, %arg4: memref<2x32x32xbf16, #tpu.memory_space<vmem>>, %arg5: memref<2x1x32xf32, #tpu.memory_space<vmem>>, %arg6: memref<8x32x2xf32, #tpu.memory_space<vmem>>, %arg7: memref<2x32x2xbf16, #tpu.memory_space<vmem>>, %arg8: memref<1x2xf32, #tpu.memory_space<vmem>>, %arg9: memref<1x256x2xf32, #tpu.memory_space<vmem>>) attributes {dimension_semantics = [#tpu.dimension_semantics<parallel>], iteration_bounds = array<i64: 2>, scalar_prefetch = 0 : i64, scratch_operands = 0 : i64, tpu.core_type = #tpu.core_type<tc>, window_params = [{transform_indices = @transform_0, window_bounds = array<i64: 2, 256, 32>}, {pipeline_mode = #tpu.pipeline_mode<synchronous>, transform_indices = @transform_1, window_bounds = array<i64: 50, 256>}, {pipeline_mode = #tpu.pipeline_mode<synchronous>, transform_indices = @transform_2, window_bounds = array<i64: 4, 256, 50>}, {pipeline_mode = #tpu.pipeline_mode<synchronous>, transform_indices = @transform_3, window_bounds = array<i64: 2, 32, 32>}, {pipeline_mode = #tpu.pipeline_mode<synchronous>, transform_indices = @transform_4, window_bounds = array<i64: 2, 1, 32>}, {pipeline_mode = #tpu.pipeline_mode<synchronous>, transform_indices = @transform_5, window_bounds = array<i64: 8, 32, 2>}, {pipeline_mode = #tpu.pipeline_mode<synchronous>, transform_indices = @transform_6, window_bounds = array<i64: 2, 32, 2>}, {pipeline_mode = #tpu.pipeline_mode<synchronous>, transform_indices = @transform_7, window_bounds = array<i64: 1, 2>}, {transform_indices = @transform_8, window_bounds = array<i64: 1, 256, 2>}]} {
    %c0 = arith.constant 0 : index
    %c0_0 = arith.constant 0 : index
    %0 = vector.load %arg2[%c0, %c0_0] : memref<50x256xf32, #tpu.memory_space<vmem>>, vector<50x256xf32>
    %c0_1 = arith.constant 0 : index
    %c0_2 = arith.constant 0 : index
    %1 = vector.load %arg8[%c0_1, %c0_2] : memref<1x2xf32, #tpu.memory_space<vmem>>, vector<1x2xf32>
    %2 = vector.shape_cast %1 : vector<1x2xf32> to vector<1x2xf32>
    %3 = vector.broadcast %2 : vector<1x2xf32> to vector<256x2xf32>
    %c0_3 = arith.constant 0 : index
    %c0_4 = arith.constant 0 : index
    %c0_5 = arith.constant 0 : index
    %4 = vector.load %arg1[%c0_3, %c0_4, %c0_5] : memref<2x256x32xbf16, #tpu.memory_space<vmem>>, vector<1x256x32xbf16>
    %5 = vector.shape_cast %4 : vector<1x256x32xbf16> to vector<256x32xbf16>
    %c0_6 = arith.constant 0 : index
    %c0_7 = arith.constant 0 : index
    %c0_8 = arith.constant 0 : index
    %6 = vector.load %arg7[%c0_6, %c0_7, %c0_8] : memref<2x32x2xbf16, #tpu.memory_space<vmem>>, vector<1x32x2xbf16>
    %7 = vector.shape_cast %6 : vector<1x32x2xbf16> to vector<32x2xbf16>
    %cst = arith.constant dense<0.000000e+00> : vector<256x2xf32>
    %8 = tpu.matmul %5, %7, %cst {dimension_numbers = #tpu.dot_dimension_numbers<[1], [0], [0], [1], [0, 0, 1, 1], [], []>} : vector<256x32xbf16>, vector<32x2xbf16>, vector<256x2xf32> -> vector<256x2xf32>
    %9 = arith.addf %3, %8 : vector<256x2xf32>
    %10 = arith.extf %5 : vector<256x32xbf16> to vector<256x32xf32>
    %cst_9 = arith.constant dense<0.000000e+00> : vector<50x32xf32>
    %11 = tpu.matmul %0, %10, %cst_9 {dimension_numbers = #tpu.dot_dimension_numbers<[1], [0], [0], [1], [0, 0, 1, 1], [], []>} : vector<50x256xf32>, vector<256x32xf32>, vector<50x32xf32> -> vector<50x32xf32>
    %c0_10 = arith.constant 0 : index
    %c0_11 = arith.constant 0 : index
    %c0_12 = arith.constant 0 : index
    %12 = vector.load %arg4[%c0_10, %c0_11, %c0_12] : memref<2x32x32xbf16, #tpu.memory_space<vmem>>, vector<1x32x32xbf16>
    %13 = vector.shape_cast %12 : vector<1x32x32xbf16> to vector<32x32xbf16>
    %14 = arith.extf %13 : vector<32x32xbf16> to vector<32x32xf32>
    %cst_13 = arith.constant dense<0.000000e+00> : vector<50x32xf32>
    %15 = tpu.matmul %11, %14, %cst_13 {dimension_numbers = #tpu.dot_dimension_numbers<[1], [0], [0], [1], [0, 0, 1, 1], [], []>} : vector<50x32xf32>, vector<32x32xf32>, vector<50x32xf32> -> vector<50x32xf32>
    %c0_14 = arith.constant 0 : index
    %c0_15 = arith.constant 0 : index
    %c0_16 = arith.constant 0 : index
    %16 = vector.load %arg5[%c0_14, %c0_15, %c0_16] : memref<2x1x32xf32, #tpu.memory_space<vmem>>, vector<1x1x32xf32>
    %17 = vector.shape_cast %16 : vector<1x1x32xf32> to vector<1x32xf32>
    %18 = vector.broadcast %17 : vector<1x32xf32> to vector<50x32xf32>
    %19 = arith.addf %15, %18 : vector<50x32xf32>
    %cst_17 = arith.constant 0.000000e+00 : f32
    %20 = vector.broadcast %cst_17 : f32 to vector<50x32xf32>
    %21 = arith.maximumf %19, %20 : vector<50x32xf32>
    %c0_18 = arith.constant 0 : index
    %c0_19 = arith.constant 0 : index
    %c0_20 = arith.constant 0 : index
    %22 = vector.load %arg6[%c0_18, %c0_19, %c0_20] : memref<8x32x2xf32, #tpu.memory_space<vmem>>, vector<1x32x2xf32>
    %23 = vector.shape_cast %22 : vector<1x32x2xf32> to vector<32x2xf32>
    %cst_21 = arith.constant dense<0.000000e+00> : vector<50x2xf32>
    %24 = tpu.matmul %21, %23, %cst_21 {dimension_numbers = #tpu.dot_dimension_numbers<[1], [0], [0], [1], [0, 0, 1, 1], [], []>} : vector<50x32xf32>, vector<32x2xf32>, vector<50x2xf32> -> vector<50x2xf32>
    %c0_22 = arith.constant 0 : index
    %c0_23 = arith.constant 0 : index
    %c0_24 = arith.constant 0 : index
    %25 = vector.load %arg3[%c0_22, %c0_23, %c0_24] : memref<4x256x50xf32, #tpu.memory_space<vmem>>, vector<1x256x50xf32>
    %26 = vector.shape_cast %25 : vector<1x256x50xf32> to vector<256x50xf32>
    %cst_25 = arith.constant dense<0.000000e+00> : vector<256x2xf32>
    %27 = tpu.matmul %26, %24, %cst_25 {dimension_numbers = #tpu.dot_dimension_numbers<[1], [0], [0], [1], [0, 0, 1, 1], [], []>} : vector<256x50xf32>, vector<50x2xf32>, vector<256x2xf32> -> vector<256x2xf32>
    %28 = arith.addf %9, %27 : vector<256x2xf32>
    %c1 = arith.constant 1 : index
    %c0_26 = arith.constant 0 : index
    %c0_27 = arith.constant 0 : index
    %29 = vector.load %arg6[%c1, %c0_26, %c0_27] : memref<8x32x2xf32, #tpu.memory_space<vmem>>, vector<1x32x2xf32>
    %30 = vector.shape_cast %29 : vector<1x32x2xf32> to vector<32x2xf32>
    %cst_28 = arith.constant dense<0.000000e+00> : vector<50x2xf32>
    %31 = tpu.matmul %21, %30, %cst_28 {dimension_numbers = #tpu.dot_dimension_numbers<[1], [0], [0], [1], [0, 0, 1, 1], [], []>} : vector<50x32xf32>, vector<32x2xf32>, vector<50x2xf32> -> vector<50x2xf32>
    %c1_29 = arith.constant 1 : index
    %c0_30 = arith.constant 0 : index
    %c0_31 = arith.constant 0 : index
    %32 = vector.load %arg3[%c1_29, %c0_30, %c0_31] : memref<4x256x50xf32, #tpu.memory_space<vmem>>, vector<1x256x50xf32>
    %33 = vector.shape_cast %32 : vector<1x256x50xf32> to vector<256x50xf32>
    %cst_32 = arith.constant dense<0.000000e+00> : vector<256x2xf32>
    %34 = tpu.matmul %33, %31, %cst_32 {dimension_numbers = #tpu.dot_dimension_numbers<[1], [0], [0], [1], [0, 0, 1, 1], [], []>} : vector<256x50xf32>, vector<50x2xf32>, vector<256x2xf32> -> vector<256x2xf32>
    %35 = arith.addf %28, %34 : vector<256x2xf32>
    %c2 = arith.constant 2 : index
    %c0_33 = arith.constant 0 : index
    %c0_34 = arith.constant 0 : index
    %36 = vector.load %arg6[%c2, %c0_33, %c0_34] : memref<8x32x2xf32, #tpu.memory_space<vmem>>, vector<1x32x2xf32>
    %37 = vector.shape_cast %36 : vector<1x32x2xf32> to vector<32x2xf32>
    %cst_35 = arith.constant dense<0.000000e+00> : vector<50x2xf32>
    %38 = tpu.matmul %21, %37, %cst_35 {dimension_numbers = #tpu.dot_dimension_numbers<[1], [0], [0], [1], [0, 0, 1, 1], [], []>} : vector<50x32xf32>, vector<32x2xf32>, vector<50x2xf32> -> vector<50x2xf32>
    %c2_36 = arith.constant 2 : index
    %c0_37 = arith.constant 0 : index
    %c0_38 = arith.constant 0 : index
    %39 = vector.load %arg3[%c2_36, %c0_37, %c0_38] : memref<4x256x50xf32, #tpu.memory_space<vmem>>, vector<1x256x50xf32>
    %40 = vector.shape_cast %39 : vector<1x256x50xf32> to vector<256x50xf32>
    %cst_39 = arith.constant dense<0.000000e+00> : vector<256x2xf32>
    %41 = tpu.matmul %40, %38, %cst_39 {dimension_numbers = #tpu.dot_dimension_numbers<[1], [0], [0], [1], [0, 0, 1, 1], [], []>} : vector<256x50xf32>, vector<50x2xf32>, vector<256x2xf32> -> vector<256x2xf32>
    %42 = arith.addf %35, %41 : vector<256x2xf32>
    %c3 = arith.constant 3 : index
    %c0_40 = arith.constant 0 : index
    %c0_41 = arith.constant 0 : index
    %43 = vector.load %arg6[%c3, %c0_40, %c0_41] : memref<8x32x2xf32, #tpu.memory_space<vmem>>, vector<1x32x2xf32>
    %44 = vector.shape_cast %43 : vector<1x32x2xf32> to vector<32x2xf32>
    %cst_42 = arith.constant dense<0.000000e+00> : vector<50x2xf32>
    %45 = tpu.matmul %21, %44, %cst_42 {dimension_numbers = #tpu.dot_dimension_numbers<[1], [0], [0], [1], [0, 0, 1, 1], [], []>} : vector<50x32xf32>, vector<32x2xf32>, vector<50x2xf32> -> vector<50x2xf32>
    %c3_43 = arith.constant 3 : index
    %c0_44 = arith.constant 0 : index
    %c0_45 = arith.constant 0 : index
    %46 = vector.load %arg3[%c3_43, %c0_44, %c0_45] : memref<4x256x50xf32, #tpu.memory_space<vmem>>, vector<1x256x50xf32>
    %47 = vector.shape_cast %46 : vector<1x256x50xf32> to vector<256x50xf32>
    %cst_46 = arith.constant dense<0.000000e+00> : vector<256x2xf32>
    %48 = tpu.matmul %47, %45, %cst_46 {dimension_numbers = #tpu.dot_dimension_numbers<[1], [0], [0], [1], [0, 0, 1, 1], [], []>} : vector<256x50xf32>, vector<50x2xf32>, vector<256x2xf32> -> vector<256x2xf32>
    %49 = arith.addf %42, %48 : vector<256x2xf32>
    %c1_47 = arith.constant 1 : index
    %c0_48 = arith.constant 0 : index
    %c0_49 = arith.constant 0 : index
    %50 = vector.load %arg1[%c1_47, %c0_48, %c0_49] : memref<2x256x32xbf16, #tpu.memory_space<vmem>>, vector<1x256x32xbf16>
    %51 = vector.shape_cast %50 : vector<1x256x32xbf16> to vector<256x32xbf16>
    %c1_50 = arith.constant 1 : index
    %c0_51 = arith.constant 0 : index
    %c0_52 = arith.constant 0 : index
    %52 = vector.load %arg7[%c1_50, %c0_51, %c0_52] : memref<2x32x2xbf16, #tpu.memory_space<vmem>>, vector<1x32x2xbf16>
    %53 = vector.shape_cast %52 : vector<1x32x2xbf16> to vector<32x2xbf16>
    %cst_53 = arith.constant dense<0.000000e+00> : vector<256x2xf32>
    %54 = tpu.matmul %51, %53, %cst_53 {dimension_numbers = #tpu.dot_dimension_numbers<[1], [0], [0], [1], [0, 0, 1, 1], [], []>} : vector<256x32xbf16>, vector<32x2xbf16>, vector<256x2xf32> -> vector<256x2xf32>
    %55 = arith.addf %49, %54 : vector<256x2xf32>
    %56 = arith.extf %51 : vector<256x32xbf16> to vector<256x32xf32>
    %cst_54 = arith.constant dense<0.000000e+00> : vector<50x32xf32>
    %57 = tpu.matmul %0, %56, %cst_54 {dimension_numbers = #tpu.dot_dimension_numbers<[1], [0], [0], [1], [0, 0, 1, 1], [], []>} : vector<50x256xf32>, vector<256x32xf32>, vector<50x32xf32> -> vector<50x32xf32>
    %c1_55 = arith.constant 1 : index
    %c0_56 = arith.constant 0 : index
    %c0_57 = arith.constant 0 : index
    %58 = vector.load %arg4[%c1_55, %c0_56, %c0_57] : memref<2x32x32xbf16, #tpu.memory_space<vmem>>, vector<1x32x32xbf16>
    %59 = vector.shape_cast %58 : vector<1x32x32xbf16> to vector<32x32xbf16>
    %60 = arith.extf %59 : vector<32x32xbf16> to vector<32x32xf32>
    %cst_58 = arith.constant dense<0.000000e+00> : vector<50x32xf32>
    %61 = tpu.matmul %57, %60, %cst_58 {dimension_numbers = #tpu.dot_dimension_numbers<[1], [0], [0], [1], [0, 0, 1, 1], [], []>} : vector<50x32xf32>, vector<32x32xf32>, vector<50x32xf32> -> vector<50x32xf32>
    %c1_59 = arith.constant 1 : index
    %c0_60 = arith.constant 0 : index
    %c0_61 = arith.constant 0 : index
    %62 = vector.load %arg5[%c1_59, %c0_60, %c0_61] : memref<2x1x32xf32, #tpu.memory_space<vmem>>, vector<1x1x32xf32>
    %63 = vector.shape_cast %62 : vector<1x1x32xf32> to vector<1x32xf32>
    %64 = vector.broadcast %63 : vector<1x32xf32> to vector<50x32xf32>
    %65 = arith.addf %61, %64 : vector<50x32xf32>
    %cst_62 = arith.constant 0.000000e+00 : f32
    %66 = vector.broadcast %cst_62 : f32 to vector<50x32xf32>
    %67 = arith.maximumf %65, %66 : vector<50x32xf32>
    %c4 = arith.constant 4 : index
    %c0_63 = arith.constant 0 : index
    %c0_64 = arith.constant 0 : index
    %68 = vector.load %arg6[%c4, %c0_63, %c0_64] : memref<8x32x2xf32, #tpu.memory_space<vmem>>, vector<1x32x2xf32>
    %69 = vector.shape_cast %68 : vector<1x32x2xf32> to vector<32x2xf32>
    %cst_65 = arith.constant dense<0.000000e+00> : vector<50x2xf32>
    %70 = tpu.matmul %67, %69, %cst_65 {dimension_numbers = #tpu.dot_dimension_numbers<[1], [0], [0], [1], [0, 0, 1, 1], [], []>} : vector<50x32xf32>, vector<32x2xf32>, vector<50x2xf32> -> vector<50x2xf32>
    %c0_66 = arith.constant 0 : index
    %c0_67 = arith.constant 0 : index
    %c0_68 = arith.constant 0 : index
    %71 = vector.load %arg3[%c0_66, %c0_67, %c0_68] : memref<4x256x50xf32, #tpu.memory_space<vmem>>, vector<1x256x50xf32>
    %72 = vector.shape_cast %71 : vector<1x256x50xf32> to vector<256x50xf32>
    %cst_69 = arith.constant dense<0.000000e+00> : vector<256x2xf32>
    %73 = tpu.matmul %72, %70, %cst_69 {dimension_numbers = #tpu.dot_dimension_numbers<[1], [0], [0], [1], [0, 0, 1, 1], [], []>} : vector<256x50xf32>, vector<50x2xf32>, vector<256x2xf32> -> vector<256x2xf32>
    %74 = arith.addf %55, %73 : vector<256x2xf32>
    %c5 = arith.constant 5 : index
    %c0_70 = arith.constant 0 : index
    %c0_71 = arith.constant 0 : index
    %75 = vector.load %arg6[%c5, %c0_70, %c0_71] : memref<8x32x2xf32, #tpu.memory_space<vmem>>, vector<1x32x2xf32>
    %76 = vector.shape_cast %75 : vector<1x32x2xf32> to vector<32x2xf32>
    %cst_72 = arith.constant dense<0.000000e+00> : vector<50x2xf32>
    %77 = tpu.matmul %67, %76, %cst_72 {dimension_numbers = #tpu.dot_dimension_numbers<[1], [0], [0], [1], [0, 0, 1, 1], [], []>} : vector<50x32xf32>, vector<32x2xf32>, vector<50x2xf32> -> vector<50x2xf32>
    %c1_73 = arith.constant 1 : index
    %c0_74 = arith.constant 0 : index
    %c0_75 = arith.constant 0 : index
    %78 = vector.load %arg3[%c1_73, %c0_74, %c0_75] : memref<4x256x50xf32, #tpu.memory_space<vmem>>, vector<1x256x50xf32>
    %79 = vector.shape_cast %78 : vector<1x256x50xf32> to vector<256x50xf32>
    %cst_76 = arith.constant dense<0.000000e+00> : vector<256x2xf32>
    %80 = tpu.matmul %79, %77, %cst_76 {dimension_numbers = #tpu.dot_dimension_numbers<[1], [0], [0], [1], [0, 0, 1, 1], [], []>} : vector<256x50xf32>, vector<50x2xf32>, vector<256x2xf32> -> vector<256x2xf32>
    %81 = arith.addf %74, %80 : vector<256x2xf32>
    %c6 = arith.constant 6 : index
    %c0_77 = arith.constant 0 : index
    %c0_78 = arith.constant 0 : index
    %82 = vector.load %arg6[%c6, %c0_77, %c0_78] : memref<8x32x2xf32, #tpu.memory_space<vmem>>, vector<1x32x2xf32>
    %83 = vector.shape_cast %82 : vector<1x32x2xf32> to vector<32x2xf32>
    %cst_79 = arith.constant dense<0.000000e+00> : vector<50x2xf32>
    %84 = tpu.matmul %67, %83, %cst_79 {dimension_numbers = #tpu.dot_dimension_numbers<[1], [0], [0], [1], [0, 0, 1, 1], [], []>} : vector<50x32xf32>, vector<32x2xf32>, vector<50x2xf32> -> vector<50x2xf32>
    %c2_80 = arith.constant 2 : index
    %c0_81 = arith.constant 0 : index
    %c0_82 = arith.constant 0 : index
    %85 = vector.load %arg3[%c2_80, %c0_81, %c0_82] : memref<4x256x50xf32, #tpu.memory_space<vmem>>, vector<1x256x50xf32>
    %86 = vector.shape_cast %85 : vector<1x256x50xf32> to vector<256x50xf32>
    %cst_83 = arith.constant dense<0.000000e+00> : vector<256x2xf32>
    %87 = tpu.matmul %86, %84, %cst_83 {dimension_numbers = #tpu.dot_dimension_numbers<[1], [0], [0], [1], [0, 0, 1, 1], [], []>} : vector<256x50xf32>, vector<50x2xf32>, vector<256x2xf32> -> vector<256x2xf32>
    %88 = arith.addf %81, %87 : vector<256x2xf32>
    %c7 = arith.constant 7 : index
    %c0_84 = arith.constant 0 : index
    %c0_85 = arith.constant 0 : index
    %89 = vector.load %arg6[%c7, %c0_84, %c0_85] : memref<8x32x2xf32, #tpu.memory_space<vmem>>, vector<1x32x2xf32>
    %90 = vector.shape_cast %89 : vector<1x32x2xf32> to vector<32x2xf32>
    %cst_86 = arith.constant dense<0.000000e+00> : vector<50x2xf32>
    %91 = tpu.matmul %67, %90, %cst_86 {dimension_numbers = #tpu.dot_dimension_numbers<[1], [0], [0], [1], [0, 0, 1, 1], [], []>} : vector<50x32xf32>, vector<32x2xf32>, vector<50x2xf32> -> vector<50x2xf32>
    %c3_87 = arith.constant 3 : index
    %c0_88 = arith.constant 0 : index
    %c0_89 = arith.constant 0 : index
    %92 = vector.load %arg3[%c3_87, %c0_88, %c0_89] : memref<4x256x50xf32, #tpu.memory_space<vmem>>, vector<1x256x50xf32>
    %93 = vector.shape_cast %92 : vector<1x256x50xf32> to vector<256x50xf32>
    %cst_90 = arith.constant dense<0.000000e+00> : vector<256x2xf32>
    %94 = tpu.matmul %93, %91, %cst_90 {dimension_numbers = #tpu.dot_dimension_numbers<[1], [0], [0], [1], [0, 0, 1, 1], [], []>} : vector<256x50xf32>, vector<50x2xf32>, vector<256x2xf32> -> vector<256x2xf32>
    %95 = arith.addf %88, %94 : vector<256x2xf32>
    %cst_91 = arith.constant dense<0xFF800000> : vector<256xf32>
    %96 = vector.multi_reduction <maximumf>, %95, %cst_91 [1] : vector<256x2xf32> to vector<256xf32>
    %97 = vector.shape_cast %96 : vector<256xf32> to vector<256x1xf32>
    %98 = vector.broadcast %97 : vector<256x1xf32> to vector<256x2xf32>
    %99 = arith.subf %95, %98 : vector<256x2xf32>
    %100 = math.exp %99 : vector<256x2xf32>
    %cst_92 = arith.constant dense<0.000000e+00> : vector<256xf32>
    %101 = vector.multi_reduction <add>, %100, %cst_92 [1] : vector<256x2xf32> to vector<256xf32>
    %102 = vector.shape_cast %101 : vector<256xf32> to vector<256x1xf32>
    %103 = math.log %102 : vector<256x1xf32>
    %104 = arith.addf %97, %103 : vector<256x1xf32>
    %105 = vector.broadcast %104 : vector<256x1xf32> to vector<256x2xf32>
    %106 = arith.subf %95, %105 : vector<256x2xf32>
    %c0_93 = arith.constant 0 : index
    %c0_94 = arith.constant 0 : index
    %c0_95 = arith.constant 0 : index
    %107 = vector.load %arg9[%c0_93, %c0_94, %c0_95] : memref<1x256x2xf32, #tpu.memory_space<vmem>>, vector<1x256x2xf32>
    %108 = vector.shape_cast %107 : vector<1x256x2xf32> to vector<256x2xf32>
    %109 = vector.shape_cast %106 : vector<256x2xf32> to vector<1x256x2xf32>
    tpu.vector_store %arg9[%c0_93, %c0_94, %c0_95], %109 {strides = array<i32>} : memref<1x256x2xf32, #tpu.memory_space<vmem>>, vector<1x256x2xf32>,
    return
  }
  func.func @transform_0(%arg0: i32) -> (i32, i32, i32) {
    %c0_i32 = arith.constant 0 : i32
    %c0_i32_0 = arith.constant 0 : i32
    %c0_i32_1 = arith.constant 0 : i32
    return %c0_i32, %arg0, %c0_i32_0 : i32, i32, i32
  }
  func.func @transform_1(%arg0: i32) -> (i32, i32) {
    %c0_i32 = arith.constant 0 : i32
    %c0_i32_0 = arith.constant 0 : i32
    %c0_i32_1 = arith.constant 0 : i32
    return %c0_i32, %c0_i32_0 : i32, i32
  }
  func.func @transform_2(%arg0: i32) -> (i32, i32, i32) {
    %c0_i32 = arith.constant 0 : i32
    %c0_i32_0 = arith.constant 0 : i32
    %c0_i32_1 = arith.constant 0 : i32
    %c0_i32_2 = arith.constant 0 : i32
    return %c0_i32, %c0_i32_0, %c0_i32_1 : i32, i32, i32
  }
  func.func @transform_3(%arg0: i32) -> (i32, i32, i32) {
    %c0_i32 = arith.constant 0 : i32
    %c0_i32_0 = arith.constant 0 : i32
    %c0_i32_1 = arith.constant 0 : i32
    %c0_i32_2 = arith.constant 0 : i32
    return %c0_i32, %c0_i32_0, %c0_i32_1 : i32, i32, i32
  }
  func.func @transform_4(%arg0: i32) -> (i32, i32, i32) {
    %c0_i32 = arith.constant 0 : i32
    %c0_i32_0 = arith.constant 0 : i32
    %c0_i32_1 = arith.constant 0 : i32
    %c0_i32_2 = arith.constant 0 : i32
    return %c0_i32, %c0_i32_0, %c0_i32_1 : i32, i32, i32
  }
  func.func @transform_5(%arg0: i32) -> (i32, i32, i32) {
    %c0_i32 = arith.constant 0 : i32
    %c0_i32_0 = arith.constant 0 : i32
    %c0_i32_1 = arith.constant 0 : i32
    %c0_i32_2 = arith.constant 0 : i32
    return %c0_i32, %c0_i32_0, %c0_i32_1 : i32, i32, i32
  }
  func.func @transform_6(%arg0: i32) -> (i32, i32, i32) {
    %c0_i32 = arith.constant 0 : i32
    %c0_i32_0 = arith.constant 0 : i32
    %c0_i32_1 = arith.constant 0 : i32
    %c0_i32_2 = arith.constant 0 : i32
    return %c0_i32, %c0_i32_0, %c0_i32_1 : i32, i32, i32
  }
  func.func @transform_7(%arg0: i32) -> (i32, i32) {
    %c0_i32 = arith.constant 0 : i32
    %c0_i32_0 = arith.constant 0 : i32
    %c0_i32_1 = arith.constant 0 : i32
    return %c0_i32, %c0_i32_0 : i32, i32
  }
  func.func @transform_8(%arg0: i32) -> (i32, i32, i32) {
    %c0_i32 = arith.constant 0 : i32
    %c0_i32_0 = arith.constant 0 : i32
    %c0_i32_1 = arith.constant 0 : i32
    return %arg0, %c0_i32, %c0_i32_0 : i32, i32, i32
  }
}

</mosaic_0001>

<bundles_post_ra>
// kernel: psp2s_forward.2
= control target key start
LH: loop header
LB: loop body
LE: loop exit
PB: predicated region body
PF: predicated region fallthrough
CT: control target
= control target key end

     0   :  { %s1359_s12 = smov 0   ;;  %s1361_s13 = smov 0   ;;  %s1674_s0 = inlined_call_operand.vmem [shape: bf16[2,512,36], index: 0, kind: input, shape index: {}]   ;;  %s1675_s1 = inlined_call_operand.vmem [shape: bf16[2,36,32], index: 1, kind: input, shape index: {}]   ;;  %s1676_s2 = inlined_call_operand.vmem [shape: f32[2,1,32], index: 2, kind: input, shape index: {}]   ;;  %s1677_s3 = inlined_call_operand.vmem [shape: bf16[2,512,32], index: 3, kind: output, shape index: {}]  }
   0x1   :  { %s1363_s14 = smov 0  }
   0x2 LB: > { %s25_s15 = sadd.s32 1, %s1333_s13  ;;  %p1068_p0 = scmp.ge.s32.totalorder %s1337_s14, 1  ;;  %s1337_s14 = sphi %s1363_s14, %s13_s14   ;;  %s1333_s13 = sphi %s1361_s13, %s1679_s13   ;;  %s1329_s12 = sphi %s1359_s12, %s1678_s12  }
   0x3   : > { %p27_p1 = scmp.ge.s32.totalorder %s25_s15, 2  ;;  %p176_p2 = scmp.lt.s32.totalorder %s1337_s14, 3 }
   0x5   : > { %s1681_s15 = smov (%p27_p1, %s25_s15), 0  ;;  %p177_p3 = pnand %p1068_p0, %p176_p2 }
   0x6   : > { %p217_p4 = scmp.lt.s32.totalorder (!%p177_p3), %s1329_s12, 1 }
   0x7   : > { %180 = sbr.rel (%p177_p3) target bundleno = 294 (0x126), region = 32 }
   0xc   : > { %s1683_s12 = smov (!%p217_p4, %s1329_s12), 1  ;;  %vm590_vm0 = vcmask 1041408   ;;  %vm493_vm1 = vcmask 293888   ;;  %vm891_vm2 = vcmask 257024  }
   0xd   : > { %s1289_s16 = smul.u32 20, %s1683_s12  ;;  %s233_s19 = scalar_lea.vmem %s1676_s2, %s1683_s12 }
   0xe   : > { %s1244_s23 = sshll.u32 %s1683_s12, 8  ;;  %v1464_v38 = vld [vmem:[%s233_s19] ss:$0 sm:$0xff] }
   0xf   : > { %s230_s22 = scalar_lea.vmem %s1675_s1, %s1289_s16  ;;  %s1393_s26 = scalar_lea.vmem %s1674_s0, %s1244_s23 }
  0x10   : > { %v313_v0 = vld [vmem:[%s230_s22 + $0x10] sm:$0x3]  ;;  %v1279_v4 = vld [vmem:[%s230_s22 + $0x8] sm:$0xff]  ;;  %v1278_v5 = vld [vmem:[%s230_s22] sm:$0xff]  ;;  %s1473_s4 = scalar_lea.vmem %s1677_s3, %s1244_s23 }
  0x11   : > { %v487_v1 = vunpack.c.l.b16 %v313_v0  ;;  %v1246_v6 = vld [vmem:[%s1393_s26] sm:$0xff]  ;;  %v1247_v10 = vld [vmem:[%s1393_s26 + $0x8] sm:$0xff]  ;;  %v1248_v14 = vld [vmem:[%s1393_s26 + $0x10] sm:$0xff] }
  0x12   : > { %v1254_v7 = vld [vmem:[%s1393_s26 + $0x40] sm:$0xff]  ;;  %v1255_v11 = vld [vmem:[%s1393_s26 + $0x48] sm:$0xff]  ;;  %v1256_v15 = vld [vmem:[%s1393_s26 + $0x50] sm:$0xff] }
  0x13   : > { %v490_v2 = vpack.c.b16 %v487_v1, %v487_v1  ;;  %v1262_v8 = vld [vmem:[%s1393_s26 + $0x80] sm:$0xff]  ;;  %v1263_v12 = vld [vmem:[%s1393_s26 + $0x88] sm:$0xff]  ;;  %v1264_v16 = vld [vmem:[%s1393_s26 + $0x90] sm:$0xff] }
  0x14   : > { %v1270_v9 = vld [vmem:[%s1393_s26 + $0xc0] sm:$0xff]  ;;  %v1271_v13 = vld [vmem:[%s1393_s26 + $0xc8] sm:$0xff]  ;;  %v1272_v17 = vld [vmem:[%s1393_s26 + $0xd0] sm:$0xff] }
  0x15   : > { %v592_v3 = vsel %vm590_vm0, %v490_v2, 0  ;;  %v1249_v18 = vld [vmem:[%s1393_s26 + $0x18] sm:$0xff]  ;;  %v1250_v22 = vld [vmem:[%s1393_s26 + $0x20] sm:$0xff]  ;;  %v1251_v26 = vld [vmem:[%s1393_s26 + $0x28] sm:$0xff] }
  0x16   : > { %599 = vmatpush.bf16.msra.mxu0 %v592_v3  ;;  %1280 = vmatpush.bf16.msra.mxu1 %v592_v3  ;;  %v1257_v19 = vld [vmem:[%s1393_s26 + $0x58] sm:$0xff]  ;;  %v1258_v23 = vld [vmem:[%s1393_s26 + $0x60] sm:$0xff]  ;;  %v1259_v27 = vld [vmem:[%s1393_s26 + $0x68] sm:$0xff] }
  0x17   : > { %1281 = vmatpush.bf16.msra.mxu2 %v592_v3  ;;  %1282 = vmatpush.bf16.msra.mxu3 %v592_v3  ;;  %v1265_v20 = vld [vmem:[%s1393_s26 + $0x98] sm:$0xff]  ;;  %v1266_v24 = vld [vmem:[%s1393_s26 + $0xa0] sm:$0xff]  ;;  %v1267_v28 = vld [vmem:[%s1393_s26 + $0xa8] sm:$0xff] }
  0x18   : > { %v1273_v21 = vld [vmem:[%s1393_s26 + $0xd8] sm:$0xff]  ;;  %v1274_v25 = vld [vmem:[%s1393_s26 + $0xe0] sm:$0xff]  ;;  %v1275_v29 = vld [vmem:[%s1393_s26 + $0xe8] sm:$0xff] }
  0x19   : > { %v1252_v30 = vld [vmem:[%s1393_s26 + $0x30] sm:$0xff]  ;;  %v1253_v34 = vld [vmem:[%s1393_s26 + $0x38] sm:$0xff] }
  0x1a   : > { %600 = vmatpush.bf16.msra.mxu0 %v1279_v4  ;;  %1283 = vmatpush.bf16.msra.mxu1 %v1279_v4  ;;  %v1260_v31 = vld [vmem:[%s1393_s26 + $0x70] sm:$0xff]  ;;  %v1261_v35 = vld [vmem:[%s1393_s26 + $0x78] sm:$0xff] }
  0x1b   : > { %1284 = vmatpush.bf16.msra.mxu2 %v1279_v4  ;;  %1285 = vmatpush.bf16.msra.mxu3 %v1279_v4  ;;  %v1268_v32 = vld [vmem:[%s1393_s26 + $0xb0] sm:$0xff]  ;;  %v1269_v36 = vld [vmem:[%s1393_s26 + $0xb8] sm:$0xff] }
  0x1c   : > { %v1276_v33 = vld [vmem:[%s1393_s26 + $0xf0] sm:$0xff]  ;;  %v1277_v37 = vld [vmem:[%s1393_s26 + $0xf8] sm:$0xff] }
  0x1e   : > { %601 = vmatpush.bf16.msra.mxu0 %v1278_v5  ;;  %1286 = vmatpush.bf16.msra.mxu1 %v1278_v5 }
  0x1f   : > { %1287 = vmatpush.bf16.msra.mxu2 %v1278_v5  ;;  %1288 = vmatpush.bf16.msra.mxu3 %v1278_v5 }
  0x21   : > { %1210 = vmatmul.msk.bf16.vlgmr.msra.gmra.mxu0 %vm493_vm1, %v1246_v6  ;;  %1218 = vmatmul.msk.bf16.vlgmr.msra.gmra.mxu1 %vm493_vm1, %v1254_v7 }
  0x22   : > { %1226 = vmatmul.msk.bf16.vlgmr.msra.gmra.mxu2 %vm493_vm1, %v1262_v8  ;;  %1234 = vmatmul.msk.bf16.vlgmr.msra.gmra.mxu3 %vm493_vm1, %v1270_v9 }
  0x31   : > { %1211 = vmatmul.msk.bf16.gmra.mxu0 %vm493_vm1, %v1247_v10  ;;  %1219 = vmatmul.msk.bf16.gmra.mxu1 %vm493_vm1, %v1255_v11 }
  0x32   : > { %1227 = vmatmul.msk.bf16.gmra.mxu2 %vm493_vm1, %v1263_v12  ;;  %1235 = vmatmul.msk.bf16.gmra.mxu3 %vm493_vm1, %v1271_v13 }
  0x41   : > { %1212 = vmatmul.msk.bf16.gmra.mxu0 %vm493_vm1, %v1248_v14  ;;  %1220 = vmatmul.msk.bf16.gmra.mxu1 %vm493_vm1, %v1256_v15 }
  0x42   : > { %1228 = vmatmul.msk.bf16.gmra.mxu2 %vm493_vm1, %v1264_v16  ;;  %1236 = vmatmul.msk.bf16.gmra.mxu3 %vm493_vm1, %v1272_v17 }
  0x51   : > { %1213 = vmatmul.msk.bf16.gmra.mxu0 %vm493_vm1, %v1249_v18  ;;  %1221 = vmatmul.msk.bf16.gmra.mxu1 %vm493_vm1, %v1257_v19 }
  0x52   : > { %1229 = vmatmul.msk.bf16.gmra.mxu2 %vm493_vm1, %v1265_v20  ;;  %1237 = vmatmul.msk.bf16.gmra.mxu3 %vm493_vm1, %v1273_v21 }
  0x61   : > { %1214 = vmatmul.msk.bf16.gmra.mxu0 %vm493_vm1, %v1250_v22  ;;  %1222 = vmatmul.msk.bf16.gmra.mxu1 %vm493_vm1, %v1258_v23 }
  0x62   : > { %1230 = vmatmul.msk.bf16.gmra.mxu2 %vm493_vm1, %v1266_v24  ;;  %1238 = vmatmul.msk.bf16.gmra.mxu3 %vm493_vm1, %v1274_v25 }
  0x71   : > { %1215 = vmatmul.msk.bf16.gmra.mxu0 %vm493_vm1, %v1251_v26  ;;  %1223 = vmatmul.msk.bf16.gmra.mxu1 %vm493_vm1, %v1259_v27 }
  0x72   : > { %1231 = vmatmul.msk.bf16.gmra.mxu2 %vm493_vm1, %v1267_v28  ;;  %1239 = vmatmul.msk.bf16.gmra.mxu3 %vm493_vm1, %v1275_v29 }
  0x81   : > { %1216 = vmatmul.msk.bf16.gmra.mxu0 %vm493_vm1, %v1252_v30  ;;  %1224 = vmatmul.msk.bf16.gmra.mxu1 %vm493_vm1, %v1260_v31 }
  0x82   : > { %1232 = vmatmul.msk.bf16.gmra.mxu2 %vm493_vm1, %v1268_v32  ;;  %1240 = vmatmul.msk.bf16.gmra.mxu3 %vm493_vm1, %v1276_v33 }
  0x91   : > { %1217 = vmatmul.msk.bf16.gmra.mxu0 %vm493_vm1, %v1253_v34  ;;  %1225 = vmatmul.msk.bf16.gmra.mxu1 %vm493_vm1, %v1261_v35 }
  0x92   : > { %1233 = vmatmul.msk.bf16.gmra.mxu2 %vm493_vm1, %v1269_v36  ;;  %1241 = vmatmul.msk.bf16.gmra.mxu3 %vm493_vm1, %v1277_v37 }
  0x9e   : > { %v603_v39 = vpop.f32.mrf.mxu0  ;;  %v643_v40 = vpop.f32.mrf.mxu1 }
  0x9f   : > { %v604_v41 = vadd.f32 %v1464_v38, %v603_v39  ;;  %v644_v42 = vadd.f32 %v1464_v38, %v643_v40 }
  0xa1   : > { %v763_v43 = vmax.f32 %v604_v41, 0.0  ;;  %v779_v44 = vmax.f32 %v644_v42, 0.0 }
  0xa3   : > { %v827_v45 = vpack.c.bf16 %v763_v43, %v763_v43  ;;  %v843_v46 = vpack.c.bf16 %v779_v44, %v779_v44 }
  0xa5   : > { %892 = vst.msk [vmem:[%s1473_s4] sm:$0xf] %vm891_vm2, %v827_v45  ;;  %v683_v47 = vpop.f32.mrf.mxu2  ;;  %v723_v48 = vpop.f32.mrf.mxu3 }
  0xa6   : > { %908 = vst.msk [vmem:[%s1473_s4 + $0x40] sm:$0xf] %vm891_vm2, %v843_v46  ;;  %v684_v49 = vadd.f32 %v1464_v38, %v683_v47  ;;  %v724_v50 = vadd.f32 %v1464_v38, %v723_v48  ;;  %v605_v51 = vpop.f32.mrf.mxu0  ;;  %v645_v52 = vpop.f32.mrf.mxu1 }
  0xa7   : > { %v606_v53 = vadd.f32 %v1464_v38, %v605_v51  ;;  %v646_v54 = vadd.f32 %v1464_v38, %v645_v52 }
  0xa8   : > { %v795_v55 = vmax.f32 %v684_v49, 0.0  ;;  %v811_v56 = vmax.f32 %v724_v50, 0.0 }
  0xa9   : > { %v764_v57 = vmax.f32 %v606_v53, 0.0  ;;  %v780_v58 = vmax.f32 %v646_v54, 0.0 }
  0xaa   : > { %v859_v59 = vpack.c.bf16 %v795_v55, %v795_v55  ;;  %v875_v60 = vpack.c.bf16 %v811_v56, %v811_v56 }
  0xab   : > { %v828_v61 = vpack.c.bf16 %v764_v57, %v764_v57  ;;  %v844_v62 = vpack.c.bf16 %v780_v58, %v780_v58 }
  0xac   : > { %924 = vst.msk [vmem:[%s1473_s4 + $0x80] sm:$0xf] %vm891_vm2, %v859_v59 }
  0xad   : > { %940 = vst.msk [vmem:[%s1473_s4 + $0xc0] sm:$0xf] %vm891_vm2, %v875_v60  ;;  %v685_v63 = vpop.f32.mrf.mxu2  ;;  %v725_v0 = vpop.f32.mrf.mxu3 }
  0xae   : > { %893 = vst.msk [vmem:[%s1473_s4 + $0x4] sm:$0xf] %vm891_vm2, %v828_v61  ;;  %v686_v1 = vadd.f32 %v1464_v38, %v685_v63  ;;  %v726_v2 = vadd.f32 %v1464_v38, %v725_v0  ;;  %v608_v3 = vpop.f32.mrf.mxu0  ;;  %v648_v4 = vpop.f32.mrf.mxu1 }
  0xaf   : > { %909 = vst.msk [vmem:[%s1473_s4 + $0x44] sm:$0xf] %vm891_vm2, %v844_v62  ;;  %v609_v5 = vadd.f32 %v1464_v38, %v608_v3  ;;  %v649_v6 = vadd.f32 %v1464_v38, %v648_v4 }
  0xb0   : > { %v796_v7 = vmax.f32 %v686_v1, 0.0  ;;  %v812_v8 = vmax.f32 %v726_v2, 0.0 }
  0xb1   : > { %v765_v9 = vmax.f32 %v609_v5, 0.0  ;;  %v781_v10 = vmax.f32 %v649_v6, 0.0 }
  0xb2   : > { %v860_v11 = vpack.c.bf16 %v796_v7, %v796_v7  ;;  %v876_v12 = vpack.c.bf16 %v812_v8, %v812_v8 }
  0xb3   : > { %v829_v13 = vpack.c.bf16 %v765_v9, %v765_v9  ;;  %v845_v14 = vpack.c.bf16 %v781_v10, %v781_v10 }
  0xb4   : > { %925 = vst.msk [vmem:[%s1473_s4 + $0x84] sm:$0xf] %vm891_vm2, %v860_v11 }
  0xb5   : > { %941 = vst.msk [vmem:[%s1473_s4 + $0xc4] sm:$0xf] %vm891_vm2, %v876_v12  ;;  %v688_v15 = vpop.f32.mrf.mxu2  ;;  %v728_v16 = vpop.f32.mrf.mxu3 }
  0xb6   : > { %894 = vst.msk [vmem:[%s1473_s4 + $0x8] sm:$0xf] %vm891_vm2, %v829_v13  ;;  %v689_v17 = vadd.f32 %v1464_v38, %v688_v15  ;;  %v729_v18 = vadd.f32 %v1464_v38, %v728_v16  ;;  %v610_v19 = vpop.f32.mrf.mxu0  ;;  %v650_v20 = vpop.f32.mrf.mxu1 }
  0xb7   : > { %910 = vst.msk [vmem:[%s1473_s4 + $0x48] sm:$0xf] %vm891_vm2, %v845_v14  ;;  %v611_v21 = vadd.f32 %v1464_v38, %v610_v19  ;;  %v651_v22 = vadd.f32 %v1464_v38, %v650_v20 }
  0xb8   : > { %v797_v23 = vmax.f32 %v689_v17, 0.0  ;;  %v813_v24 = vmax.f32 %v729_v18, 0.0 }
  0xb9   : > { %v766_v25 = vmax.f32 %v611_v21, 0.0  ;;  %v782_v26 = vmax.f32 %v651_v22, 0.0 }
  0xba   : > { %v861_v27 = vpack.c.bf16 %v797_v23, %v797_v23  ;;  %v877_v28 = vpack.c.bf16 %v813_v24, %v813_v24 }
  0xbb   : > { %v830_v29 = vpack.c.bf16 %v766_v25, %v766_v25  ;;  %v846_v30 = vpack.c.bf16 %v782_v26, %v782_v26 }
  0xbc   : > { %926 = vst.msk [vmem:[%s1473_s4 + $0x88] sm:$0xf] %vm891_vm2, %v861_v27 }
  0xbd   : > { %942 = vst.msk [vmem:[%s1473_s4 + $0xc8] sm:$0xf] %vm891_vm2, %v877_v28  ;;  %v690_v31 = vpop.f32.mrf.mxu2  ;;  %v730_v32 = vpop.f32.mrf.mxu3 }
  0xbe   : > { %895 = vst.msk [vmem:[%s1473_s4 + $0xc] sm:$0xf] %vm891_vm2, %v830_v29  ;;  %v691_v33 = vadd.f32 %v1464_v38, %v690_v31  ;;  %v731_v34 = vadd.f32 %v1464_v38, %v730_v32  ;;  %v613_v35 = vpop.f32.mrf.mxu0  ;;  %v653_v36 = vpop.f32.mrf.mxu1 }
  0xbf   : > { %911 = vst.msk [vmem:[%s1473_s4 + $0x4c] sm:$0xf] %vm891_vm2, %v846_v30  ;;  %v614_v37 = vadd.f32 %v1464_v38, %v613_v35  ;;  %v654_v39 = vadd.f32 %v1464_v38, %v653_v36 }
  0xc0   : > { %v798_v40 = vmax.f32 %v691_v33, 0.0  ;;  %v814_v41 = vmax.f32 %v731_v34, 0.0 }
  0xc1   : > { %v767_v42 = vmax.f32 %v614_v37, 0.0  ;;  %v783_v43 = vmax.f32 %v654_v39, 0.0 }
  0xc2   : > { %v862_v44 = vpack.c.bf16 %v798_v40, %v798_v40  ;;  %v878_v45 = vpack.c.bf16 %v814_v41, %v814_v41 }
  0xc3   : > { %v831_v46 = vpack.c.bf16 %v767_v42, %v767_v42  ;;  %v847_v47 = vpack.c.bf16 %v783_v43, %v783_v43 }
  0xc4   : > { %927 = vst.msk [vmem:[%s1473_s4 + $0x8c] sm:$0xf] %vm891_vm2, %v862_v44 }
  0xc5   : > { %943 = vst.msk [vmem:[%s1473_s4 + $0xcc] sm:$0xf] %vm891_vm2, %v878_v45  ;;  %v693_v48 = vpop.f32.mrf.mxu2  ;;  %v733_v49 = vpop.f32.mrf.mxu3 }
  0xc6   : > { %896 = vst.msk [vmem:[%s1473_s4 + $0x10] sm:$0xf] %vm891_vm2, %v831_v46  ;;  %v694_v50 = vadd.f32 %v1464_v38, %v693_v48  ;;  %v734_v51 = vadd.f32 %v1464_v38, %v733_v49  ;;  %v615_v52 = vpop.f32.mrf.mxu0  ;;  %v655_v53 = vpop.f32.mrf.mxu1 }
  0xc7   : > { %912 = vst.msk [vmem:[%s1473_s4 + $0x50] sm:$0xf] %vm891_vm2, %v847_v47  ;;  %v616_v54 = vadd.f32 %v1464_v38, %v615_v52  ;;  %v656_v55 = vadd.f32 %v1464_v38, %v655_v53 }
  0xc8   : > { %v799_v56 = vmax.f32 %v694_v50, 0.0  ;;  %v815_v57 = vmax.f32 %v734_v51, 0.0 }
  0xc9   : > { %v768_v58 = vmax.f32 %v616_v54, 0.0  ;;  %v784_v59 = vmax.f32 %v656_v55, 0.0 }
  0xca   : > { %v863_v60 = vpack.c.bf16 %v799_v56, %v799_v56  ;;  %v879_v61 = vpack.c.bf16 %v815_v57, %v815_v57 }
  0xcb   : > { %v832_v62 = vpack.c.bf16 %v768_v58, %v768_v58  ;;  %v848_v63 = vpack.c.bf16 %v784_v59, %v784_v59 }
  0xcc   : > { %928 = vst.msk [vmem:[%s1473_s4 + $0x90] sm:$0xf] %vm891_vm2, %v863_v60 }
  0xcd   : > { %944 = vst.msk [vmem:[%s1473_s4 + $0xd0] sm:$0xf] %vm891_vm2, %v879_v61  ;;  %v695_v0 = vpop.f32.mrf.mxu2  ;;  %v735_v1 = vpop.f32.mrf.mxu3 }
  0xce   : > { %897 = vst.msk [vmem:[%s1473_s4 + $0x14] sm:$0xf] %vm891_vm2, %v832_v62  ;;  %v696_v2 = vadd.f32 %v1464_v38, %v695_v0  ;;  %v736_v3 = vadd.f32 %v1464_v38, %v735_v1  ;;  %v618_v4 = vpop.f32.mrf.mxu0  ;;  %v658_v5 = vpop.f32.mrf.mxu1 }
  0xcf   : > { %913 = vst.msk [vmem:[%s1473_s4 + $0x54] sm:$0xf] %vm891_vm2, %v848_v63  ;;  %v619_v6 = vadd.f32 %v1464_v38, %v618_v4  ;;  %v659_v7 = vadd.f32 %v1464_v38, %v658_v5 }
  0xd0   : > { %v800_v8 = vmax.f32 %v696_v2, 0.0  ;;  %v816_v9 = vmax.f32 %v736_v3, 0.0 }
  0xd1   : > { %v769_v10 = vmax.f32 %v619_v6, 0.0  ;;  %v785_v11 = vmax.f32 %v659_v7, 0.0 }
  0xd2   : > { %v864_v12 = vpack.c.bf16 %v800_v8, %v800_v8  ;;  %v880_v13 = vpack.c.bf16 %v816_v9, %v816_v9 }
  0xd3   : > { %v833_v14 = vpack.c.bf16 %v769_v10, %v769_v10  ;;  %v849_v15 = vpack.c.bf16 %v785_v11, %v785_v11 }
  0xd4   : > { %929 = vst.msk [vmem:[%s1473_s4 + $0x94] sm:$0xf] %vm891_vm2, %v864_v12 }
  0xd5   : > { %945 = vst.msk [vmem:[%s1473_s4 + $0xd4] sm:$0xf] %vm891_vm2, %v880_v13  ;;  %v698_v16 = vpop.f32.mrf.mxu2  ;;  %v738_v17 = vpop.f32.mrf.mxu3 }
  0xd6   : > { %898 = vst.msk [vmem:[%s1473_s4 + $0x18] sm:$0xf] %vm891_vm2, %v833_v14  ;;  %v699_v18 = vadd.f32 %v1464_v38, %v698_v16  ;;  %v739_v19 = vadd.f32 %v1464_v38, %v738_v17  ;;  %v620_v20 = vpop.f32.mrf.mxu0  ;;  %v660_v21 = vpop.f32.mrf.mxu1 }
  0xd7   : > { %914 = vst.msk [vmem:[%s1473_s4 + $0x58] sm:$0xf] %vm891_vm2, %v849_v15  ;;  %v621_v22 = vadd.f32 %v1464_v38, %v620_v20  ;;  %v661_v23 = vadd.f32 %v1464_v38, %v660_v21 }
  0xd8   : > { %v801_v24 = vmax.f32 %v699_v18, 0.0  ;;  %v817_v25 = vmax.f32 %v739_v19, 0.0 }
  0xd9   : > { %v770_v26 = vmax.f32 %v621_v22, 0.0  ;;  %v786_v27 = vmax.f32 %v661_v23, 0.0 }
  0xda   : > { %v865_v28 = vpack.c.bf16 %v801_v24, %v801_v24  ;;  %v881_v29 = vpack.c.bf16 %v817_v25, %v817_v25 }
  0xdb   : > { %v834_v30 = vpack.c.bf16 %v770_v26, %v770_v26  ;;  %v850_v31 = vpack.c.bf16 %v786_v27, %v786_v27 }
  0xdc   : > { %930 = vst.msk [vmem:[%s1473_s4 + $0x98] sm:$0xf] %vm891_vm2, %v865_v28 }
  0xdd   : > { %946 = vst.msk [vmem:[%s1473_s4 + $0xd8] sm:$0xf] %vm891_vm2, %v881_v29  ;;  %v700_v32 = vpop.f32.mrf.mxu2  ;;  %v740_v33 = vpop.f32.mrf.mxu3 }
  0xde   : > { %899 = vst.msk [vmem:[%s1473_s4 + $0x1c] sm:$0xf] %vm891_vm2, %v834_v30  ;;  %v701_v34 = vadd.f32 %v1464_v38, %v700_v32  ;;  %v741_v35 = vadd.f32 %v1464_v38, %v740_v33  ;;  %v623_v36 = vpop.f32.mrf.mxu0  ;;  %v663_v37 = vpop.f32.mrf.mxu1 }
  0xdf   : > { %915 = vst.msk [vmem:[%s1473_s4 + $0x5c] sm:$0xf] %vm891_vm2, %v850_v31  ;;  %v624_v39 = vadd.f32 %v1464_v38, %v623_v36  ;;  %v664_v40 = vadd.f32 %v1464_v38, %v663_v37 }
  0xe0   : > { %v802_v41 = vmax.f32 %v701_v34, 0.0  ;;  %v818_v42 = vmax.f32 %v741_v35, 0.0 }
  0xe1   : > { %v771_v43 = vmax.f32 %v624_v39, 0.0  ;;  %v787_v44 = vmax.f32 %v664_v40, 0.0 }
  0xe2   : > { %v866_v45 = vpack.c.bf16 %v802_v41, %v802_v41  ;;  %v882_v46 = vpack.c.bf16 %v818_v42, %v818_v42 }
  0xe3   : > { %v835_v47 = vpack.c.bf16 %v771_v43, %v771_v43  ;;  %v851_v48 = vpack.c.bf16 %v787_v44, %v787_v44 }
  0xe4   : > { %931 = vst.msk [vmem:[%s1473_s4 + $0x9c] sm:$0xf] %vm891_vm2, %v866_v45 }
  0xe5   : > { %947 = vst.msk [vmem:[%s1473_s4 + $0xdc] sm:$0xf] %vm891_vm2, %v882_v46  ;;  %v703_v49 = vpop.f32.mrf.mxu2  ;;  %v743_v50 = vpop.f32.mrf.mxu3 }
  0xe6   : > { %900 = vst.msk [vmem:[%s1473_s4 + $0x20] sm:$0xf] %vm891_vm2, %v835_v47  ;;  %v704_v51 = vadd.f32 %v1464_v38, %v703_v49  ;;  %v744_v52 = vadd.f32 %v1464_v38, %v743_v50  ;;  %v625_v53 = vpop.f32.mrf.mxu0  ;;  %v665_v54 = vpop.f32.mrf.mxu1 }
  0xe7   : > { %916 = vst.msk [vmem:[%s1473_s4 + $0x60] sm:$0xf] %vm891_vm2, %v851_v48  ;;  %v626_v55 = vadd.f32 %v1464_v38, %v625_v53  ;;  %v666_v56 = vadd.f32 %v1464_v38, %v665_v54 }
  0xe8   : > { %v803_v57 = vmax.f32 %v704_v51, 0.0  ;;  %v819_v58 = vmax.f32 %v744_v52, 0.0 }
  0xe9   : > { %v772_v59 = vmax.f32 %v626_v55, 0.0  ;;  %v788_v60 = vmax.f32 %v666_v56, 0.0 }
  0xea   : > { %v867_v61 = vpack.c.bf16 %v803_v57, %v803_v57  ;;  %v883_v62 = vpack.c.bf16 %v819_v58, %v819_v58 }
  0xeb   : > { %v836_v63 = vpack.c.bf16 %v772_v59, %v772_v59  ;;  %v852_v0 = vpack.c.bf16 %v788_v60, %v788_v60 }
  0xec   : > { %932 = vst.msk [vmem:[%s1473_s4 + $0xa0] sm:$0xf] %vm891_vm2, %v867_v61 }
  0xed   : > { %948 = vst.msk [vmem:[%s1473_s4 + $0xe0] sm:$0xf] %vm891_vm2, %v883_v62  ;;  %v705_v1 = vpop.f32.mrf.mxu2  ;;  %v745_v2 = vpop.f32.mrf.mxu3 }
  0xee   : > { %901 = vst.msk [vmem:[%s1473_s4 + $0x24] sm:$0xf] %vm891_vm2, %v836_v63  ;;  %v706_v3 = vadd.f32 %v1464_v38, %v705_v1  ;;  %v746_v4 = vadd.f32 %v1464_v38, %v745_v2  ;;  %v628_v5 = vpop.f32.mrf.mxu0  ;;  %v668_v6 = vpop.f32.mrf.mxu1 }
  0xef   : > { %917 = vst.msk [vmem:[%s1473_s4 + $0x64] sm:$0xf] %vm891_vm2, %v852_v0  ;;  %v629_v7 = vadd.f32 %v1464_v38, %v628_v5  ;;  %v669_v8 = vadd.f32 %v1464_v38, %v668_v6 }
  0xf0   : > { %v804_v9 = vmax.f32 %v706_v3, 0.0  ;;  %v820_v10 = vmax.f32 %v746_v4, 0.0 }
  0xf1   : > { %v773_v11 = vmax.f32 %v629_v7, 0.0  ;;  %v789_v12 = vmax.f32 %v669_v8, 0.0 }
  0xf2   : > { %v868_v13 = vpack.c.bf16 %v804_v9, %v804_v9  ;;  %v884_v14 = vpack.c.bf16 %v820_v10, %v820_v10 }
  0xf3   : > { %v837_v15 = vpack.c.bf16 %v773_v11, %v773_v11  ;;  %v853_v16 = vpack.c.bf16 %v789_v12, %v789_v12 }
  0xf4   : > { %933 = vst.msk [vmem:[%s1473_s4 + $0xa4] sm:$0xf] %vm891_vm2, %v868_v13 }
  0xf5   : > { %949 = vst.msk [vmem:[%s1473_s4 + $0xe4] sm:$0xf] %vm891_vm2, %v884_v14  ;;  %v708_v17 = vpop.f32.mrf.mxu2  ;;  %v748_v18 = vpop.f32.mrf.mxu3 }
  0xf6   : > { %902 = vst.msk [vmem:[%s1473_s4 + $0x28] sm:$0xf] %vm891_vm2, %v837_v15  ;;  %v709_v19 = vadd.f32 %v1464_v38, %v708_v17  ;;  %v749_v20 = vadd.f32 %v1464_v38, %v748_v18  ;;  %v630_v21 = vpop.f32.mrf.mxu0  ;;  %v670_v22 = vpop.f32.mrf.mxu1 }
  0xf7   : > { %918 = vst.msk [vmem:[%s1473_s4 + $0x68] sm:$0xf] %vm891_vm2, %v853_v16  ;;  %v631_v23 = vadd.f32 %v1464_v38, %v630_v21  ;;  %v671_v24 = vadd.f32 %v1464_v38, %v670_v22 }
  0xf8   : > { %v805_v25 = vmax.f32 %v709_v19, 0.0  ;;  %v821_v26 = vmax.f32 %v749_v20, 0.0 }
  0xf9   : > { %v774_v27 = vmax.f32 %v631_v23, 0.0  ;;  %v790_v28 = vmax.f32 %v671_v24, 0.0 }
  0xfa   : > { %v869_v29 = vpack.c.bf16 %v805_v25, %v805_v25  ;;  %v885_v30 = vpack.c.bf16 %v821_v26, %v821_v26 }
  0xfb   : > { %v838_v31 = vpack.c.bf16 %v774_v27, %v774_v27  ;;  %v854_v32 = vpack.c.bf16 %v790_v28, %v790_v28 }
  0xfc   : > { %934 = vst.msk [vmem:[%s1473_s4 + $0xa8] sm:$0xf] %vm891_vm2, %v869_v29 }
  0xfd   : > { %950 = vst.msk [vmem:[%s1473_s4 + $0xe8] sm:$0xf] %vm891_vm2, %v885_v30  ;;  %v710_v33 = vpop.f32.mrf.mxu2  ;;  %v750_v34 = vpop.f32.mrf.mxu3 }
  0xfe   : > { %903 = vst.msk [vmem:[%s1473_s4 + $0x2c] sm:$0xf] %vm891_vm2, %v838_v31  ;;  %v711_v35 = vadd.f32 %v1464_v38, %v710_v33  ;;  %v751_v36 = vadd.f32 %v1464_v38, %v750_v34  ;;  %v633_v37 = vpop.f32.mrf.mxu0  ;;  %v673_v39 = vpop.f32.mrf.mxu1 }
  0xff   : > { %919 = vst.msk [vmem:[%s1473_s4 + $0x6c] sm:$0xf] %vm891_vm2, %v854_v32  ;;  %v634_v40 = vadd.f32 %v1464_v38, %v633_v37  ;;  %v674_v41 = vadd.f32 %v1464_v38, %v673_v39 }
 0x100   : > { %v806_v42 = vmax.f32 %v711_v35, 0.0  ;;  %v822_v43 = vmax.f32 %v751_v36, 0.0 }
 0x101   : > { %v775_v44 = vmax.f32 %v634_v40, 0.0  ;;  %v791_v45 = vmax.f32 %v674_v41, 0.0 }
 0x102   : > { %v870_v46 = vpack.c.bf16 %v806_v42, %v806_v42  ;;  %v886_v47 = vpack.c.bf16 %v822_v43, %v822_v43 }
 0x103   : > { %v839_v48 = vpack.c.bf16 %v775_v44, %v775_v44  ;;  %v855_v49 = vpack.c.bf16 %v791_v45, %v791_v45 }
 0x104   : > { %935 = vst.msk [vmem:[%s1473_s4 + $0xac] sm:$0xf] %vm891_vm2, %v870_v46 }
 0x105   : > { %951 = vst.msk [vmem:[%s1473_s4 + $0xec] sm:$0xf] %vm891_vm2, %v886_v47  ;;  %v713_v50 = vpop.f32.mrf.mxu2  ;;  %v753_v51 = vpop.f32.mrf.mxu3 }
 0x106   : > { %904 = vst.msk [vmem:[%s1473_s4 + $0x30] sm:$0xf] %vm891_vm2, %v839_v48  ;;  %v714_v52 = vadd.f32 %v1464_v38, %v713_v50  ;;  %v754_v53 = vadd.f32 %v1464_v38, %v753_v51  ;;  %v635_v54 = vpop.f32.mrf.mxu0  ;;  %v675_v55 = vpop.f32.mrf.mxu1 }
 0x107   : > { %920 = vst.msk [vmem:[%s1473_s4 + $0x70] sm:$0xf] %vm891_vm2, %v855_v49  ;;  %v636_v56 = vadd.f32 %v1464_v38, %v635_v54  ;;  %v676_v57 = vadd.f32 %v1464_v38, %v675_v55 }
 0x108   : > { %v807_v58 = vmax.f32 %v714_v52, 0.0  ;;  %v823_v59 = vmax.f32 %v754_v53, 0.0 }
 0x109   : > { %v776_v60 = vmax.f32 %v636_v56, 0.0  ;;  %v792_v61 = vmax.f32 %v676_v57, 0.0 }
 0x10a   : > { %v871_v62 = vpack.c.bf16 %v807_v58, %v807_v58  ;;  %v887_v63 = vpack.c.bf16 %v823_v59, %v823_v59 }
 0x10b   : > { %v840_v0 = vpack.c.bf16 %v776_v60, %v776_v60  ;;  %v856_v1 = vpack.c.bf16 %v792_v61, %v792_v61 }
 0x10c   : > { %936 = vst.msk [vmem:[%s1473_s4 + $0xb0] sm:$0xf] %vm891_vm2, %v871_v62 }
 0x10d   : > { %952 = vst.msk [vmem:[%s1473_s4 + $0xf0] sm:$0xf] %vm891_vm2, %v887_v63  ;;  %v715_v2 = vpop.f32.mrf.mxu2  ;;  %v755_v3 = vpop.f32.mrf.mxu3 }
 0x10e   : > { %905 = vst.msk [vmem:[%s1473_s4 + $0x34] sm:$0xf] %vm891_vm2, %v840_v0  ;;  %v716_v4 = vadd.f32 %v1464_v38, %v715_v2  ;;  %v756_v5 = vadd.f32 %v1464_v38, %v755_v3  ;;  %v638_v6 = vpop.f32.mrf.mxu0  ;;  %v678_v7 = vpop.f32.mrf.mxu1 }
 0x10f   : > { %921 = vst.msk [vmem:[%s1473_s4 + $0x74] sm:$0xf] %vm891_vm2, %v856_v1  ;;  %v639_v8 = vadd.f32 %v1464_v38, %v638_v6  ;;  %v679_v9 = vadd.f32 %v1464_v38, %v678_v7 }
 0x110   : > { %v808_v10 = vmax.f32 %v716_v4, 0.0  ;;  %v824_v11 = vmax.f32 %v756_v5, 0.0 }
 0x111   : > { %v777_v12 = vmax.f32 %v639_v8, 0.0  ;;  %v793_v13 = vmax.f32 %v679_v9, 0.0 }
 0x112   : > { %v872_v14 = vpack.c.bf16 %v808_v10, %v808_v10  ;;  %v888_v15 = vpack.c.bf16 %v824_v11, %v824_v11 }
 0x113   : > { %v841_v16 = vpack.c.bf16 %v777_v12, %v777_v12  ;;  %v857_v17 = vpack.c.bf16 %v793_v13, %v793_v13 }
 0x114   : > { %937 = vst.msk [vmem:[%s1473_s4 + $0xb4] sm:$0xf] %vm891_vm2, %v872_v14 }
 0x115   : > { %953 = vst.msk [vmem:[%s1473_s4 + $0xf4] sm:$0xf] %vm891_vm2, %v888_v15  ;;  %v718_v18 = vpop.f32.mrf.mxu2  ;;  %v758_v19 = vpop.f32.mrf.mxu3 }
 0x116   : > { %906 = vst.msk [vmem:[%s1473_s4 + $0x38] sm:$0xf] %vm891_vm2, %v841_v16  ;;  %v719_v20 = vadd.f32 %v1464_v38, %v718_v18  ;;  %v759_v21 = vadd.f32 %v1464_v38, %v758_v19  ;;  %v640_v22 = vpop.f32.mrf.mxu0  ;;  %v680_v23 = vpop.f32.mrf.mxu1 }
 0x117   : > { %922 = vst.msk [vmem:[%s1473_s4 + $0x78] sm:$0xf] %vm891_vm2, %v857_v17  ;;  %v641_v24 = vadd.f32 %v1464_v38, %v640_v22  ;;  %v681_v25 = vadd.f32 %v1464_v38, %v680_v23 }
 0x118   : > { %v809_v26 = vmax.f32 %v719_v20, 0.0  ;;  %v825_v27 = vmax.f32 %v759_v21, 0.0 }
 0x119   : > { %v778_v28 = vmax.f32 %v641_v24, 0.0  ;;  %v794_v29 = vmax.f32 %v681_v25, 0.0 }
 0x11a   : > { %v873_v30 = vpack.c.bf16 %v809_v26, %v809_v26  ;;  %v889_v31 = vpack.c.bf16 %v825_v27, %v825_v27 }
 0x11b   : > { %v842_v32 = vpack.c.bf16 %v778_v28, %v778_v28  ;;  %v858_v33 = vpack.c.bf16 %v794_v29, %v794_v29 }
 0x11c   : > { %938 = vst.msk [vmem:[%s1473_s4 + $0xb8] sm:$0xf] %vm891_vm2, %v873_v30 }
 0x11d   : > { %954 = vst.msk [vmem:[%s1473_s4 + $0xf8] sm:$0xf] %vm891_vm2, %v889_v31  ;;  %v720_v34 = vpop.f32.mrf.mxu2  ;;  %v760_v35 = vpop.f32.mrf.mxu3 }
 0x11e   : > { %907 = vst.msk [vmem:[%s1473_s4 + $0x3c] sm:$0xf] %vm891_vm2, %v842_v32  ;;  %v721_v36 = vadd.f32 %v1464_v38, %v720_v34  ;;  %v761_v37 = vadd.f32 %v1464_v38, %v760_v35 }
 0x11f   : > { %923 = vst.msk [vmem:[%s1473_s4 + $0x7c] sm:$0xf] %vm891_vm2, %v858_v33 }
 0x120   : > { %v810_v39 = vmax.f32 %v721_v36, 0.0  ;;  %v826_v40 = vmax.f32 %v761_v37, 0.0 }
 0x122   : > { %v874_v41 = vpack.c.bf16 %v810_v39, %v810_v39  ;;  %v890_v42 = vpack.c.bf16 %v826_v40, %v826_v40 }
 0x124   : > { %939 = vst.msk [vmem:[%s1473_s4 + $0xbc] sm:$0xf] %vm891_vm2, %v874_v41 }
 0x125   : > { %955 = vst.msk [vmem:[%s1473_s4 + $0xfc] sm:$0xf] %vm891_vm2, %v890_v42 }
 0x126 PF: > { %s13_s14 = sadd.s32 1, %s1337_s14   ;;  %s1678_s12 = smov %s1333_s13 }
 0x127   : > { %p10_p5 = scmp.ge.s32.totalorder %s13_s14, 4   ;;  %s1679_s13 = smov %s1681_s15 }
 0x129   :  { %12 = sbr.rel (!%p10_p5) target bundleno = 2 (0x2), region = 68 }

// kernel: psp2s_forward.3
= control target key start
LH: loop header
LB: loop body
LE: loop exit
PB: predicated region body
PF: predicated region fallthrough
CT: control target
= control target key end

     0   :  { %s5314_s27 = smov 0   ;;  %s5316_s28 = smov 0   ;;  %s8017_s0 = inlined_call_operand.vmem [shape: bf16[2,512,32], index: 0, kind: input, shape index: {}]   ;;  %s8018_s1 = inlined_call_operand.vmem [shape: f32[50,256], index: 1, kind: input, shape index: {}]   ;;  %s8019_s2 = inlined_call_operand.vmem [shape: f32[4,256,50], index: 2, kind: input, shape index: {}]   ;;  %s8020_s3 = inlined_call_operand.vmem [shape: bf16[2,32,32], index: 3, kind: input, shape index: {}]   ;;  %s8021_s4 = inlined_call_operand.vmem [shape: f32[2,1,32], index: 4, kind: input, shape index: {}]   ;;  %s8022_s5 = inlined_call_operand.vmem [shape: f32[8,32,2], index: 5, kind: input, shape index: {}]   ;;  %s8023_s6 = inlined_call_operand.vmem [shape: bf16[2,32,2], index: 6, kind: input, shape index: {}]   ;;  %s8024_s7 = inlined_call_operand.vmem [shape: f32[1,2], index: 7, kind: input, shape index: {}]   ;;  %s8025_s8 = inlined_call_operand.vmem [shape: f32[2,256,2], index: 8, kind: output, shape index: {}]  }
   0x1   :  { %s5318_s29 = smov 0  }
   0x2 LB: > { %s4189_s30 = sadd.s32 4294967295, %s5267_s29   ;;  %s5331_s9 = sadd.s32 1, %s5267_s29   ;;  %s5267_s29 = sphi %s5318_s29, %s8234_s29   ;;  %s5263_s28 = sphi %s5316_s28, %s8233_s28   ;;  %s5259_s27 = sphi %s5314_s27, %s8232_s27  }
   0x3   : > { %s22_s10 = ssub.s32 %s5267_s29, %s5331_s9  ;;  %s25_s11 = sadd.s32 1, %s5263_s28 }
   0x4   : > { %p23_p0 = scmp.eq.s32.totalorder %s22_s10, 0  ;;  %p32_p1 = scmp.ne.s32.totalorder %s5263_s28, %s5259_s27 }
   0x5   : > { %p33_p2 = scmp.eq.s32.totalorder %s5267_s29, 0  ;;  %p4192_p4 = scmp.ge.s32.totalorder %s5267_s29, 2 }
   0x6   : > { %s5340_s12 = scalar_select %p23_p0, %s5263_s28, %s25_s11  }
   0x7   : > { %p34_p3 = por %p33_p2, %p32_p1  ;;  %252 = sbr.rel (%p4192_p4) target bundleno = 48 (0x30), region = 44 }
   0xc   : > { %255 = sbr.rel (!%p34_p3) target bundleno = 48 (0x30), region = 48  ;;  %s257_s13 = sand.u32 (%p34_p3), 1, %s5263_s28  }
   0xd   : > { %s4877_s14 = sshll.u32 (%p34_p3), %s5267_s29, 7  ;;  %s4193_s15 = sshll.u32 (%p34_p3), %s257_s13, 8 }
   0xe   : > { %s5348_s18 = scalar_lea.vmem (%p34_p3), %s8017_s0, %s4877_s14  ;;  %s5353_s19 = scalar_lea.vmem (%p34_p3), [#allocation2], %s4193_s15 }
   0xf   : > { %v279_v0 = vld [vmem:[%s5348_s18] sm:$0xff] (%p34_p3)   ;;  %v283_v1 = vld [vmem:[%s5348_s18 + $0x8] sm:$0xff] (%p34_p3)   ;;  %v287_v2 = vld [vmem:[%s5348_s18 + $0x10] sm:$0xff] (%p34_p3)  }
  0x10   : > { %280 = vst [vmem:[%s5353_s19] sm:$0xff] (%p34_p3), %v279_v0   ;;  %v291_v3 = vld [vmem:[%s5348_s18 + $0x18] sm:$0xff] (%p34_p3)   ;;  %v295_v4 = vld [vmem:[%s5348_s18 + $0x20] sm:$0xff] (%p34_p3)   ;;  %v299_v5 = vld [vmem:[%s5348_s18 + $0x28] sm:$0xff] (%p34_p3)  }
  0x11   : > { %284 = vst [vmem:[%s5353_s19 + $0x8] sm:$0xff] %v283_v1   ;;  %v303_v6 = vld [vmem:[%s5348_s18 + $0x30] sm:$0xff]   ;;  %v307_v7 = vld [vmem:[%s5348_s18 + $0x38] sm:$0xff]   ;;  %v311_v8 = vld [vmem:[%s5348_s18 + $0x40] sm:$0xff]  }
  0x12   : > { %288 = vst [vmem:[%s5353_s19 + $0x10] sm:$0xff] %v287_v2   ;;  %v315_v9 = vld [vmem:[%s5348_s18 + $0x48] sm:$0xff]   ;;  %v319_v10 = vld [vmem:[%s5348_s18 + $0x50] sm:$0xff]   ;;  %v323_v11 = vld [vmem:[%s5348_s18 + $0x58] sm:$0xff]  }
  0x13   : > { %292 = vst [vmem:[%s5353_s19 + $0x18] sm:$0xff] %v291_v3   ;;  %v327_v12 = vld [vmem:[%s5348_s18 + $0x60] sm:$0xff]   ;;  %v331_v13 = vld [vmem:[%s5348_s18 + $0x68] sm:$0xff]   ;;  %v335_v14 = vld [vmem:[%s5348_s18 + $0x70] sm:$0xff]  }
  0x14   : > { %296 = vst [vmem:[%s5353_s19 + $0x20] sm:$0xff] %v295_v4   ;;  %v339_v15 = vld [vmem:[%s5348_s18 + $0x78] sm:$0xff]   ;;  %v343_v16 = vld [vmem:[%s5348_s18 + $0x100] sm:$0xff]   ;;  %v347_v17 = vld [vmem:[%s5348_s18 + $0x108] sm:$0xff]  }
  0x15   : > { %300 = vst [vmem:[%s5353_s19 + $0x28] sm:$0xff] %v299_v5   ;;  %v351_v18 = vld [vmem:[%s5348_s18 + $0x110] sm:$0xff]   ;;  %v355_v19 = vld [vmem:[%s5348_s18 + $0x118] sm:$0xff]   ;;  %v359_v20 = vld [vmem:[%s5348_s18 + $0x120] sm:$0xff]  }
  0x16   : > { %304 = vst [vmem:[%s5353_s19 + $0x30] sm:$0xff] %v303_v6   ;;  %v363_v21 = vld [vmem:[%s5348_s18 + $0x128] sm:$0xff]   ;;  %v367_v22 = vld [vmem:[%s5348_s18 + $0x130] sm:$0xff]   ;;  %v371_v23 = vld [vmem:[%s5348_s18 + $0x138] sm:$0xff]  }
  0x17   : > { %308 = vst [vmem:[%s5353_s19 + $0x38] sm:$0xff] %v307_v7   ;;  %v375_v24 = vld [vmem:[%s5348_s18 + $0x140] sm:$0xff]   ;;  %v379_v25 = vld [vmem:[%s5348_s18 + $0x148] sm:$0xff]   ;;  %v383_v26 = vld [vmem:[%s5348_s18 + $0x150] sm:$0xff]  }
  0x18   : > { %312 = vst [vmem:[%s5353_s19 + $0x40] sm:$0xff] %v311_v8   ;;  %v387_v27 = vld [vmem:[%s5348_s18 + $0x158] sm:$0xff]   ;;  %v391_v28 = vld [vmem:[%s5348_s18 + $0x160] sm:$0xff]   ;;  %v395_v29 = vld [vmem:[%s5348_s18 + $0x168] sm:$0xff]  }
  0x19   : > { %316 = vst [vmem:[%s5353_s19 + $0x48] sm:$0xff] %v315_v9   ;;  %v399_v30 = vld [vmem:[%s5348_s18 + $0x170] sm:$0xff]   ;;  %v403_v31 = vld [vmem:[%s5348_s18 + $0x178] sm:$0xff]  }
  0x1a   : > { %320 = vst [vmem:[%s5353_s19 + $0x50] sm:$0xff] %v319_v10  }
  0x1b   : > { %324 = vst [vmem:[%s5353_s19 + $0x58] sm:$0xff] %v323_v11  }
  0x1c   : > { %328 = vst [vmem:[%s5353_s19 + $0x60] sm:$0xff] %v327_v12  }
  0x1d   : > { %332 = vst [vmem:[%s5353_s19 + $0x68] sm:$0xff] %v331_v13  }
  0x1e   : > { %336 = vst [vmem:[%s5353_s19 + $0x70] sm:$0xff] %v335_v14  }
  0x1f   : > { %340 = vst [vmem:[%s5353_s19 + $0x78] sm:$0xff] %v339_v15  }
  0x20   : > { %344 = vst [vmem:[%s5353_s19 + $0x80] sm:$0xff] %v343_v16  }
  0x21   : > { %348 = vst [vmem:[%s5353_s19 + $0x88] sm:$0xff] %v347_v17  }
  0x22   : > { %352 = vst [vmem:[%s5353_s19 + $0x90] sm:$0xff] %v351_v18  }
  0x23   : > { %356 = vst [vmem:[%s5353_s19 + $0x98] sm:$0xff] %v355_v19  }
  0x24   : > { %360 = vst [vmem:[%s5353_s19 + $0xa0] sm:$0xff] %v359_v20  }
  0x25   : > { %364 = vst [vmem:[%s5353_s19 + $0xa8] sm:$0xff] %v363_v21  }
  0x26   : > { %368 = vst [vmem:[%s5353_s19 + $0xb0] sm:$0xff] %v367_v22  }
  0x27   : > { %372 = vst [vmem:[%s5353_s19 + $0xb8] sm:$0xff] %v371_v23  }
  0x28   : > { %376 = vst [vmem:[%s5353_s19 + $0xc0] sm:$0xff] %v375_v24  }
  0x29   : > { %380 = vst [vmem:[%s5353_s19 + $0xc8] sm:$0xff] %v379_v25  }
  0x2a   : > { %384 = vst [vmem:[%s5353_s19 + $0xd0] sm:$0xff] %v383_v26  }
  0x2b   : > { %388 = vst [vmem:[%s5353_s19 + $0xd8] sm:$0xff] %v387_v27  }
  0x2c   : > { %392 = vst [vmem:[%s5353_s19 + $0xe0] sm:$0xff] %v391_v28  }
  0x2d   : > { %396 = vst [vmem:[%s5353_s19 + $0xe8] sm:$0xff] %v395_v29  }
  0x2e   : > { %400 = vst [vmem:[%s5353_s19 + $0xf0] sm:$0xff] %v399_v30  }
  0x2f   : > { %404 = vst [vmem:[%s5353_s19 + $0xf8] sm:$0xff] %v403_v31  }
  0x30 PF: > { %p4196_p5 = scmp.ge.s32.totalorder %s5267_s29, 1  ;;  %p557_p6 = scmp.lt.s32.totalorder %s5267_s29, 3 }
  0x32   : > { %p558_p7 = pnand %p4196_p5, %p557_p6 }
  0x34   : > { %561 = sbr.rel (%p558_p7) target bundleno = 2553 (0x9f9), region = 89 }
  0x39   : > { %v4896_v32 = vld [vmem:[%s8023_s6 + $0x8] sm:$0xff]  ;;  %s564_s22 = sand.u32 1, %s5259_s27   ;;  %v4895_v33 = vld [vmem:[%s8023_s6] sm:$0xff]  ;;  %vm750_vm0 = vcmask 261120   ;;  %vm1298_vm1 = vcmask 1041408   ;;  %vm1201_vm2 = vcmask 408576  }
  0x3a   : > { %s4197_s23 = sshll.u32 %s564_s22, 8  ;;  %805 = vmatpush.bf16.msra.mxu0 %v4896_v32  ;;  %vm3679_vm3 = vcmask 15360   ;;  %p598_p8 = scmp.lt.s32.totalorder %s4189_s30, 1 }
  0x3b   : > { %s5425_s26 = scalar_lea.vmem [#allocation2], %s4197_s23 }
  0x3c   : > { %v4879_v34 = vld [vmem:[%s5425_s26] sm:$0xff]  ;;  %v4880_v35 = vld [vmem:[%s5425_s26 + $0x8] sm:$0xff]  ;;  %v4881_v36 = vld [vmem:[%s5425_s26 + $0x10] sm:$0xff]  ;;  %s8236_s30 = smov (!%p598_p8, %s4189_s30), 1 }
  0x3d   : > { %v4882_v37 = vld [vmem:[%s5425_s26 + $0x18] sm:$0xff]  ;;  %v4883_v38 = vld [vmem:[%s5425_s26 + $0x20] sm:$0xff]  ;;  %v4884_v39 = vld [vmem:[%s5425_s26 + $0x28] sm:$0xff]  ;;  %s4878_s16 = sshll.u32 %s8236_s30, 8 }
  0x3e   : > { %806 = vmatpush.bf16.msra.mxu0 %v4895_v33  ;;  %v4885_v40 = vld [vmem:[%s5425_s26 + $0x30] sm:$0xff]  ;;  %v4886_v41 = vld [vmem:[%s5425_s26 + $0x38] sm:$0xff]  ;;  %v4887_v42 = vld [vmem:[%s5425_s26 + $0x40] sm:$0xff]  ;;  %s7802_s17 = scalar_lea.vmem %s8025_s8, %s4878_s16 }
  0x3f   : > { %v4888_v45 = vld [vmem:[%s5425_s26 + $0x48] sm:$0xff]  ;;  %v4889_v48 = vld [vmem:[%s5425_s26 + $0x50] sm:$0xff]  ;;  %v4890_v51 = vld [vmem:[%s5425_s26 + $0x58] sm:$0xff] }
  0x40   : > { %v4891_v54 = vld [vmem:[%s5425_s26 + $0x60] sm:$0xff]  ;;  %v653_v57 = vld [vmem:[%s5425_s26 + $0x78] sm:$0xff]   ;;  %v651_v63 = vld [vmem:[%s5425_s26 + $0x70] sm:$0xff]  }
  0x41   : > { %4272 = vmatmul.msk.bf16.vlgmr.msra.gmra.mxu0 %vm750_vm0, %v4879_v34  ;;  %v5471_v56 = vld [vmem:[%s5425_s26 + $0x3c] sm:$0xff]   ;;  %v951_v59 = vunpack.c.h.bf16 %v653_v57  ;;  %v636_v60 = vld [vmem:[%s5425_s26 + $0x34] sm:$0xff]   ;;  %v950_v61 = vunpack.c.l.bf16 %v653_v57  ;;  %v949_v1 = vunpack.c.h.bf16 %v651_v63  ;;  %v634_v2 = vld [vmem:[%s5425_s26 + $0x2c] sm:$0xff]   ;;  %v948_v5 = vunpack.c.l.bf16 %v651_v63 }
  0x42   : > { %v935_v58 = vunpack.c.l.bf16 %v5471_v56  ;;  %v934_v62 = vunpack.c.h.bf16 %v636_v60  ;;  %v933_v0 = vunpack.c.l.bf16 %v636_v60  ;;  %v932_v4 = vunpack.c.h.bf16 %v634_v2  ;;  %v649_v7 = vld [vmem:[%s5425_s26 + $0x68] sm:$0xff]   ;;  %v647_v12 = vld [vmem:[%s5425_s26 + $0x60] sm:$0xff]   ;;  %v645_v20 = vld [vmem:[%s5425_s26 + $0x58] sm:$0xff]  }
  0x43   : > { %990 = vmatpush.msrb.mxu0 %v951_v59  ;;  %4934 = vmatpush.msra.mxu2 %v951_v59  ;;  %v931_v6 = vunpack.c.l.bf16 %v634_v2  ;;  %v632_v8 = vld [vmem:[%s5425_s26 + $0x24] sm:$0xff]   ;;  %v947_v9 = vunpack.c.h.bf16 %v649_v7  ;;  %v946_v11 = vunpack.c.l.bf16 %v649_v7  ;;  %v945_v14 = vunpack.c.h.bf16 %v647_v12  ;;  %v630_v16 = vld [vmem:[%s5425_s26 + $0x1c] sm:$0xff]   ;;  %v628_v23 = vld [vmem:[%s5425_s26 + $0x14] sm:$0xff]  }
  0x44   : > { %952 = vmatpush.msra.mxu1 %v935_v58  ;;  %v930_v10 = vunpack.c.h.bf16 %v632_v8  ;;  %v929_v13 = vunpack.c.l.bf16 %v632_v8  ;;  %v4892_v15 = vld [vmem:[%s5425_s26 + $0x68] sm:$0xff]  ;;  %v928_v18 = vunpack.c.h.bf16 %v630_v16  ;;  %v944_v19 = vunpack.c.l.bf16 %v647_v12  ;;  %v643_v26 = vld [vmem:[%s5425_s26 + $0x50] sm:$0xff]   ;;  %v604_v57 = vld [vmem:[%s8018_s1] sm:$0xff] }
  0x45   : > { %991 = vmatpush.msrb.mxu0 %v950_v61  ;;  %4935 = vmatpush.msra.mxu2 %v950_v61  ;;  %v927_v21 = vunpack.c.l.bf16 %v630_v16  ;;  %v943_v22 = vunpack.c.h.bf16 %v645_v20  ;;  %v942_v24 = vunpack.c.l.bf16 %v645_v20  ;;  %v926_v25 = vunpack.c.h.bf16 %v628_v23  ;;  %v626_v29 = vld [vmem:[%s5425_s26 + $0xc] sm:$0xff]   ;;  %v4894_v60 = vld [vmem:[%s5425_s26 + $0x78] sm:$0xff]  ;;  %v608_v61 = vld [vmem:[%s8018_s1 + $0x20] sm:$0xff] }
  0x46   : > { %953 = vmatpush.msra.mxu1 %v934_v62  ;;  %v925_v27 = vunpack.c.l.bf16 %v628_v23  ;;  %v941_v28 = vunpack.c.h.bf16 %v643_v26  ;;  %v924_v31 = vunpack.c.h.bf16 %v626_v29  ;;  %v940_v32 = vunpack.c.l.bf16 %v643_v26  ;;  %v641_v34 = vld [vmem:[%s5425_s26 + $0x48] sm:$0xff]   ;;  %v606_v59 = vld [vmem:[%s8018_s1 + $0x10] sm:$0xff]  ;;  %v611_v62 = vld [vmem:[%s8018_s1 + $0x38] sm:$0xff] }
  0x47   : > { %992 = vmatpush.msrb.mxu0 %v949_v1  ;;  %4936 = vmatpush.msra.mxu2 %v949_v1  ;;  %v923_v33 = vunpack.c.l.bf16 %v626_v29  ;;  %v613_v1 = vld [vmem:[%s8018_s1 + $0x48] sm:$0xff]  ;;  %v607_v8 = vld [vmem:[%s8018_s1 + $0x18] sm:$0xff] }
  0x48   : > { %954 = vmatpush.msra.mxu1 %v933_v0  ;;  %v610_v0 = vld [vmem:[%s8018_s1 + $0x30] sm:$0xff]  ;;  %v609_v12 = vld [vmem:[%s8018_s1 + $0x28] sm:$0xff] }
  0x49   : > { %993 = vmatpush.msrb.mxu0 %v948_v5  ;;  %4937 = vmatpush.msra.mxu2 %v948_v5  ;;  %v612_v5 = vld [vmem:[%s8018_s1 + $0x40] sm:$0xff] }
  0x4a   : > { %955 = vmatpush.msra.mxu1 %v932_v4  ;;  %v605_v4 = vld [vmem:[%s8018_s1 + $0x8] sm:$0xff] }
  0x4b   : > { %994 = vmatpush.msrb.mxu0 %v947_v9  ;;  %4938 = vmatpush.msra.mxu2 %v947_v9  ;;  %v614_v9 = vld [vmem:[%s8018_s1 + $0x50] sm:$0xff] }
  0x4c   : > { %956 = vmatpush.msra.mxu1 %v931_v6  ;;  %v615_v6 = vld [vmem:[%s8018_s1 + $0x58] sm:$0xff] }
  0x4d   : > { %995 = vmatpush.msrb.mxu0 %v946_v11  ;;  %4939 = vmatpush.msra.mxu2 %v946_v11 }
  0x4e   : > { %957 = vmatpush.msra.mxu1 %v930_v10  ;;  %v617_v10 = vld [vmem:[%s8018_s1 + $0x68] sm:$0x3] }
  0x4f   : > { %996 = vmatpush.msrb.mxu0 %v945_v14  ;;  %4940 = vmatpush.msra.mxu2 %v945_v14 }
  0x50   : > { %958 = vmatpush.msra.mxu1 %v929_v13  ;;  %v616_v13 = vld [vmem:[%s8018_s1 + $0x60] sm:$0x3] }
  0x51   : > { %4273 = vmatmul.msk.bf16.gmra.mxu0 %vm750_vm0, %v4880_v35  ;;  %4941 = vmatpush.msra.mxu2 %v944_v19  ;;  %v624_v35 = vld [vmem:[%s5425_s26 + $0x4] sm:$0xff]  }
  0x52   : > { %959 = vmatpush.msra.mxu1 %v928_v18  ;;  %997 = vmatpush.msrb.mxu0 %v944_v19 }
  0x53   : > { %4942 = vmatpush.msra.mxu2 %v943_v22 }
  0x54   : > { %960 = vmatpush.msra.mxu1 %v927_v21  ;;  %998 = vmatpush.msrb.mxu0 %v943_v22 }
  0x55   : > { %4943 = vmatpush.msra.mxu2 %v942_v24 }
  0x56   : > { %961 = vmatpush.msra.mxu1 %v926_v25  ;;  %999 = vmatpush.msrb.mxu0 %v942_v24  ;;  %v4931_v24 = vld [vmem:[%s8020_s3 + $0x8] sm:$0xff]  }
  0x57   : > { %4944 = vmatpush.msra.mxu2 %v941_v28  ;;  %v4922_v25 = vunpack.c.h.bf16 %v4931_v24  ;;  %v4921_v26 = vunpack.c.l.bf16 %v4931_v24  ;;  %v4488_v24 = vld [vmem:[%s8022_s5 + $0x68] sm:$0xff] }
  0x58   : > { %962 = vmatpush.msra.mxu1 %v925_v27  ;;  %1000 = vmatpush.msrb.mxu0 %v941_v28  ;;  %v4916_v27 = vld [vmem:[%s8020_s3] sm:$0xff]  }
  0x59   : > { %4945 = vmatpush.msra.mxu2 %v940_v32  ;;  %1073 = vmatpush.msra.mxu3 %v4922_v25  ;;  %v4918_v28 = vunpack.c.h.bf16 %v4916_v27  ;;  %v1106_v25 = vld [vmem:[%s8022_s5] sm:$0xff] }
  0x5a   : > { %963 = vmatpush.msra.mxu1 %v924_v31  ;;  %1001 = vmatpush.msrb.mxu0 %v940_v32  ;;  %v4917_v31 = vunpack.c.l.bf16 %v4916_v27  ;;  %v4982_v27 = vld [vmem:[%s8021_s4] ss:$0 sm:$0xff] }
  0x5b   : > { %1074 = vmatpush.msra.mxu3 %v4921_v26  ;;  %v4487_v26 = vld [vmem:[%s8022_s5 + $0x60] sm:$0xff] }
  0x5c   : > { %964 = vmatpush.msra.mxu1 %v923_v33 }
  0x5d   : > { %1075 = vmatpush.msra.mxu3 %v4918_v28 }
  0x5f   : > { %1076 = vmatpush.msra.mxu3 %v4917_v31 }
  0x61   : > { %4274 = vmatmul.msk.bf16.gmra.mxu0 %vm750_vm0, %v4881_v36  ;;  %v939_v36 = vunpack.c.h.bf16 %v641_v34 }
  0x63   : > { %1002 = vmatpush.msrb.mxu0 %v939_v36  ;;  %4946 = vmatpush.msra.mxu2 %v939_v36 }
  0x71   : > { %4275 = vmatmul.msk.bf16.gmra.mxu0 %vm750_vm0, %v4882_v37  ;;  %v922_v37 = vunpack.c.h.bf16 %v624_v35 }
  0x73   : > { %965 = vmatpush.msra.mxu1 %v922_v37 }
  0x81   : > { %4276 = vmatmul.msk.bf16.gmra.mxu0 %vm750_vm0, %v4883_v38  ;;  %v938_v38 = vunpack.c.l.bf16 %v641_v34 }
  0x83   : > { %1003 = vmatpush.msrb.mxu0 %v938_v38  ;;  %4947 = vmatpush.msra.mxu2 %v938_v38 }
  0x91   : > { %4277 = vmatmul.msk.bf16.gmra.mxu0 %vm750_vm0, %v4884_v39  ;;  %v639_v39 = vld [vmem:[%s5425_s26 + $0x44] sm:$0xf] }
  0xa1   : > { %4278 = vmatmul.msk.bf16.gmra.mxu0 %vm750_vm0, %v4885_v40  ;;  %v921_v40 = vunpack.c.l.bf16 %v624_v35 }
  0xa3   : > { %966 = vmatpush.msra.mxu1 %v921_v40 }
  0xb1   : > { %4279 = vmatmul.msk.bf16.gmra.mxu0 %vm750_vm0, %v4886_v41  ;;  %v937_v41 = vunpack.c.l.bf16 %v639_v39 }
  0xb3   : > { %1004 = vmatpush.msrb.mxu0 %v937_v41  ;;  %4948 = vmatpush.msra.mxu2 %v937_v41 }
  0xbe   : > { %v5444_v43 = vpop.f32.mrf.mxu0 }
  0xc1   : > { %4280 = vmatmul.msk.bf16.gmra.mxu0 %vm750_vm0, %v4887_v42  ;;  %v4893_v42 = vld [vmem:[%s5425_s26 + $0x70] sm:$0xff] }
  0xc6   : > { %v5447_v44 = vpop.f32.mrf.mxu0 }
  0xce   : > { %v5450_v46 = vpop.f32.mrf.mxu0 }
  0xd1   : > { %4281 = vmatmul.msk.bf16.gmra.mxu0 %vm750_vm0, %v4888_v45  ;;  %v622_v45 = vld [vmem:[%s5425_s26] sm:$0xf] }
  0xd6   : > { %v5453_v47 = vpop.f32.mrf.mxu0 }
  0xde   : > { %v5456_v49 = vpop.f32.mrf.mxu0 }
  0xe1   : > { %4282 = vmatmul.msk.bf16.gmra.mxu0 %vm750_vm0, %v4889_v48 }
  0xe6   : > { %v5459_v50 = vpop.f32.mrf.mxu0 }
  0xee   : > { %v5462_v52 = vpop.f32.mrf.mxu0 }
  0xf1   : > { %4283 = vmatmul.msk.bf16.gmra.mxu0 %vm750_vm0, %v4890_v51  ;;  %v920_v51 = vunpack.c.l.bf16 %v622_v45 }
  0xf3   : > { %967 = vmatpush.msra.mxu1 %v920_v51 }
  0xf4   : > { %968 = vmatmul.f32.vlgmr.msra.gmra.mxu1 %v604_v57  ;;  %v1109_v57 = vld [vmem:[%s8022_s5 + $0x18] sm:$0xff] }
  0xf5   : > { %1143 = vmatpush.msrb.mxu3 %v1109_v57 }
  0xf6   : > { %v5465_v53 = vpop.f32.mrf.mxu0 }
  0xfc   : > { %971 = vmatmul.f32.gmra.mxu1 %v606_v59  ;;  %v4490_v59 = vld [vmem:[%s8022_s5 + $0x78] sm:$0xff] }
  0xfe   : > { %v5468_v55 = vpop.f32.mrf.mxu0 }
 0x101   : > { %4284 = vmatmul.msk.bf16.gmra.mxu0 %vm750_vm0, %v4891_v54  ;;  %v936_v54 = vunpack.c.h.bf16 %v5471_v56 }
 0x103   : > { %1005 = vmatpush.msrb.mxu0 %v936_v54  ;;  %4949 = vmatpush.msra.mxu2 %v936_v54 }
 0x104   : > { %974 = vmatmul.f32.gmra.mxu1 %v608_v61  ;;  %1015 = vmatmul.f32.vlgmr.msra.gmra.mxu2 %v611_v62 }
 0x105   : > { %2104 = vmatpush.msra.mxu0 %v4490_v59 }
 0x106   : > { %v5479_v3 = vpop.f32.mrf.mxu0 }
 0x10c   : > { %977 = vmatmul.f32.gmra.mxu1 %v610_v0  ;;  %1018 = vmatmul.f32.gmra.mxu2 %v613_v1 }
 0x10e   : > { %v5486_v17 = vpop.f32.mrf.mxu0 }
 0x111   : > { %4285 = vmatmul.msk.bf16.gmra.mxu0 %vm750_vm0, %v4892_v15 }
 0x114   : > { %980 = vmatmul.f32.gmra.mxu1 %v612_v5  ;;  %1021 = vmatmul.f32.gmra.mxu2 %v615_v6 }
 0x116   : > { %v5493_v30 = vpop.f32.mrf.mxu0 }
 0x11c   : > { %983 = vmatmul.f32.gmra.mxu1 %v614_v9  ;;  %1024 = vmatmul.f32.gmra.mxu2 %v617_v10  ;;  %v1108_v10 = vld [vmem:[%s8022_s5 + $0x10] sm:$0xff] }
 0x11d   : > { %1144 = vmatpush.msrb.mxu3 %v1108_v10 }
 0x11e   : > { %v5500_v48 = vpop.f32.mrf.mxu0 }
 0x121   : > { %4286 = vmatmul.msk.bf16.gmra.mxu0 %vm750_vm0, %v4893_v42 }
 0x124   : > { %986 = vmatmul.f32.gmra.mxu1 %v616_v13  ;;  %v1107_v13 = vld [vmem:[%s8022_s5 + $0x8] sm:$0xff] }
 0x125   : > { %1145 = vmatpush.msrb.mxu3 %v1107_v13 }
 0x126   : > { %v5507_v58 = vpop.f32.mrf.mxu0 }
 0x127   : > { %1146 = vmatpush.msrb.mxu3 %v1106_v25 }
 0x12e   : > { %v5513_v56 = vpop.f32.mrf.mxu0 }
 0x131   : > { %4287 = vmatmul.msk.bf16.gmra.mxu0 %vm750_vm0, %v4894_v60 }
 0x136   : > { %v5522_v63 = vpop.f32.mrf.mxu0 }
 0x137   : > { %8028 = vst [vmem:[#allocation3_spill] sm:$0xff] %v5522_v63 }
 0x13e   : > { %v5530_v2 = vpop.f32.mrf.mxu0 }
 0x141   : > { %1006 = vmatmul.f32.vlgmr.msrb.gmra.mxu0 %v605_v4 }
 0x146   : > { %v5541_v7 = vpop.f32.mrf.mxu0 }
 0x147   : > { %8029 = vst [vmem:[#allocation4_spill] sm:$0xff] %v5541_v7 }
 0x149   : > { %1009 = vmatmul.f32.gmra.mxu0 %v607_v8 }
 0x14e   : > { %v5552_v11 = vpop.f32.mrf.mxu0 }
 0x151   : > { %1012 = vmatmul.f32.gmra.mxu0 %v609_v12  ;;  %v4489_v12 = vld [vmem:[%s8022_s5 + $0x70] sm:$0xff] }
 0x152   : > { %2105 = vmatpush.msra.mxu0 %v4489_v12 }
 0x154   : > { %2106 = vmatpush.msra.mxu0 %v4488_v24 }
 0x156   : > { %v5560_v14 = vpop.f32.mrf.mxu0  ;;  %2107 = vmatpush.msra.mxu0 %v4487_v26 }
 0x15e   : > { %v5562_v15 = vpop.f32.mrf.mxu0 }
 0x166   : > { %v5564_v16 = vpop.f32.mrf.mxu0 }
 0x16e   : > { %v5566_v18 = vpop.f32.mrf.mxu0 }
 0x16f   : > { %8030 = vst [vmem:[#allocation5_spill] sm:$0xff] %v5566_v18 }
 0x171   : > { %v969_v34 = vpop.f32.mrf.mxu1 }
 0x176   : > { %v5568_v19 = vpop.f32.mrf.mxu0 }
 0x177   : > { %8031 = vst [vmem:[#allocation6_spill] sm:$0xff] %v5568_v19 }
 0x179   : > { %v972_v36 = vpop.f32.mrf.mxu1 }
 0x17e   : > { %v5570_v20 = vpop.f32.mrf.mxu0 }
 0x17f   : > { %8032 = vst [vmem:[#allocation7_spill] sm:$0xff] %v5570_v20 }
 0x181   : > { %v975_v39 = vpop.f32.mrf.mxu1 }
 0x186   : > { %v5572_v21 = vpop.f32.mrf.mxu0 }
 0x187   : > { %8033 = vst [vmem:[#allocation8_spill] sm:$0xff] %v5572_v21  ;;  %v1016_v45 = vpop.f32.mrf.mxu2 }
 0x189   : > { %v978_v42 = vpop.f32.mrf.mxu1 }
 0x18a   : > { %v1017_v60 = vadd.f32 %v1016_v45, %v978_v42 }
 0x18e   : > { %v5574_v22 = vpop.f32.mrf.mxu0 }
 0x18f   : > { %8034 = vst [vmem:[#allocation9_spill] sm:$0xff] %v5574_v22  ;;  %v1019_v62 = vpop.f32.mrf.mxu2 }
 0x191   : > { %v981_v61 = vpop.f32.mrf.mxu1 }
 0x192   : > { %v1020_v0 = vadd.f32 %v1019_v62, %v981_v61 }
 0x196   : > { %v5576_v23 = vpop.f32.mrf.mxu0 }
 0x197   : > { %8035 = vst [vmem:[#allocation10_spill] sm:$0xff] %v5576_v23  ;;  %v1022_v4 = vpop.f32.mrf.mxu2 }
 0x199   : > { %v984_v1 = vpop.f32.mrf.mxu1 }
 0x19a   : > { %v1023_v5 = vadd.f32 %v1022_v4, %v984_v1 }
 0x19e   : > { %v5584_v29 = vpop.f32.mrf.mxu0 }
 0x19f   : > { %8036 = vst [vmem:[#allocation11_spill] sm:$0xff] %v5584_v29  ;;  %v1025_v8 = vpop.f32.mrf.mxu2 }
 0x1a1   : > { %v987_v6 = vpop.f32.mrf.mxu1 }
 0x1a2   : > { %v1026_v9 = vadd.f32 %v1025_v8, %v987_v6 }
 0x1a6   : > { %v5586_v32 = vpop.f32.mrf.mxu0 }
 0x1a7   : > { %8037 = vst [vmem:[#allocation12_spill] sm:$0xff] %v5586_v32 }
 0x1ae   : > { %v5588_v33 = vpop.f32.mrf.mxu0 }
 0x1af   : > { %8038 = vst [vmem:[#allocation13_spill] sm:$0xff] %v5588_v33 }
 0x1b6   : > { %v5590_v35 = vpop.f32.mrf.mxu0 }
 0x1b7   : > { %8039 = vst [vmem:[#allocation14_spill] sm:$0xff] %v5590_v35 }
 0x1be   : > { %v1007_v37 = vpop.f32.mrf.mxu0 }
 0x1bf   : > { %v1008_v38 = vadd.f32 %v1007_v37, %v969_v34 }
 0x1c1   : > { %4288 = vmatmul.msk.f32.vlgmr.msra.gmra.mxu3 %vm750_vm0, %v1008_v38 }
 0x1c6   : > { %v1010_v40 = vpop.f32.mrf.mxu0 }
 0x1c7   : > { %v1011_v41 = vadd.f32 %v1010_v40, %v972_v36 }
 0x1c9   : > { %4289 = vmatmul.msk.f32.gmra.mxu3 %vm750_vm0, %v1011_v41 }
 0x1ce   : > { %v1013_v51 = vpop.f32.mrf.mxu0 }
 0x1cf   : > { %v1014_v54 = vadd.f32 %v1013_v51, %v975_v39 }
 0x1d1   : > { %4290 = vmatmul.msk.f32.gmra.mxu3 %vm750_vm0, %v1014_v54 }
 0x1d9   : > { %4291 = vmatmul.msk.f32.gmra.mxu3 %vm750_vm0, %v1017_v60 }
 0x1e1   : > { %4292 = vmatmul.msk.f32.gmra.mxu3 %vm750_vm0, %v1020_v0 }
 0x1e9   : > { %4293 = vmatmul.msk.f32.gmra.mxu3 %vm750_vm0, %v1023_v5 }
 0x1f1   : > { %4294 = vmatmul.msk.f32.gmra.mxu3 %vm750_vm0, %v1026_v9 }
 0x244   : > { %v1078_v28 = vpop.f32.mrf.mxu3 }
 0x245   : > { %v1079_v31 = vadd.f32 %v4982_v27, %v1078_v28 }
 0x247   : > { %v5626_v34 = vmax.f32 %v1079_v31, 0.0 }
 0x249   : > { %4295 = vmatmul.msk.f32.vlgmr.msrb.gmra.mxu3 %vm750_vm0, %v5626_v34  ;;  %4491 = vmatmul.msk.f32.vlgmr.msra.gmra.mxu0 %vm750_vm0, %v5626_v34 }
 0x24c   : > { %v1081_v36 = vpop.f32.mrf.mxu3 }
 0x24d   : > { %v1082_v37 = vadd.f32 %v4982_v27, %v1081_v36 }
 0x24f   : > { %v5632_v38 = vmax.f32 %v1082_v37, 0.0  ;;  %v1169_v37 = vld [vmem:[%s8019_s2] sm:$0xff] }
 0x251   : > { %4296 = vmatmul.msk.f32.gmra.mxu3 %vm750_vm0, %v5632_v38  ;;  %4492 = vmatmul.msk.f32.gmra.mxu0 %vm750_vm0, %v5632_v38 }
 0x254   : > { %v1084_v39 = vpop.f32.mrf.mxu3 }
 0x255   : > { %v1085_v40 = vadd.f32 %v4982_v27, %v1084_v39  ;;  %v1187_v39 = vld [vmem:[%s8019_s2 + $0x90] sm:$0xff] }
 0x257   : > { %v5638_v41 = vmax.f32 %v1085_v40, 0.0  ;;  %v1170_v40 = vld [vmem:[%s8019_s2 + $0x8] sm:$0xff] }
 0x259   : > { %4297 = vmatmul.msk.f32.gmra.mxu3 %vm750_vm0, %v5638_v41  ;;  %4493 = vmatmul.msk.f32.gmra.mxu0 %vm750_vm0, %v5638_v41 }
 0x25c   : > { %v1087_v42 = vpop.f32.mrf.mxu3 }
 0x25d   : > { %v1088_v45 = vadd.f32 %v4982_v27, %v1087_v42  ;;  %v1188_v42 = vld [vmem:[%s8019_s2 + $0x98] sm:$0xff] }
 0x25f   : > { %v5644_v51 = vmax.f32 %v1088_v45, 0.0  ;;  %v1171_v45 = vld [vmem:[%s8019_s2 + $0x10] sm:$0xff] }
 0x261   : > { %4298 = vmatmul.msk.f32.gmra.mxu3 %vm750_vm0, %v5644_v51  ;;  %4494 = vmatmul.msk.f32.gmra.mxu0 %vm750_vm0, %v5644_v51 }
 0x264   : > { %v1090_v54 = vpop.f32.mrf.mxu3 }
 0x265   : > { %v1091_v57 = vadd.f32 %v4982_v27, %v1090_v54  ;;  %v1189_v54 = vld [vmem:[%s8019_s2 + $0xa0] sm:$0xff] }
 0x267   : > { %v5650_v59 = vmax.f32 %v1091_v57, 0.0  ;;  %v1172_v57 = vld [vmem:[%s8019_s2 + $0x18] sm:$0xff] }
 0x269   : > { %4299 = vmatmul.msk.f32.gmra.mxu3 %vm750_vm0, %v5650_v59  ;;  %4495 = vmatmul.msk.f32.gmra.mxu0 %vm750_vm0, %v5650_v59 }
 0x26c   : > { %v1093_v60 = vpop.f32.mrf.mxu3 }
 0x26d   : > { %v1094_v61 = vadd.f32 %v4982_v27, %v1093_v60  ;;  %v1190_v60 = vld [vmem:[%s8019_s2 + $0xa8] sm:$0xff] }
 0x26f   : > { %v5656_v62 = vmax.f32 %v1094_v61, 0.0  ;;  %v1173_v61 = vld [vmem:[%s8019_s2 + $0x20] sm:$0xff] }
 0x271   : > { %4300 = vmatmul.msk.f32.gmra.mxu3 %vm750_vm0, %v5656_v62  ;;  %4496 = vmatmul.msk.f32.gmra.mxu0 %vm750_vm0, %v5656_v62 }
 0x274   : > { %v1096_v0 = vpop.f32.mrf.mxu3 }
 0x275   : > { %v1097_v1 = vadd.f32 %v4982_v27, %v1096_v0  ;;  %v1191_v0 = vld [vmem:[%s8019_s2 + $0xb0] sm:$0xff] }
 0x277   : > { %v5662_v4 = vmax.f32 %v1097_v1, 0.0  ;;  %v1174_v1 = vld [vmem:[%s8019_s2 + $0x28] sm:$0xff] }
 0x279   : > { %4301 = vmatmul.msk.f32.gmra.mxu3 %vm750_vm0, %v5662_v4  ;;  %4497 = vmatmul.msk.f32.gmra.mxu0 %vm750_vm0, %v5662_v4 }
 0x2c6   : > { %v2109_v5 = vpop.f32.mrf.mxu0 }
 0x2cc   : > { %v1148_v6 = vpop.f32.mrf.mxu3 }
 0x2ce   : > { %v2112_v8 = vpop.f32.mrf.mxu0 }
 0x2d4   : > { %v1151_v9 = vpop.f32.mrf.mxu3 }
 0x2d6   : > { %v2115_v10 = vpop.f32.mrf.mxu0 }
 0x2dc   : > { %v1154_v12 = vpop.f32.mrf.mxu3 }
 0x2de   : > { %v2118_v13 = vpop.f32.mrf.mxu0 }
 0x2e4   : > { %v1157_v24 = vpop.f32.mrf.mxu3 }
 0x2e6   : > { %v2121_v25 = vpop.f32.mrf.mxu0 }
 0x2ec   : > { %v1160_v26 = vpop.f32.mrf.mxu3 }
 0x2ee   : > { %v2124_v28 = vpop.f32.mrf.mxu0 }
 0x2f4   : > { %v1163_v27 = vpop.f32.mrf.mxu3 }
 0x2f6   : > { %v2127_v31 = vpop.f32.mrf.mxu0 }
 0x2f7   : > { %4530 = vmatpush.msk.msrb.mxu0 %vm1298_vm1, %v2127_v31  ;;  %v4335_v31 = vld [vmem:[%s8022_s5 + $0x20] sm:$0xff] }
 0x2f9   : > { %2272 = vmatpush.msrb.mxu0 %v2124_v28  ;;  %v4337_v28 = vld [vmem:[%s8022_s5 + $0x30] sm:$0xff] }
 0x2fb   : > { %2273 = vmatpush.msrb.mxu0 %v2121_v25  ;;  %v1196_v25 = vld [vmem:[%s8019_s2 + $0xd8] sm:$0xff] }
 0x2fc   : > { %v1166_v36 = vpop.f32.mrf.mxu3 }
 0x2fd   : > { %4302 = vmatpush.msk.msrb.mxu1 %vm1298_vm1, %v1166_v36  ;;  %4950 = vmatpush.msk.msrb.mxu2 %vm1298_vm1, %v1166_v36  ;;  %v1179_v36 = vld [vmem:[%s8019_s2 + $0x50] sm:$0xff] }
 0x2fe   : > { %2274 = vmatpush.msrb.mxu0 %v2118_v13  ;;  %v1195_v13 = vld [vmem:[%s8019_s2 + $0xd0] sm:$0xff] }
 0x2ff   : > { %1312 = vmatpush.msrb.mxu1 %v1163_v27  ;;  %4951 = vmatpush.msrb.mxu2 %v1163_v27  ;;  %v4336_v27 = vld [vmem:[%s8022_s5 + $0x28] sm:$0xff] }
 0x300   : > { %2275 = vmatpush.msrb.mxu0 %v2115_v10  ;;  %v1194_v10 = vld [vmem:[%s8019_s2 + $0xc8] sm:$0xff] }
 0x301   : > { %1313 = vmatpush.msrb.mxu1 %v1160_v26  ;;  %4952 = vmatpush.msrb.mxu2 %v1160_v26  ;;  %v4338_v26 = vld [vmem:[%s8022_s5 + $0x38] sm:$0xff] }
 0x302   : > { %2276 = vmatpush.msrb.mxu0 %v2112_v8  ;;  %v1193_v8 = vld [vmem:[%s8019_s2 + $0xc0] sm:$0xff] }
 0x303   : > { %1314 = vmatpush.msrb.mxu1 %v1157_v24  ;;  %4953 = vmatpush.msrb.mxu2 %v1157_v24  ;;  %v1178_v24 = vld [vmem:[%s8019_s2 + $0x48] sm:$0xff] }
 0x304   : > { %2277 = vmatpush.msrb.mxu0 %v2109_v5  ;;  %v1192_v5 = vld [vmem:[%s8019_s2 + $0xb8] sm:$0xff] }
 0x305   : > { %1315 = vmatpush.msrb.mxu1 %v1154_v12  ;;  %4954 = vmatpush.msrb.mxu2 %v1154_v12  ;;  %v1177_v12 = vld [vmem:[%s8019_s2 + $0x40] sm:$0xff] }
 0x307   : > { %1316 = vmatpush.msrb.mxu1 %v1151_v9  ;;  %4955 = vmatpush.msrb.mxu2 %v1151_v9  ;;  %v1176_v9 = vld [vmem:[%s8019_s2 + $0x38] sm:$0xff] }
 0x309   : > { %1317 = vmatpush.msrb.mxu1 %v1148_v6  ;;  %4956 = vmatpush.msrb.mxu2 %v1148_v6  ;;  %v1175_v6 = vld [vmem:[%s8019_s2 + $0x30] sm:$0xff] }
 0x30a   : > { %4303 = vmatmul.msk.f32.vlgmr.msrb.gmra.mxu1 %vm1201_vm2, %v1169_v37  ;;  %4321 = vmatmul.msk.f32.vlgmr.msrb.gmra.mxu2 %vm1201_vm2, %v1187_v39  ;;  %v1197_v37 = vld [vmem:[%s8019_s2 + $0xe0] sm:$0xff]  ;;  %v1180_v39 = vld [vmem:[%s8019_s2 + $0x58] sm:$0xff] }
 0x30b   : > { %1464 = vmatpush.msra.mxu2 %v4338_v26 }
 0x30d   : > { %1465 = vmatpush.msra.mxu2 %v4337_v28 }
 0x30f   : > { %1466 = vmatpush.msra.mxu2 %v4336_v27 }
 0x311   : > { %1467 = vmatpush.msra.mxu2 %v4335_v31 }
 0x312   : > { %4304 = vmatmul.msk.f32.gmra.mxu1 %vm1201_vm2, %v1170_v40  ;;  %4322 = vmatmul.msk.f32.gmra.mxu2 %vm1201_vm2, %v1188_v42  ;;  %v1198_v40 = vld [vmem:[%s8019_s2 + $0xe8] sm:$0xff]  ;;  %v1181_v42 = vld [vmem:[%s8019_s2 + $0x60] sm:$0xff] }
 0x31a   : > { %4305 = vmatmul.msk.f32.gmra.mxu1 %vm1201_vm2, %v1171_v45  ;;  %4323 = vmatmul.msk.f32.gmra.mxu2 %vm1201_vm2, %v1189_v54  ;;  %v1199_v45 = vld [vmem:[%s8019_s2 + $0xf0] sm:$0xff]  ;;  %v1182_v54 = vld [vmem:[%s8019_s2 + $0x68] sm:$0xff] }
 0x322   : > { %4306 = vmatmul.msk.f32.gmra.mxu1 %vm1201_vm2, %v1172_v57  ;;  %4324 = vmatmul.msk.f32.gmra.mxu2 %vm1201_vm2, %v1190_v60  ;;  %v1200_v57 = vld [vmem:[%s8019_s2 + $0xf8] sm:$0xff]  ;;  %v1183_v60 = vld [vmem:[%s8019_s2 + $0x70] sm:$0xff] }
 0x32a   : > { %4307 = vmatmul.msk.f32.gmra.mxu1 %vm1201_vm2, %v1173_v61  ;;  %4325 = vmatmul.msk.f32.gmra.mxu2 %vm1201_vm2, %v1191_v0  ;;  %v1184_v61 = vld [vmem:[%s8019_s2 + $0x78] sm:$0xff]  ;;  %v5807_v0 = vld [vmem:[%s8024_s7] ss:$0 sm:$0xff] }
 0x32b   : > { %v890_v28 = vadd.f32 %v5807_v0, %v5450_v46 }
 0x332   : > { %4308 = vmatmul.msk.f32.gmra.mxu1 %vm1201_vm2, %v1174_v1  ;;  %4326 = vmatmul.msk.f32.gmra.mxu2 %vm1201_vm2, %v1192_v5  ;;  %v888_v1 = vadd.f32 %v5807_v0, %v5444_v43  ;;  %v4413_v43 = vld [vmem:[%s8022_s5 + $0x50] sm:$0xff] }
 0x33a   : > { %4309 = vmatmul.msk.f32.gmra.mxu1 %vm1201_vm2, %v1175_v6  ;;  %4327 = vmatmul.msk.f32.gmra.mxu2 %vm1201_vm2, %v1193_v8  ;;  %v1185_v6 = vld [vmem:[%s8019_s2 + $0x80] sm:$0xff] }
 0x342   : > { %4310 = vmatmul.msk.f32.gmra.mxu1 %vm1201_vm2, %v1176_v9  ;;  %4328 = vmatmul.msk.f32.gmra.mxu2 %vm1201_vm2, %v1194_v10  ;;  %v4414_v9 = vld [vmem:[%s8022_s5 + $0x58] sm:$0xff] }
 0x343   : > { %1784 = vmatpush.msrb.mxu2 %v4414_v9 }
 0x345   : > { %1785 = vmatpush.msrb.mxu2 %v4413_v43 }
 0x34a   : > { %4311 = vmatmul.msk.f32.gmra.mxu1 %vm1201_vm2, %v1177_v12  ;;  %4329 = vmatmul.msk.f32.gmra.mxu2 %vm1201_vm2, %v1195_v13  ;;  %v1186_v13 = vld [vmem:[%s8019_s2 + $0x88] sm:$0xff] }
 0x352   : > { %4312 = vmatmul.msk.f32.gmra.mxu1 %vm1201_vm2, %v1178_v24  ;;  %4330 = vmatmul.msk.f32.gmra.mxu2 %vm1201_vm2, %v1196_v25  ;;  %v4412_v24 = vld [vmem:[%s8022_s5 + $0x48] sm:$0xff]  ;;  %v4411_v25 = vld [vmem:[%s8022_s5 + $0x40] sm:$0xff] }
 0x353   : > { %1786 = vmatpush.msrb.mxu2 %v4412_v24 }
 0x355   : > { %1787 = vmatpush.msrb.mxu2 %v4411_v25 }
 0x35a   : > { %4313 = vmatmul.msk.f32.gmra.mxu1 %vm1201_vm2, %v1179_v36  ;;  %4331 = vmatmul.msk.f32.gmra.mxu2 %vm1201_vm2, %v1197_v37 }
 0x362   : > { %4314 = vmatmul.msk.f32.gmra.mxu1 %vm1201_vm2, %v1180_v39  ;;  %4332 = vmatmul.msk.f32.gmra.mxu2 %vm1201_vm2, %v1198_v40  ;;  %v892_v40 = vadd.f32 %v5807_v0, %v5456_v49 }
 0x36a   : > { %4315 = vmatmul.msk.f32.gmra.mxu1 %vm1201_vm2, %v1181_v42  ;;  %4333 = vmatmul.msk.f32.gmra.mxu2 %vm1201_vm2, %v1199_v45 }
 0x372   : > { %4316 = vmatmul.msk.f32.gmra.mxu1 %vm1201_vm2, %v1182_v54  ;;  %4334 = vmatmul.msk.f32.gmra.mxu2 %vm1201_vm2, %v1200_v57 }
 0x37a   : > { %4317 = vmatmul.msk.f32.gmra.mxu1 %vm1201_vm2, %v1183_v60  ;;  %4339 = vmatmul.msk.f32.vlgmr.msra.gmra.mxu2 %vm750_vm0, %v5626_v34  ;;  %v894_v60 = vadd.f32 %v5807_v0, %v5462_v52 }
 0x382   : > { %4318 = vmatmul.msk.f32.gmra.mxu1 %vm1201_vm2, %v1184_v61  ;;  %4340 = vmatmul.msk.f32.gmra.mxu2 %vm750_vm0, %v5632_v38 }
 0x387   : > { %v1319_v5 = vpop.f32.mrf.mxu1 }
 0x388   : > { %v5817_v8 = vadd.f32 %v1319_v5, %v888_v1 }
 0x38a   : > { %4319 = vmatmul.msk.f32.gmra.mxu1 %vm1201_vm2, %v1185_v6  ;;  %4341 = vmatmul.msk.f32.gmra.mxu2 %vm750_vm0, %v5638_v41 }
 0x38d   : > { %v5825_v10 = vpop.f32.mrf.mxu2 }
 0x38f   : > { %v5830_v12 = vpop.f32.mrf.mxu1 }
 0x392   : > { %4320 = vmatmul.msk.f32.gmra.mxu1 %vm1201_vm2, %v1186_v13  ;;  %4342 = vmatmul.msk.f32.gmra.mxu2 %vm750_vm0, %v5644_v51 }
 0x395   : > { %v5844_v26 = vpop.f32.mrf.mxu2 }
 0x397   : > { %v1325_v27 = vpop.f32.mrf.mxu1 }
 0x398   : > { %v5848_v31 = vadd.f32 %v1325_v27, %v890_v28 }
 0x39a   : > { %4343 = vmatmul.msk.f32.gmra.mxu2 %vm750_vm0, %v5650_v59 }
 0x39d   : > { %v5852_v36 = vpop.f32.mrf.mxu2 }
 0x39f   : > { %v5854_v37 = vpop.f32.mrf.mxu1 }
 0x3a2   : > { %4344 = vmatmul.msk.f32.gmra.mxu2 %vm750_vm0, %v5656_v62 }
 0x3a5   : > { %v5858_v39 = vpop.f32.mrf.mxu2 }
 0x3a7   : > { %v1331_v42 = vpop.f32.mrf.mxu1 }
 0x3a8   : > { %v5862_v46 = vadd.f32 %v1331_v42, %v892_v40  ;;  %v4347_v40 = vld [vmem:[%s8019_s2 + $0x108] sm:$0xff] }
 0x3aa   : > { %4345 = vmatmul.msk.f32.gmra.mxu2 %vm750_vm0, %v5662_v4 }
 0x3ad   : > { %v5866_v45 = vpop.f32.mrf.mxu2 }
 0x3ae   : > { %8040 = vst [vmem:[#allocation15_spill] sm:$0xff] %v5866_v45 }
 0x3af   : > { %v5868_v54 = vpop.f32.mrf.mxu1 }
 0x3b2   : > { %4415 = vmatmul.msk.f32.vlgmr.msrb.gmra.mxu2 %vm750_vm0, %v5626_v34 }
 0x3b5   : > { %v5872_v57 = vpop.f32.mrf.mxu2 }
 0x3b6   : > { %8041 = vst [vmem:[#allocation16_spill] sm:$0xff] %v5872_v57 }
 0x3b7   : > { %v1337_v61 = vpop.f32.mrf.mxu1 }
 0x3b8   : > { %v5876_v49 = vadd.f32 %v1337_v61, %v894_v60  ;;  %v4348_v60 = vld [vmem:[%s8019_s2 + $0x110] sm:$0xff] }
 0x3ba   : > { %4416 = vmatmul.msk.f32.gmra.mxu2 %vm750_vm0, %v5632_v38 }
 0x3bd   : > { %v5880_v1 = vpop.f32.mrf.mxu2 }
 0x3be   : > { %8042 = vst [vmem:[#allocation17_spill] sm:$0xff] %v5880_v1 }
 0x3c2   : > { %4417 = vmatmul.msk.f32.gmra.mxu2 %vm750_vm0, %v5638_v41 }
 0x3c5   : > { %v5884_v5 = vpop.f32.mrf.mxu2 }
 0x3c6   : > { %8043 = vst [vmem:[#allocation18_spill] sm:$0xff] %v5884_v5  ;;  %v6481_v5 = vld [vmem:[%s8019_s2 + $0x2e0] sm:$0xff] }
 0x3ca   : > { %4418 = vmatmul.msk.f32.gmra.mxu2 %vm750_vm0, %v5644_v51 }
 0x3cd   : > { %v5888_v34 = vpop.f32.mrf.mxu2 }
 0x3ce   : > { %8044 = vst [vmem:[#allocation19_spill] sm:$0xff] %v5888_v34  ;;  %v6440_v34 = vld [vmem:[%s8019_s2 + $0x2d0] sm:$0xff] }
 0x3d2   : > { %4419 = vmatmul.msk.f32.gmra.mxu2 %vm750_vm0, %v5650_v59 }
 0x3d5   : > { %v5892_v52 = vpop.f32.mrf.mxu2 }
 0x3d6   : > { %8045 = vst [vmem:[#allocation20_spill] sm:$0xff] %v5892_v52 }
 0x3da   : > { %4420 = vmatmul.msk.f32.gmra.mxu2 %vm750_vm0, %v5656_v62 }
 0x3dd   : > { %v5896_v38 = vpop.f32.mrf.mxu2 }
 0x3de   : > { %8046 = vst [vmem:[#allocation21_spill] sm:$0xff] %v5896_v38 }
 0x3e2   : > { %4421 = vmatmul.msk.f32.gmra.mxu2 %vm750_vm0, %v5662_v4  ;;  %v4346_v4 = vld [vmem:[%s8019_s2 + $0x100] sm:$0xff] }
 0x3e5   : > { %v5900_v41 = vpop.f32.mrf.mxu2 }
 0x3e6   : > { %8047 = vst [vmem:[#allocation22_spill] sm:$0xff] %v5900_v41 }
 0x3ed   : > { %v5902_v6 = vpop.f32.mrf.mxu2 }
 0x3ee   : > { %8048 = vst [vmem:[#allocation23_spill] sm:$0xff] %v5902_v6 }
 0x3f5   : > { %v5904_v51 = vpop.f32.mrf.mxu2 }
 0x3f6   : > { %8049 = vst [vmem:[#allocation24_spill] sm:$0xff] %v5904_v51 }
 0x3fd   : > { %v1469_v9 = vpop.f32.mrf.mxu2 }
 0x405   : > { %v1472_v43 = vpop.f32.mrf.mxu2 }
 0x40d   : > { %v1475_v13 = vpop.f32.mrf.mxu2 }
 0x415   : > { %v1478_v59 = vpop.f32.mrf.mxu2 }
 0x41d   : > { %v1481_v24 = vpop.f32.mrf.mxu2 }
 0x425   : > { %v1484_v25 = vpop.f32.mrf.mxu2 }
 0x42d   : > { %v1487_v28 = vpop.f32.mrf.mxu2 }
 0x42e   : > { %4378 = vmatpush.msk.msra.mxu3 %vm1298_vm1, %v1487_v28  ;;  %v4897_v28 = vld [vmem:[%s5425_s26 + $0x80] sm:$0xff] }
 0x430   : > { %1632 = vmatpush.msra.mxu3 %v1484_v25  ;;  %v4498_v25 = vld [vmem:[%s8019_s2 + $0x300] sm:$0xff] }
 0x431   : > { %4531 = vmatmul.msk.f32.vlgmr.msrb.gmra.mxu0 %vm1201_vm2, %v4498_v25  ;;  %v4353_v25 = vld [vmem:[%s8019_s2 + $0x138] sm:$0xff] }
 0x432   : > { %1633 = vmatpush.msra.mxu3 %v1481_v24  ;;  %v4350_v24 = vld [vmem:[%s8019_s2 + $0x120] sm:$0xff] }
 0x434   : > { %1634 = vmatpush.msra.mxu3 %v1478_v59  ;;  %v4913_v59 = vld [vmem:[%s8023_s6 + $0x10] sm:$0xff] }
 0x435   : > { %v1789_v62 = vpop.f32.mrf.mxu2 }
 0x436   : > { %1635 = vmatpush.msra.mxu3 %v1475_v13 }
 0x438   : > { %1636 = vmatpush.msra.mxu3 %v1472_v43  ;;  %v4914_v43 = vld [vmem:[%s8023_s6 + $0x18] sm:$0xff] }
 0x439   : > { %2591 = vmatpush.bf16.msra.mxu1 %v4914_v43  ;;  %v4352_v43 = vld [vmem:[%s8019_s2 + $0x130] sm:$0xff] }
 0x43a   : > { %1637 = vmatpush.msra.mxu3 %v1469_v9  ;;  %v4349_v9 = vld [vmem:[%s8019_s2 + $0x118] sm:$0xff] }
 0x43b   : > { %4379 = vmatmul.msk.f32.vlgmr.msra.gmra.mxu3 %vm1201_vm2, %v4346_v4 }
 0x43d   : > { %v1792_v27 = vpop.f32.mrf.mxu2  ;;  %2592 = vmatpush.bf16.msra.mxu1 %v4913_v59  ;;  %v4500_v59 = vld [vmem:[%s8019_s2 + $0x310] sm:$0xff] }
 0x440   : > { %4671 = vmatmul.msk.bf16.vlgmr.msra.gmra.mxu1 %vm750_vm0, %v4897_v28  ;;  %v4899_v28 = vld [vmem:[%s5425_s26 + $0x90] sm:$0xff] }
 0x443   : > { %4380 = vmatmul.msk.f32.gmra.mxu3 %vm1201_vm2, %v4347_v40  ;;  %v4351_v40 = vld [vmem:[%s8019_s2 + $0x128] sm:$0xff] }
 0x445   : > { %v1795_v42 = vpop.f32.mrf.mxu2 }
 0x44b   : > { %4381 = vmatmul.msk.f32.gmra.mxu3 %vm1201_vm2, %v4348_v60  ;;  %v4499_v60 = vld [vmem:[%s8019_s2 + $0x308] sm:$0xff] }
 0x44c   : > { %4532 = vmatmul.msk.f32.gmra.mxu0 %vm1201_vm2, %v4499_v60  ;;  %v4424_v60 = vld [vmem:[%s8019_s2 + $0x210] sm:$0xff] }
 0x44d   : > { %v1798_v61 = vpop.f32.mrf.mxu2 }
 0x453   : > { %4382 = vmatmul.msk.f32.gmra.mxu3 %vm1201_vm2, %v4349_v9 }
 0x454   : > { %4533 = vmatmul.msk.f32.gmra.mxu0 %vm1201_vm2, %v4500_v59  ;;  %v4356_v59 = vld [vmem:[%s8019_s2 + $0x150] sm:$0xff] }
 0x455   : > { %v1801_v13 = vpop.f32.mrf.mxu2 }
 0x45b   : > { %4383 = vmatmul.msk.f32.gmra.mxu3 %vm1201_vm2, %v4350_v24  ;;  %v4898_v24 = vld [vmem:[%s5425_s26 + $0x88] sm:$0xff] }
 0x45c   : > { %4672 = vmatmul.msk.bf16.gmra.mxu1 %vm750_vm0, %v4898_v24  ;;  %v4425_v24 = vld [vmem:[%s8019_s2 + $0x218] sm:$0xff] }
 0x45d   : > { %v1804_v4 = vpop.f32.mrf.mxu2 }
 0x463   : > { %4384 = vmatmul.msk.f32.gmra.mxu3 %vm1201_vm2, %v4351_v40  ;;  %v4355_v40 = vld [vmem:[%s8019_s2 + $0x148] sm:$0xff] }
 0x465   : > { %v1807_v9 = vpop.f32.mrf.mxu2 }
 0x466   : > { %4454 = vmatpush.msk.msra.mxu2 %vm1298_vm1, %v1807_v9  ;;  %v4503_v9 = vld [vmem:[%s8019_s2 + $0x328] sm:$0xff] }
 0x468   : > { %1952 = vmatpush.msra.mxu2 %v1804_v4  ;;  %v5983_v4 = vpop.f32.mrf.mxu1 }
 0x46a   : > { %1953 = vmatpush.msra.mxu2 %v1801_v13  ;;  %v4422_v13 = vld [vmem:[%s8019_s2 + $0x200] sm:$0xff] }
 0x46b   : > { %4385 = vmatmul.msk.f32.gmra.mxu3 %vm1201_vm2, %v4352_v43 }
 0x46c   : > { %1954 = vmatpush.msra.mxu2 %v1798_v61  ;;  %v4501_v61 = vld [vmem:[%s8019_s2 + $0x318] sm:$0xff]  ;;  %4673 = vmatmul.msk.bf16.gmra.mxu1 %vm750_vm0, %v4899_v28  ;;  %v4358_v28 = vld [vmem:[%s8019_s2 + $0x160] sm:$0xff] }
 0x46d   : > { %4534 = vmatmul.msk.f32.gmra.mxu0 %vm1201_vm2, %v4501_v61  ;;  %v4357_v61 = vld [vmem:[%s8019_s2 + $0x158] sm:$0xff] }
 0x46e   : > { %1955 = vmatpush.msra.mxu2 %v1795_v42  ;;  %v4423_v42 = vld [vmem:[%s8019_s2 + $0x208] sm:$0xff] }
 0x470   : > { %1956 = vmatpush.msra.mxu2 %v1792_v27  ;;  %v4354_v27 = vld [vmem:[%s8019_s2 + $0x140] sm:$0xff]  ;;  %v5998_v43 = vpop.f32.mrf.mxu1 }
 0x472   : > { %1957 = vmatpush.msra.mxu2 %v1789_v62  ;;  %v4502_v62 = vld [vmem:[%s8019_s2 + $0x320] sm:$0xff] }
 0x473   : > { %4386 = vmatmul.msk.f32.gmra.mxu3 %vm1201_vm2, %v4353_v25  ;;  %4455 = vmatmul.msk.f32.vlgmr.msra.gmra.mxu2 %vm1201_vm2, %v4422_v13  ;;  %v4504_v25 = vld [vmem:[%s8019_s2 + $0x330] sm:$0xff]  ;;  %v4900_v13 = vld [vmem:[%s5425_s26 + $0x98] sm:$0xff] }
 0x475   : > { %4535 = vmatmul.msk.f32.gmra.mxu0 %vm1201_vm2, %v4502_v62  ;;  %v4505_v62 = vld [vmem:[%s8019_s2 + $0x338] sm:$0xff] }
 0x47b   : > { %4387 = vmatmul.msk.f32.gmra.mxu3 %vm1201_vm2, %v4354_v27  ;;  %4456 = vmatmul.msk.f32.gmra.mxu2 %vm1201_vm2, %v4423_v42  ;;  %v4426_v27 = vld [vmem:[%s8019_s2 + $0x220] sm:$0xff]  ;;  %v6020_v42 = vpop.f32.mrf.mxu1 }
 0x47c   : > { %4674 = vmatmul.msk.bf16.gmra.mxu1 %vm750_vm0, %v4900_v13  ;;  %v4507_v13 = vld [vmem:[%s8019_s2 + $0x348] sm:$0xff] }
 0x47d   : > { %4536 = vmatmul.msk.f32.gmra.mxu0 %vm1201_vm2, %v4503_v9  ;;  %v4506_v9 = vld [vmem:[%s8019_s2 + $0x340] sm:$0xff] }
 0x483   : > { %4388 = vmatmul.msk.f32.gmra.mxu3 %vm1201_vm2, %v4355_v40  ;;  %4457 = vmatmul.msk.f32.gmra.mxu2 %vm1201_vm2, %v4424_v60  ;;  %v4427_v40 = vld [vmem:[%s8019_s2 + $0x228] sm:$0xff]  ;;  %v6034_v60 = vpop.f32.mrf.mxu1 }
 0x485   : > { %4537 = vmatmul.msk.f32.gmra.mxu0 %vm1201_vm2, %v4504_v25  ;;  %v4428_v25 = vld [vmem:[%s8019_s2 + $0x230] sm:$0xff] }
 0x48b   : > { %4389 = vmatmul.msk.f32.gmra.mxu3 %vm1201_vm2, %v4356_v59  ;;  %4458 = vmatmul.msk.f32.gmra.mxu2 %vm1201_vm2, %v4425_v24  ;;  %v4901_v59 = vld [vmem:[%s5425_s26 + $0xa0] sm:$0xff]  ;;  %v4359_v24 = vld [vmem:[%s8019_s2 + $0x168] sm:$0xff] }
 0x48c   : > { %4675 = vmatmul.msk.bf16.gmra.mxu1 %vm750_vm0, %v4901_v59  ;;  %v4361_v59 = vld [vmem:[%s8019_s2 + $0x178] sm:$0xff] }
 0x48d   : > { %4538 = vmatmul.msk.f32.gmra.mxu0 %vm1201_vm2, %v4505_v62  ;;  %v4429_v62 = vld [vmem:[%s8019_s2 + $0x238] sm:$0xff] }
 0x493   : > { %4390 = vmatmul.msk.f32.gmra.mxu3 %vm1201_vm2, %v4357_v61  ;;  %4459 = vmatmul.msk.f32.gmra.mxu2 %vm1201_vm2, %v4426_v27  ;;  %v6056_v61 = vpop.f32.mrf.mxu1  ;;  %v4360_v27 = vld [vmem:[%s8019_s2 + $0x170] sm:$0xff] }
 0x495   : > { %4539 = vmatmul.msk.f32.gmra.mxu0 %vm1201_vm2, %v4506_v9 }
 0x49b   : > { %4391 = vmatmul.msk.f32.gmra.mxu3 %vm1201_vm2, %v4358_v28  ;;  %4460 = vmatmul.msk.f32.gmra.mxu2 %vm1201_vm2, %v4427_v40  ;;  %v4508_v28 = vld [vmem:[%s8019_s2 + $0x350] sm:$0xff]  ;;  %v4902_v40 = vld [vmem:[%s5425_s26 + $0xa8] sm:$0xff]  ;;  %v6072_v9 = vpop.f32.mrf.mxu1 }
 0x49c   : > { %4676 = vmatmul.msk.bf16.gmra.mxu1 %vm750_vm0, %v4902_v40  ;;  %v4903_v40 = vld [vmem:[%s5425_s26 + $0xb0] sm:$0xff] }
 0x49d   : > { %4540 = vmatmul.msk.f32.gmra.mxu0 %vm1201_vm2, %v4507_v13  ;;  %v4362_v13 = vld [vmem:[%s8019_s2 + $0x180] sm:$0xff] }
 0x4a3   : > { %4392 = vmatmul.msk.f32.gmra.mxu3 %vm1201_vm2, %v4359_v24  ;;  %4461 = vmatmul.msk.f32.gmra.mxu2 %vm1201_vm2, %v4428_v25  ;;  %v4430_v24 = vld [vmem:[%s8019_s2 + $0x240] sm:$0xff]  ;;  %v4509_v25 = vld [vmem:[%s8019_s2 + $0x358] sm:$0xff] }
 0x4a5   : > { %4541 = vmatmul.msk.f32.gmra.mxu0 %vm1201_vm2, %v4508_v28  ;;  %v4510_v28 = vld [vmem:[%s8019_s2 + $0x360] sm:$0xff] }
 0x4ab   : > { %4393 = vmatmul.msk.f32.gmra.mxu3 %vm1201_vm2, %v4360_v27  ;;  %4462 = vmatmul.msk.f32.gmra.mxu2 %vm1201_vm2, %v4429_v62  ;;  %v4431_v27 = vld [vmem:[%s8019_s2 + $0x248] sm:$0xff]  ;;  %v6092_v62 = vpop.f32.mrf.mxu1 }
 0x4ac   : > { %4677 = vmatmul.msk.bf16.gmra.mxu1 %vm750_vm0, %v4903_v40 }
 0x4ad   : > { %4542 = vmatmul.msk.f32.gmra.mxu0 %vm1201_vm2, %v4509_v25  ;;  %v4363_v25 = vld [vmem:[%s8019_s2 + $0x188] sm:$0xff] }
 0x4ae   : > { %v2279_v6 = vpop.f32.mrf.mxu0 }
 0x4b3   : > { %4394 = vmatmul.msk.f32.gmra.mxu3 %vm1201_vm2, %v4361_v59  ;;  %4463 = vmatmul.msk.f32.gmra.mxu2 %vm1201_vm2, %v4430_v24  ;;  %v6113_v51 = vpop.f32.mrf.mxu1 }
 0x4b5   : > { %4543 = vmatmul.msk.f32.gmra.mxu0 %vm1201_vm2, %v4510_v28 }
 0x4bb   : > { %4395 = vmatmul.msk.f32.gmra.mxu3 %vm1201_vm2, %v4362_v13  ;;  %4464 = vmatmul.msk.f32.gmra.mxu2 %vm1201_vm2, %v4431_v27  ;;  %v4432_v13 = vld [vmem:[%s8019_s2 + $0x250] sm:$0xff]  ;;  %v889_v27 = vadd.f32 %v5807_v0, %v5447_v44 }
 0x4bc   : > { %v4364_v44 = vld [vmem:[%s8019_s2 + $0x190] sm:$0xff] }
 0x4bd   : > { %v1416_v28 = vadd.f32 %v5830_v12, %v889_v27  ;;  %v4904_v12 = vld [vmem:[%s5425_s26 + $0xb8] sm:$0xff]  ;;  %v6137_v27 = vpop.f32.mrf.mxu1 }
 0x4be   : > { %v1639_v59 = vpop.f32.mrf.mxu3  ;;  %8050 = vst [vmem:[#allocation25_spill] sm:$0xff] %v6137_v27  ;;  %4678 = vmatmul.msk.bf16.gmra.mxu1 %vm750_vm0, %v4904_v12 }
 0x4bf   : > { %v6103_v24 = vadd.f32 %v1639_v59, %v5817_v8  ;;  %v4511_v8 = vld [vmem:[%s8019_s2 + $0x368] sm:$0xff] }
 0x4c0   : > { %4544 = vmatmul.msk.f32.gmra.mxu0 %vm1201_vm2, %v4511_v8 }
 0x4c3   : > { %4396 = vmatmul.msk.f32.gmra.mxu3 %vm1201_vm2, %v4363_v25  ;;  %4465 = vmatmul.msk.f32.gmra.mxu2 %vm1201_vm2, %v4432_v13  ;;  %v4433_v25 = vld [vmem:[%s8019_s2 + $0x258] sm:$0xff]  ;;  %v4512_v13 = vld [vmem:[%s8019_s2 + $0x370] sm:$0xff] }
 0x4c6   : > { %v1642_v40 = vpop.f32.mrf.mxu3 }
 0x4c7   : > { %v6122_v59 = vadd.f32 %v1642_v40, %v1416_v28  ;;  %v4365_v40 = vld [vmem:[%s8019_s2 + $0x198] sm:$0xff] }
 0x4c8   : > { %4545 = vmatmul.msk.f32.gmra.mxu0 %vm1201_vm2, %v4512_v13 }
 0x4cb   : > { %4397 = vmatmul.msk.f32.gmra.mxu3 %vm1201_vm2, %v4364_v44  ;;  %4466 = vmatmul.msk.f32.gmra.mxu2 %vm1201_vm2, %v4433_v25  ;;  %v4434_v44 = vld [vmem:[%s8019_s2 + $0x260] sm:$0xff]  ;;  %v891_v25 = vadd.f32 %v5807_v0, %v5453_v47 }
 0x4cc   : > { %v4366_v47 = vld [vmem:[%s8019_s2 + $0x1a0] sm:$0xff] }
 0x4cd   : > { %v1418_v13 = vadd.f32 %v5854_v37, %v891_v25  ;;  %v4514_v37 = vld [vmem:[%s8019_s2 + $0x380] sm:$0xff] }
 0x4ce   : > { %v1645_v8 = vpop.f32.mrf.mxu3 }
 0x4cf   : > { %v6141_v28 = vadd.f32 %v1645_v8, %v5848_v31  ;;  %v4513_v31 = vld [vmem:[%s8019_s2 + $0x378] sm:$0xff]  ;;  %v6158_v8 = vpop.f32.mrf.mxu1 }
 0x4d0   : > { %4546 = vmatmul.msk.f32.gmra.mxu0 %vm1201_vm2, %v4513_v31 }
 0x4d3   : > { %4398 = vmatmul.msk.f32.gmra.mxu3 %vm1201_vm2, %v4365_v40  ;;  %4467 = vmatmul.msk.f32.gmra.mxu2 %vm1201_vm2, %v4434_v44  ;;  %v4435_v40 = vld [vmem:[%s8019_s2 + $0x268] sm:$0xff]  ;;  %v4905_v44 = vld [vmem:[%s5425_s26 + $0xc0] sm:$0xff] }
 0x4d4   : > { %4679 = vmatmul.msk.bf16.gmra.mxu1 %vm750_vm0, %v4905_v44 }
 0x4d6   : > { %v1648_v12 = vpop.f32.mrf.mxu3 }
 0x4d7   : > { %v6160_v35 = vadd.f32 %v1648_v12, %v1418_v13  ;;  %v4367_v13 = vld [vmem:[%s8019_s2 + $0x1a8] sm:$0xff]  ;;  %v4436_v12 = vld [vmem:[%s8019_s2 + $0x270] sm:$0xff] }
 0x4d8   : > { %4547 = vmatmul.msk.f32.gmra.mxu0 %vm1201_vm2, %v4514_v37 }
 0x4db   : > { %4399 = vmatmul.msk.f32.gmra.mxu3 %vm1201_vm2, %v4366_v47  ;;  %4468 = vmatmul.msk.f32.gmra.mxu2 %vm1201_vm2, %v4435_v40  ;;  %v6185_v47 = vpop.f32.mrf.mxu1  ;;  %v893_v40 = vadd.f32 %v5807_v0, %v5459_v50  ;;  %v4368_v50 = vld [vmem:[%s8019_s2 + $0x1b0] sm:$0xff] }
 0x4dc   : > { %8051 = vst [vmem:[#allocation26_spill] sm:$0xff] %v6185_v47 }
 0x4dd   : > { %v1420_v37 = vadd.f32 %v5868_v54, %v893_v40  ;;  %v4516_v54 = vld [vmem:[%s8019_s2 + $0x390] sm:$0xff]  ;;  %v4906_v40 = vld [vmem:[%s5425_s26 + $0xc8] sm:$0xff] }
 0x4de   : > { %v1651_v25 = vpop.f32.mrf.mxu3 }
 0x4df   : > { %v6177_v31 = vadd.f32 %v1651_v25, %v5862_v46  ;;  %v4515_v46 = vld [vmem:[%s8019_s2 + $0x388] sm:$0xff] }
 0x4e0   : > { %4548 = vmatmul.msk.f32.gmra.mxu0 %vm1201_vm2, %v4515_v46 }
 0x4e3   : > { %4400 = vmatmul.msk.f32.gmra.mxu3 %vm1201_vm2, %v4367_v13  ;;  %4469 = vmatmul.msk.f32.gmra.mxu2 %vm1201_vm2, %v4436_v12  ;;  %v4437_v13 = vld [vmem:[%s8019_s2 + $0x278] sm:$0xff]  ;;  %v2594_v12 = vpop.f32.mrf.mxu1 }
 0x4e4   : > { %4680 = vmatmul.msk.bf16.gmra.mxu1 %vm750_vm0, %v4906_v40 }
 0x4e6   : > { %v1654_v44 = vpop.f32.mrf.mxu3 }
 0x4e7   : > { %v6196_v25 = vadd.f32 %v1654_v44, %v1420_v37  ;;  %v4369_v44 = vld [vmem:[%s8019_s2 + $0x1b8] sm:$0xff] }
 0x4e8   : > { %4549 = vmatmul.msk.f32.gmra.mxu0 %vm1201_vm2, %v4516_v54  ;;  %v895_v54 = vadd.f32 %v5807_v0, %v5465_v53 }
 0x4eb   : > { %4401 = vmatmul.msk.f32.gmra.mxu3 %vm1201_vm2, %v4368_v50  ;;  %4470 = vmatmul.msk.f32.gmra.mxu2 %vm1201_vm2, %v4437_v13  ;;  %v4438_v50 = vld [vmem:[%s8019_s2 + $0x280] sm:$0xff]  ;;  %v2282_v13 = vpop.f32.mrf.mxu0  ;;  %v2596_v40 = vpop.f32.mrf.mxu1 }
 0x4ee   : > { %v1657_v46 = vpop.f32.mrf.mxu3 }
 0x4ef   : > { %v6213_v37 = vadd.f32 %v1657_v46, %v5876_v49  ;;  %v4517_v49 = vld [vmem:[%s8019_s2 + $0x398] sm:$0xff]  ;;  %v1422_v46 = vadd.f32 %v5983_v4, %v895_v54  ;;  %v896_v4 = vadd.f32 %v5807_v0, %v5468_v55 }
 0x4f0   : > { %4550 = vmatmul.msk.f32.gmra.mxu0 %vm1201_vm2, %v4517_v49  ;;  %v6240_v49 = vld [vmem:[%s5425_s26 + $0xbc] sm:$0xff]  }
 0x4f1   : > { %v1423_v55 = vadd.f32 %v5998_v43, %v896_v4  ;;  %v4440_v43 = vld [vmem:[%s8019_s2 + $0x290] sm:$0xff] }
 0x4f2   : > { %v4575_v4 = vld [vmem:[%s5425_s26 + $0xac] sm:$0xff]  }
 0x4f3   : > { %4402 = vmatmul.msk.f32.gmra.mxu3 %vm1201_vm2, %v4369_v44  ;;  %4471 = vmatmul.msk.f32.gmra.mxu2 %vm1201_vm2, %v4438_v50  ;;  %v4370_v44 = vld [vmem:[%s8019_s2 + $0x1c0] sm:$0xff]  ;;  %v4439_v50 = vld [vmem:[%s8019_s2 + $0x288] sm:$0xff]  ;;  %v2718_v23 = vunpack.c.h.bf16 %v4575_v4 }
 0x4f6   : > { %v1660_v33 = vpop.f32.mrf.mxu3  ;;  %v1959_v41 = vpop.f32.mrf.mxu2 }
 0x4f7   : > { %v6230_v32 = vadd.f32 %v1660_v33, %v1422_v46  ;;  %v2055_v53 = vadd.f32 %v1959_v41, %v6103_v24  ;;  %v2285_v33 = vpop.f32.mrf.mxu0  ;;  %v4518_v41 = vld [vmem:[%s8019_s2 + $0x3a0] sm:$0xff]  ;;  %v2721_v24 = vunpack.c.l.bf16 %v6240_v49  ;;  %v4577_v46 = vld [vmem:[%s5425_s26 + $0xb4] sm:$0xff]  }
 0x4f8   : > { %4551 = vmatmul.msk.f32.gmra.mxu0 %vm1201_vm2, %v4518_v41  ;;  %v2719_v52 = vunpack.c.l.bf16 %v4577_v46  ;;  %v4371_v41 = vld [vmem:[%s8019_s2 + $0x1c8] sm:$0xff] }
 0x4f9   : > { %v2375_v38 = vadd.f32 %v2279_v6, %v2055_v53  ;;  %v4907_v6 = vld [vmem:[%s5425_s26 + $0xd0] sm:$0xff]  ;;  %2738 = vmatpush.msrb.mxu3 %v2721_v24 }
 0x4fa   : > { %4681 = vmatmul.msk.bf16.gmra.mxu1 %vm750_vm0, %v4907_v6 }
 0x4fb   : > { %v6244_v54 = vadd.f32 %v2594_v12, %v2375_v38  ;;  %4403 = vmatmul.msk.f32.gmra.mxu3 %vm1201_vm2, %v4370_v44  ;;  %4472 = vmatmul.msk.f32.gmra.mxu2 %vm1201_vm2, %v4439_v50  ;;  %v2599_v38 = vpop.f32.mrf.mxu1  ;;  %v2720_v12 = vunpack.c.h.bf16 %v4577_v46  ;;  %v2717_v46 = vunpack.c.l.bf16 %v4575_v4 }
 0x4fd   : > { %2739 = vmatpush.msrb.mxu3 %v2720_v12 }
 0x4fe   : > { %v1663_v53 = vpop.f32.mrf.mxu3  ;;  %v1962_v44 = vpop.f32.mrf.mxu2 }
 0x4ff   : > { %v6257_v50 = vadd.f32 %v1663_v53, %v1423_v55  ;;  %v2056_v29 = vadd.f32 %v1962_v44, %v6122_v59  ;;  %2740 = vmatpush.msrb.mxu3 %v2719_v52  ;;  %v4519_v59 = vld [vmem:[%s8019_s2 + $0x3a8] sm:$0xff]  ;;  %v2288_v12 = vpop.f32.mrf.mxu0 }
 0x500   : > { %4552 = vmatmul.msk.f32.gmra.mxu0 %vm1201_vm2, %v4519_v59  ;;  %v4573_v55 = vld [vmem:[%s5425_s26 + $0xa4] sm:$0xff]  }
 0x501   : > { %v2376_v24 = vadd.f32 %v2282_v13, %v2056_v29  ;;  %2741 = vmatpush.msrb.mxu3 %v2718_v23  ;;  %v2716_v29 = vunpack.c.h.bf16 %v4573_v55  ;;  %v2715_v44 = vunpack.c.l.bf16 %v4573_v55  ;;  %v4441_v23 = vld [vmem:[%s8019_s2 + $0x298] sm:$0xff] }
 0x503   : > { %v6267_v6 = vadd.f32 %v2596_v40, %v2376_v24  ;;  %4404 = vmatmul.msk.f32.gmra.mxu3 %vm1201_vm2, %v4371_v41  ;;  %4473 = vmatmul.msk.f32.gmra.mxu2 %vm1201_vm2, %v4440_v43  ;;  %v2601_v53 = vpop.f32.mrf.mxu1  ;;  %v4372_v41 = vld [vmem:[%s8019_s2 + $0x1d0] sm:$0xff]  ;;  %v4571_v43 = vld [vmem:[%s5425_s26 + $0x9c] sm:$0xff]  }
 0x504   : > { %2742 = vmatpush.msrb.mxu3 %v2717_v46  ;;  %v2714_v24 = vunpack.c.h.bf16 %v4571_v43  ;;  %v4520_v46 = vld [vmem:[%s8019_s2 + $0x3b0] sm:$0xff]  ;;  %v2713_v55 = vunpack.c.l.bf16 %v4571_v43 }
 0x506   : > { %v6276_v52 = vpop.f32.mrf.mxu3  ;;  %v1965_v13 = vpop.f32.mrf.mxu2  ;;  %2743 = vmatpush.msrb.mxu3 %v2716_v29  ;;  %v4569_v29 = vld [vmem:[%s5425_s26 + $0x94] sm:$0xff]  }
 0x507   : > { %v2057_v40 = vadd.f32 %v1965_v13, %v6141_v28  ;;  %v898_v28 = vadd.f32 %v5807_v0, %v5486_v17  ;;  %v2712_v17 = vunpack.c.h.bf16 %v4569_v29  ;;  %v2711_v43 = vunpack.c.l.bf16 %v4569_v29 }
 0x508   : > { %2744 = vmatpush.msrb.mxu3 %v2715_v44  ;;  %4553 = vmatmul.msk.f32.gmra.mxu0 %vm1201_vm2, %v4520_v46 }
 0x509   : > { %v2377_v4 = vadd.f32 %v2285_v33, %v2057_v40  ;;  %v4908_v33 = vld [vmem:[%s5425_s26 + $0xd8] sm:$0xff]  ;;  %v1425_v13 = vadd.f32 %v6034_v60, %v898_v28  ;;  %v4442_v60 = vld [vmem:[%s8019_s2 + $0x2a0] sm:$0xff] }
 0x50a   : > { %2745 = vmatpush.msrb.mxu3 %v2714_v24  ;;  %4682 = vmatmul.msk.bf16.gmra.mxu1 %vm750_vm0, %v4908_v33  ;;  %v4567_v24 = vld [vmem:[%s5425_s26 + $0x8c] sm:$0xff]  }
 0x50b   : > { %v6288_v59 = vadd.f32 %v2599_v38, %v2377_v4  ;;  %4405 = vmatmul.msk.f32.gmra.mxu3 %vm1201_vm2, %v4372_v41  ;;  %4474 = vmatmul.msk.f32.gmra.mxu2 %vm1201_vm2, %v4441_v23  ;;  %v2291_v23 = vpop.f32.mrf.mxu0  ;;  %v4373_v4 = vld [vmem:[%s8019_s2 + $0x1d8] sm:$0xff]  ;;  %v2604_v46 = vpop.f32.mrf.mxu1  ;;  %v2709_v29 = vunpack.c.l.bf16 %v4567_v24 }
 0x50c   : > { %2746 = vmatpush.msrb.mxu3 %v2713_v55  ;;  %v2710_v55 = vunpack.c.h.bf16 %v4567_v24 }
 0x50e   : > { %v1669_v38 = vpop.f32.mrf.mxu3  ;;  %v1968_v40 = vpop.f32.mrf.mxu2  ;;  %2747 = vmatpush.msrb.mxu3 %v2712_v17 }
 0x50f   : > { %v6300_v44 = vadd.f32 %v1669_v38, %v1425_v13  ;;  %v2058_v41 = vadd.f32 %v1968_v40, %v6160_v35  ;;  %v4521_v35 = vld [vmem:[%s8019_s2 + $0x3b8] sm:$0xff]  ;;  %v4565_v13 = vld [vmem:[%s5425_s26 + $0x84] sm:$0xff]  }
 0x510   : > { %2748 = vmatpush.msrb.mxu3 %v2711_v43  ;;  %4554 = vmatmul.msk.f32.gmra.mxu0 %vm1201_vm2, %v4521_v35  ;;  %v2707_v40 = vunpack.c.l.bf16 %v4565_v13  ;;  %v6328_v43 = vld [vmem:[%s8019_s2 + $0x2a8] sm:$0xff] }
 0x511   : > { %v2378_v28 = vadd.f32 %v2288_v12, %v2058_v41  ;;  %v2708_v12 = vunpack.c.h.bf16 %v4565_v13  ;;  %v4374_v41 = vld [vmem:[%s8019_s2 + $0x1e0] sm:$0xff] }
 0x512   : > { %2749 = vmatpush.msrb.mxu3 %v2710_v55  ;;  %v4909_v13 = vld [vmem:[%s5425_s26 + $0xe0] sm:$0xff] }
 0x513   : > { %v6310_v33 = vadd.f32 %v2601_v53, %v2378_v28  ;;  %4406 = vmatmul.msk.f32.gmra.mxu3 %vm1201_vm2, %v4373_v4  ;;  %4475 = vmatmul.msk.f32.gmra.mxu2 %vm1201_vm2, %v4442_v60  ;;  %v4563_v4 = vld [vmem:[%s5425_s26 + $0x80] sm:$0xf]  ;;  %v2294_v24 = vpop.f32.mrf.mxu0  ;;  %v2606_v35 = vpop.f32.mrf.mxu1 }
 0x514   : > { %2750 = vmatpush.msrb.mxu3 %v2709_v29  ;;  %v2706_v28 = vunpack.c.l.bf16 %v4563_v4  ;;  %v4522_v29 = vld [vmem:[%s8019_s2 + $0x3c0] sm:$0xff] }
 0x516   : > { %v6319_v17 = vpop.f32.mrf.mxu3  ;;  %v1971_v38 = vpop.f32.mrf.mxu2  ;;  %2751 = vmatpush.msrb.mxu3 %v2708_v12 }
 0x517   : > { %v2059_v53 = vadd.f32 %v1971_v38, %v6177_v31  ;;  %v900_v31 = vadd.f32 %v5807_v0, %v5500_v48 }
 0x518   : > { %2752 = vmatpush.msrb.mxu3 %v2707_v40  ;;  %4555 = vmatmul.msk.f32.gmra.mxu0 %vm1201_vm2, %v4522_v29  ;;  %v6354_v40 = vld [vmem:[%s8019_s2 + $0x2b0] sm:$0xff]  ;;  %v6374_v29 = vld [vmem:[%s8019_s2 + $0x2b8] sm:$0xff] }
 0x519   : > { %v2379_v60 = vadd.f32 %v2291_v23, %v2059_v53  ;;  %v1427_v23 = vadd.f32 %v6072_v9, %v900_v31  ;;  %v4375_v53 = vld [vmem:[%s8019_s2 + $0x1e8] sm:$0xff] }
 0x51a   : > { %2753 = vmatpush.msrb.mxu3 %v2706_v28  ;;  %4683 = vmatmul.msk.bf16.gmra.mxu1 %vm750_vm0, %v4909_v13 }
 0x51b   : > { %v6333_v55 = vadd.f32 %v2604_v46, %v2379_v60  ;;  %4407 = vmatmul.msk.f32.gmra.mxu3 %vm1201_vm2, %v4374_v41  ;;  %4476 = vmatmul.msk.f32.gmra.mxu2 %vm1201_vm2, %v6328_v43  ;;  %v2297_v9 = vpop.f32.mrf.mxu0  ;;  %v2609_v60 = vpop.f32.mrf.mxu1 }
 0x51e   : > { %v1675_v12 = vpop.f32.mrf.mxu3  ;;  %v1974_v48 = vpop.f32.mrf.mxu2 }
 0x51f   : > { %v6345_v46 = vadd.f32 %v1675_v12, %v1427_v23  ;;  %v2060_v38 = vadd.f32 %v1974_v48, %v6196_v25  ;;  %v4523_v25 = vld [vmem:[%s8019_s2 + $0x3c8] sm:$0xff]  ;;  %v902_v23 = vadd.f32 %v5807_v0, %v5513_v56 }
 0x520   : > { %4556 = vmatmul.msk.f32.gmra.mxu0 %vm1201_vm2, %v4523_v25  ;;  %v4910_v48 = vld [vmem:[%s5425_s26 + $0xe8] sm:$0xff] }
 0x521   : > { %v2380_v41 = vadd.f32 %v2294_v24, %v2060_v38  ;;  %v1429_v38 = vadd.f32 %v6113_v51, %v902_v23 }
 0x523   : > { %v6356_v4 = vadd.f32 %v2606_v35, %v2380_v41  ;;  %4408 = vmatmul.msk.f32.gmra.mxu3 %vm1201_vm2, %v4375_v53  ;;  %4477 = vmatmul.msk.f32.gmra.mxu2 %vm1201_vm2, %v6354_v40  ;;  %v4376_v35 = vld [vmem:[%s8019_s2 + $0x1f0] sm:$0xff]  ;;  %v2300_v53 = vpop.f32.mrf.mxu0 }
 0x526   : > { %v6365_v28 = vpop.f32.mrf.mxu3  ;;  %v1977_v31 = vpop.f32.mrf.mxu2 }
 0x527   : > { %v2061_v24 = vadd.f32 %v1977_v31, %v6213_v37  ;;  %v4524_v37 = vld [vmem:[%s8019_s2 + $0x3d0] sm:$0xff]  ;;  %v4377_v31 = vld [vmem:[%s8019_s2 + $0x1f8] sm:$0xff] }
 0x528   : > { %4557 = vmatmul.msk.f32.gmra.mxu0 %vm1201_vm2, %v4524_v37 }
 0x529   : > { %v2381_v13 = vadd.f32 %v2297_v9, %v2061_v24  ;;  %v6399_v24 = vld [vmem:[%s8019_s2 + $0x2c0] sm:$0xff] }
 0x52a   : > { %4684 = vmatmul.msk.bf16.gmra.mxu1 %vm750_vm0, %v4910_v48 }
 0x52b   : > { %v6378_v12 = vadd.f32 %v2609_v60, %v2381_v13  ;;  %4409 = vmatmul.msk.f32.gmra.mxu3 %vm1201_vm2, %v4376_v35  ;;  %4478 = vmatmul.msk.f32.gmra.mxu2 %vm1201_vm2, %v6374_v29  ;;  %v2611_v60 = vpop.f32.mrf.mxu1  ;;  %v4594_v35 = vld [vmem:[%s5425_s26 + $0xf8] sm:$0xff]  }
 0x52c   : > { %v2737_v23 = vunpack.c.h.bf16 %v4594_v35  ;;  %v2736_v37 = vunpack.c.l.bf16 %v4594_v35 }
 0x52e   : > { %v1681_v41 = vpop.f32.mrf.mxu3  ;;  %v1980_v56 = vpop.f32.mrf.mxu2  ;;  %2776 = vmatpush.msra.mxu3 %v2737_v23 }
 0x52f   : > { %v6390_v9 = vadd.f32 %v1681_v41, %v1429_v38  ;;  %v2062_v25 = vadd.f32 %v1980_v56, %v6230_v32  ;;  %v4525_v32 = vld [vmem:[%s8019_s2 + $0x3d8] sm:$0xff]  ;;  %v4592_v38 = vld [vmem:[%s5425_s26 + $0xf0] sm:$0xff]   ;;  %v6417_v41 = vld [vmem:[%s8019_s2 + $0x2c8] sm:$0xff] }
 0x530   : > { %4558 = vmatmul.msk.f32.gmra.mxu0 %vm1201_vm2, %v4525_v32  ;;  %2777 = vmatpush.msra.mxu3 %v2736_v37  ;;  %v2734_v56 = vunpack.c.l.bf16 %v4592_v38  ;;  %v4911_v32 = vld [vmem:[%s5425_s26 + $0xf0] sm:$0xff] }
 0x531   : > { %8052 = vst [vmem:[#allocation27_spill] sm:$0xff] %v6390_v9  ;;  %v2382_v51 = vadd.f32 %v2300_v53, %v2062_v25  ;;  %v2735_v53 = vunpack.c.h.bf16 %v4592_v38  ;;  %v4590_v25 = vld [vmem:[%s5425_s26 + $0xe8] sm:$0xff]   ;;  %v4588_v38 = vld [vmem:[%s5425_s26 + $0xe0] sm:$0xff]  }
 0x532   : > { %v2733_v35 = vunpack.c.h.bf16 %v4590_v25  ;;  %v2732_v23 = vunpack.c.l.bf16 %v4590_v25  ;;  %v4527_v25 = vld [vmem:[%s8019_s2 + $0x3e8] sm:$0xff] }
 0x533   : > { %v6402_v13 = vadd.f32 %v2611_v60, %v2382_v51  ;;  %4410 = vmatmul.msk.f32.gmra.mxu3 %vm1201_vm2, %v4377_v31  ;;  %4479 = vmatmul.msk.f32.gmra.mxu2 %vm1201_vm2, %v6399_v24  ;;  %v904_v60 = vadd.f32 %v5807_v0, %v5530_v2  ;;  %v5112_v31 = vld [vmem:[%s8018_s1] sm:$0xff] }
 0x534   : > { %2778 = vmatpush.msra.mxu3 %v2735_v53  ;;  %v4526_v51 = vld [vmem:[%s8019_s2 + $0x3e0] sm:$0xff] }
 0x535   : > { %v1431_v2 = vadd.f32 %v6158_v8, %v904_v60  ;;  %v5113_v8 = vld [vmem:[%s8018_s1 + $0x10] sm:$0xff] }
 0x536   : > { %v6411_v48 = vpop.f32.mrf.mxu3  ;;  %2779 = vmatpush.msra.mxu3 %v2734_v56  ;;  %v2730_v56 = vunpack.c.l.bf16 %v4588_v38 }
 0x537   : > { %8053 = vst [vmem:[#allocation28_spill] sm:$0xff] %v6411_v48 }
 0x538   : > { %4559 = vmatmul.msk.f32.gmra.mxu0 %vm1201_vm2, %v4526_v51  ;;  %2780 = vmatpush.msra.mxu3 %v2733_v35  ;;  %v4586_v51 = vld [vmem:[%s5425_s26 + $0xd8] sm:$0xff]  }
 0x539   : > { %v2729_v60 = vunpack.c.h.bf16 %v4586_v51  ;;  %v2728_v35 = vunpack.c.l.bf16 %v4586_v51  ;;  %v5114_v51 = vld [vmem:[%s8018_s1 + $0x20] sm:$0xff] }
 0x53a   : > { %4685 = vmatmul.msk.bf16.gmra.mxu1 %vm750_vm0, %v4911_v32  ;;  %2781 = vmatpush.msra.mxu3 %v2732_v23 }
 0x53b   : > { %4480 = vmatmul.msk.f32.gmra.mxu2 %vm1201_vm2, %v6417_v41  ;;  %2754 = vmatmul.f32.vlgmr.msrb.gmra.mxu3 %v5112_v31  ;;  %v2731_v31 = vunpack.c.h.bf16 %v4588_v38 }
 0x53d   : > { %2782 = vmatpush.msra.mxu3 %v2731_v31  ;;  %v4582_v31 = vld [vmem:[%s5425_s26 + $0xc8] sm:$0xff]  }
 0x53e   : > { %v1687_v37 = vpop.f32.mrf.mxu3 }
 0x53f   : > { %v6435_v53 = vadd.f32 %v1687_v37, %v1431_v2  ;;  %2783 = vmatpush.msra.mxu3 %v2730_v56  ;;  %v4584_v2 = vld [vmem:[%s5425_s26 + $0xd0] sm:$0xff]   ;;  %v6458_v37 = vld [vmem:[%s8019_s2 + $0x2d8] sm:$0xff]  ;;  %v906_v56 = vadd.f32 %v5807_v0, %v5552_v11  ;;  %v2724_v11 = vunpack.c.l.bf16 %v4582_v31 }
 0x540   : > { %4560 = vmatmul.msk.f32.gmra.mxu0 %vm1201_vm2, %v4527_v25  ;;  %v2727_v23 = vunpack.c.h.bf16 %v4584_v2  ;;  %v2726_v38 = vunpack.c.l.bf16 %v4584_v2  ;;  %v2725_v25 = vunpack.c.h.bf16 %v4582_v31  ;;  %v5115_v31 = vld [vmem:[%s8018_s1 + $0x30] sm:$0xff] }
 0x541   : > { %8054 = vst [vmem:[#allocation29_spill] sm:$0xff] %v6435_v53  ;;  %2784 = vmatpush.msra.mxu3 %v2729_v60  ;;  %v4912_v60 = vld [vmem:[%s5425_s26 + $0xf8] sm:$0xff] }
 0x543   : > { %4481 = vmatmul.msk.f32.gmra.mxu2 %vm1201_vm2, %v6440_v34  ;;  %2757 = vmatmul.f32.gmra.mxu3 %v5113_v8  ;;  %v4528_v8 = vld [vmem:[%s8019_s2 + $0x3f0] sm:$0xff] }
 0x544   : > { %2785 = vmatpush.msra.mxu3 %v2728_v35  ;;  %v1433_v35 = vadd.f32 %v5825_v10, %v906_v56  ;;  %v907_v10 = vadd.f32 %v5807_v0, %v5560_v14  ;;  %v4529_v56 = vld [vmem:[%s8019_s2 + $0x3f8] sm:$0xff]  ;;  %v6501_v14 = vld [vmem:[%s8019_s2 + $0x2e8] sm:$0xff] }
 0x546   : > { %v6452_v32 = vpop.f32.mrf.mxu3  ;;  %2786 = vmatpush.msra.mxu3 %v2727_v23  ;;  %v4580_v23 = vld [vmem:[%s5425_s26 + $0xc4] sm:$0xf] }
 0x547   : > { %8055 = vst [vmem:[#allocation30_spill] sm:$0xff] %v6452_v32 }
 0x548   : > { %2787 = vmatpush.msra.mxu3 %v2726_v38  ;;  %4561 = vmatmul.msk.f32.gmra.mxu0 %vm1201_vm2, %v4528_v8  ;;  %v2722_v38 = vunpack.c.h.bf16 %v6240_v49  ;;  %v1434_v49 = vadd.f32 %v5844_v26, %v907_v10 }
 0x54a   : > { %2788 = vmatpush.msra.mxu3 %v2725_v25  ;;  %4686 = vmatmul.msk.bf16.gmra.mxu1 %vm750_vm0, %v4912_v60  ;;  %v908_v60 = vadd.f32 %v5807_v0, %v5562_v15  ;;  %v6521_v15 = vld [vmem:[%s8024_s7] ss:$0 sm:$0xff] }
 0x54b   : > { %4482 = vmatmul.msk.f32.gmra.mxu2 %vm1201_vm2, %v6458_v37  ;;  %2760 = vmatmul.f32.gmra.mxu3 %v5114_v51  ;;  %v2723_v51 = vunpack.c.l.bf16 %v4580_v23  ;;  %v6516_v23 = vld [vmem:[%s8019_s2 + $0x2f0] sm:$0xff]  ;;  %v909_v0 = vadd.f32 %v6521_v15, %v5564_v16  ;;  %v5119_v16 = vld [vmem:[%s8018_s1 + $0x60] sm:$0x3] }
 0x54c   : > { %2789 = vmatpush.msra.mxu3 %v2724_v11  ;;  %v1435_v26 = vadd.f32 %v5852_v36, %v908_v60  ;;  %v5118_v36 = vld [vmem:[%s8018_s1 + $0x50] sm:$0xff] }
 0x54e   : > { %v1693_v2 = vpop.f32.mrf.mxu3  ;;  %2790 = vmatpush.msra.mxu3 %v2723_v51  ;;  %v1436_v51 = vadd.f32 %v5858_v39, %v909_v0  ;;  %v5120_v39 = vld [vmem:[%s8018_s1 + $0x8] sm:$0xff]  ;;  %v6563_v0 = vpop.f32.mrf.mxu2 }
 0x54f   : > { %v6476_v22 = vadd.f32 %v1693_v2, %v1433_v35  ;;  %v5116_v35 = vld [vmem:[%s8018_s1 + $0x40] sm:$0xff] }
 0x550   : > { %2791 = vmatpush.msra.mxu3 %v2722_v38  ;;  %4562 = vmatmul.msk.f32.gmra.mxu0 %vm1201_vm2, %v4529_v56 }
 0x551   : > { %8056 = vst [vmem:[#allocation31_spill] sm:$0xff] %v6476_v22 }
 0x553   : > { %4483 = vmatmul.msk.f32.gmra.mxu2 %vm1201_vm2, %v6481_v5  ;;  %2763 = vmatmul.f32.gmra.mxu3 %v5115_v31  ;;  %v6536_v31 = vld [vmem:[%s8019_s2 + $0x2f8] sm:$0xff] }
 0x556   : > { %v1696_v8 = vpop.f32.mrf.mxu3 }
 0x557   : > { %v6496_v25 = vadd.f32 %v1696_v8, %v1434_v49  ;;  %v5121_v8 = vld [vmem:[%s8018_s1 + $0x18] sm:$0xff] }
 0x559   : > { %8057 = vst [vmem:[#allocation32_spill] sm:$0xff] %v6496_v25 }
 0x55b   : > { %4484 = vmatmul.msk.f32.gmra.mxu2 %vm1201_vm2, %v6501_v14  ;;  %2766 = vmatmul.f32.gmra.mxu3 %v5116_v35  ;;  %v5122_v35 = vld [vmem:[%s8018_s1 + $0x28] sm:$0xff] }
 0x55e   : > { %v1699_v11 = vpop.f32.mrf.mxu3 }
 0x55f   : > { %v6511_v2 = vadd.f32 %v1699_v11, %v1435_v26  ;;  %v5123_v11 = vld [vmem:[%s8018_s1 + $0x38] sm:$0xff] }
 0x561   : > { %8058 = vst [vmem:[#allocation33_spill] sm:$0xff] %v6511_v2 }
 0x563   : > { %4485 = vmatmul.msk.f32.gmra.mxu2 %vm1201_vm2, %v6516_v23  ;;  %2769 = vmatmul.f32.gmra.mxu3 %v5118_v36 }
 0x566   : > { %v1702_v38 = vpop.f32.mrf.mxu3 }
 0x567   : > { %v6531_v10 = vadd.f32 %v1702_v38, %v1436_v51  ;;  %v5124_v51 = vld [vmem:[%s8018_s1 + $0x48] sm:$0xff] }
 0x569   : > { %8059 = vst [vmem:[#allocation34_spill] sm:$0xff] %v6531_v10 }
 0x56b   : > { %4486 = vmatmul.msk.f32.gmra.mxu2 %vm1201_vm2, %v6536_v31  ;;  %2772 = vmatmul.f32.gmra.mxu3 %v5119_v16  ;;  %v6572_v16 = vpop.f32.mrf.mxu2 }
 0x56e   : > { %v6543_v56 = vpop.f32.mrf.mxu3 }
 0x56f   : > { %8060 = vst [vmem:[#allocation35_spill] sm:$0xff] %v6543_v56 }
 0x573   : > { %2792 = vmatmul.f32.vlgmr.msra.gmra.mxu3 %v5120_v39  ;;  %v5125_v39 = vld [vmem:[%s8018_s1 + $0x58] sm:$0xff] }
 0x576   : > { %v6548_v49 = vpop.f32.mrf.mxu3 }
 0x577   : > { %8061 = vst [vmem:[#allocation36_spill] sm:$0xff] %v6548_v49 }
 0x57b   : > { %2795 = vmatmul.f32.gmra.mxu3 %v5121_v8 }
 0x57e   : > { %v6553_v60 = vpop.f32.mrf.mxu3 }
 0x57f   : > { %8062 = vst [vmem:[#allocation37_spill] sm:$0xff] %v6553_v60 }
 0x583   : > { %2798 = vmatmul.f32.gmra.mxu3 %v5122_v35  ;;  %v6579_v35 = vpop.f32.mrf.mxu2 }
 0x586   : > { %v6558_v26 = vpop.f32.mrf.mxu3 }
 0x587   : > { %8063 = vst [vmem:[#allocation38_spill] sm:$0xff] %v6558_v26 }
 0x58b   : > { %2801 = vmatmul.f32.gmra.mxu3 %v5123_v11  ;;  %v5126_v11 = vld [vmem:[%s8018_s1 + $0x68] sm:$0x3] }
 0x58e   : > { %v6565_v36 = vpop.f32.mrf.mxu3 }
 0x58f   : > { %8064 = vst [vmem:[#allocation39_spill] sm:$0xff] %v6565_v36 }
 0x593   : > { %2804 = vmatmul.f32.gmra.mxu3 %v5124_v51  ;;  %v6586_v51 = vpop.f32.mrf.mxu2 }
 0x596   : > { %v6570_v38 = vpop.f32.mrf.mxu3 }
 0x597   : > { %8065 = vst [vmem:[#allocation40_spill] sm:$0xff] %v6570_v38 }
 0x59b   : > { %2807 = vmatmul.f32.gmra.mxu3 %v5125_v39  ;;  %v6590_v26 = vpop.f32.mrf.mxu2 }
 0x59e   : > { %v6577_v8 = vpop.f32.mrf.mxu3 }
 0x59f   : > { %8066 = vst [vmem:[#allocation41_spill] sm:$0xff] %v6577_v8 }
 0x5a3   : > { %2810 = vmatmul.f32.gmra.mxu3 %v5126_v11  ;;  %v6594_v60 = vpop.f32.mrf.mxu2  ;;  %v4933_v11 = vld [vmem:[%s8020_s3 + $0x18] sm:$0xff]  }
 0x5a4   : > { %8070 = vst [vmem:[#allocation45_spill] sm:$0xff] %v6594_v60  ;;  %v4930_v20 = vunpack.c.h.bf16 %v4933_v11  ;;  %v4929_v49 = vunpack.c.l.bf16 %v4933_v11 }
 0x5a6   : > { %v6584_v36 = vpop.f32.mrf.mxu3  ;;  %2861 = vmatpush.msrb.mxu2 %v4930_v20 }
 0x5a7   : > { %8067 = vst [vmem:[#allocation42_spill] sm:$0xff] %v6584_v36 }
 0x5a8   : > { %2862 = vmatpush.msrb.mxu2 %v4929_v49 }
 0x5ab   : > { %v6596_v1 = vpop.f32.mrf.mxu2 }
 0x5ac   : > { %8071 = vst [vmem:[#allocation46_spill] sm:$0xff] %v6596_v1 }
 0x5ae   : > { %v6588_v38 = vpop.f32.mrf.mxu3 }
 0x5af   : > { %8068 = vst [vmem:[#allocation43_spill] sm:$0xff] %v6588_v38 }
 0x5b3   : > { %v6601_v57 = vpop.f32.mrf.mxu2 }
 0x5b4   : > { %8072 = vst [vmem:[#allocation47_spill] sm:$0xff] %v6601_v57 }
 0x5b6   : > { %v6592_v21 = vpop.f32.mrf.mxu3 }
 0x5b7   : > { %8069 = vst [vmem:[#allocation44_spill] sm:$0xff] %v6592_v21  ;;  %v4932_v21 = vld [vmem:[%s8020_s3 + $0x10] sm:$0xff]  }
 0x5b8   : > { %v4926_v38 = vunpack.c.h.bf16 %v4932_v21  ;;  %v4925_v56 = vunpack.c.l.bf16 %v4932_v21 }
 0x5ba   : > { %2863 = vmatpush.msrb.mxu2 %v4926_v38 }
 0x5bb   : > { %v6606_v45 = vpop.f32.mrf.mxu2 }
 0x5bc   : > { %2864 = vmatpush.msrb.mxu2 %v4925_v56  ;;  %8073 = vst [vmem:[#allocation48_spill] sm:$0xff] %v6606_v45 }
 0x5be   : > { %v2755_v39 = vpop.f32.mrf.mxu3 }
 0x5c3   : > { %v6608_v2 = vpop.f32.mrf.mxu2 }
 0x5c4   : > { %8074 = vst [vmem:[#allocation49_spill] sm:$0xff] %v6608_v2  ;;  %v4983_v2 = vld [vmem:[%s8021_s4 + $0x1] ss:$0 sm:$0xff] }
 0x5c6   : > { %v2758_v8 = vpop.f32.mrf.mxu3 }
 0x5cb   : > { %v6610_v11 = vpop.f32.mrf.mxu2 }
 0x5cc   : > { %8075 = vst [vmem:[#allocation50_spill] sm:$0xff] %v6610_v11  ;;  %v4702_v11 = vld [vmem:[%s8022_s5 + $0x98] sm:$0xff] }
 0x5cd   : > { %2932 = vmatpush.msrb.mxu3 %v4702_v11 }
 0x5ce   : > { %v2761_v36 = vpop.f32.mrf.mxu3 }
 0x5d3   : > { %v6613_v32 = vpop.f32.mrf.mxu2 }
 0x5d4   : > { %8076 = vst [vmem:[#allocation51_spill] sm:$0xff] %v6613_v32 }
 0x5d6   : > { %v2764_v19 = vpop.f32.mrf.mxu3 }
 0x5db   : > { %v6616_v21 = vpop.f32.mrf.mxu2 }
 0x5dc   : > { %8077 = vst [vmem:[#allocation52_spill] sm:$0xff] %v6616_v21 }
 0x5de   : > { %v2767_v18 = vpop.f32.mrf.mxu3 }
 0x5e6   : > { %v2770_v10 = vpop.f32.mrf.mxu3 }
 0x5ee   : > { %v2773_v20 = vpop.f32.mrf.mxu3 }
 0x5f6   : > { %v2793_v25 = vpop.f32.mrf.mxu3 }
 0x5f7   : > { %v2794_v22 = vadd.f32 %v2793_v25, %v2755_v39  ;;  %v6625_v39 = vpop.f32.mrf.mxu1 }
 0x5f9   : > { %4692 = vmatmul.msk.f32.vlgmr.msrb.gmra.mxu2 %vm750_vm0, %v2794_v22  ;;  %v4790_v22 = vld [vmem:[%s8022_s5 + $0xd8] sm:$0xff] }
 0x5fa   : > { %3314 = vmatpush.msrb.mxu1 %v4790_v22 }
 0x5fe   : > { %v2796_v49 = vpop.f32.mrf.mxu3 }
 0x5ff   : > { %v2797_v47 = vadd.f32 %v2796_v49, %v2758_v8 }
 0x601   : > { %4693 = vmatmul.msk.f32.gmra.mxu2 %vm750_vm0, %v2797_v47  ;;  %v6627_v47 = vpop.f32.mrf.mxu2 }
 0x602   : > { %8078 = vst [vmem:[#allocation53_spill] sm:$0xff] %v6627_v47 }
 0x606   : > { %v2799_v56 = vpop.f32.mrf.mxu3 }
 0x607   : > { %v2800_v38 = vadd.f32 %v2799_v56, %v2761_v36  ;;  %v6631_v56 = vpop.f32.mrf.mxu1 }
 0x609   : > { %4694 = vmatmul.msk.f32.gmra.mxu2 %vm750_vm0, %v2800_v38  ;;  %v6633_v38 = vpop.f32.mrf.mxu2 }
 0x60a   : > { %8079 = vst [vmem:[#allocation54_spill] sm:$0xff] %v6633_v38 }
 0x60e   : > { %v2802_v25 = vpop.f32.mrf.mxu3 }
 0x60f   : > { %v2803_v8 = vadd.f32 %v2802_v25, %v2764_v19  ;;  %v6636_v11 = vpop.f32.mrf.mxu1 }
 0x611   : > { %4695 = vmatmul.msk.f32.gmra.mxu2 %vm750_vm0, %v2803_v8  ;;  %v6638_v19 = vpop.f32.mrf.mxu2 }
 0x612   : > { %8080 = vst [vmem:[#allocation55_spill] sm:$0xff] %v6638_v19 }
 0x616   : > { %v2805_v36 = vpop.f32.mrf.mxu3 }
 0x617   : > { %v2806_v49 = vadd.f32 %v2805_v36, %v2767_v18  ;;  %v6641_v8 = vpop.f32.mrf.mxu1 }
 0x619   : > { %4696 = vmatmul.msk.f32.gmra.mxu2 %vm750_vm0, %v2806_v49  ;;  %v6643_v18 = vpop.f32.mrf.mxu2 }
 0x61a   : > { %8081 = vst [vmem:[#allocation56_spill] sm:$0xff] %v6643_v18 }
 0x61e   : > { %v2808_v21 = vpop.f32.mrf.mxu3 }
 0x61f   : > { %v2809_v32 = vadd.f32 %v2808_v21, %v2770_v10  ;;  %v6645_v36 = vpop.f32.mrf.mxu1 }
 0x620   : > { %8082 = vst [vmem:[#allocation57_spill] sm:$0xff] %v6645_v36 }
 0x621   : > { %4697 = vmatmul.msk.f32.gmra.mxu2 %vm750_vm0, %v2809_v32  ;;  %v6647_v49 = vpop.f32.mrf.mxu2 }
 0x622   : > { %8083 = vst [vmem:[#allocation58_spill] sm:$0xff] %v6647_v49  ;;  %v4787_v49 = vld [vmem:[%s8022_s5 + $0xc0] sm:$0xff] }
 0x626   : > { %v2811_v22 = vpop.f32.mrf.mxu3 }
 0x627   : > { %v2812_v25 = vadd.f32 %v2811_v22, %v2773_v20  ;;  %v6649_v38 = vpop.f32.mrf.mxu1  ;;  %v4701_v22 = vld [vmem:[%s8022_s5 + $0x90] sm:$0xff] }
 0x628   : > { %8084 = vst [vmem:[#allocation59_spill] sm:$0xff] %v6649_v38  ;;  %2933 = vmatpush.msrb.mxu3 %v4701_v22 }
 0x629   : > { %4698 = vmatmul.msk.f32.gmra.mxu2 %vm750_vm0, %v2812_v25  ;;  %v6651_v10 = vpop.f32.mrf.mxu2  ;;  %v4789_v25 = vld [vmem:[%s8022_s5 + $0xd0] sm:$0xff] }
 0x62a   : > { %8085 = vst [vmem:[#allocation60_spill] sm:$0xff] %v6651_v10  ;;  %3315 = vmatpush.msrb.mxu1 %v4789_v25  ;;  %v4700_v10 = vld [vmem:[%s8022_s5 + $0x88] sm:$0xff] }
 0x62b   : > { %2934 = vmatpush.msrb.mxu3 %v4700_v10 }
 0x62f   : > { %v6653_v32 = vpop.f32.mrf.mxu1 }
 0x630   : > { %8086 = vst [vmem:[#allocation61_spill] sm:$0xff] %v6653_v32 }
 0x631   : > { %v6655_v21 = vpop.f32.mrf.mxu2 }
 0x632   : > { %8087 = vst [vmem:[#allocation62_spill] sm:$0xff] %v6655_v21  ;;  %v4788_v21 = vld [vmem:[%s8022_s5 + $0xc8] sm:$0xff] }
 0x633   : > { %3316 = vmatpush.msrb.mxu1 %v4788_v21 }
 0x635   : > { %3317 = vmatpush.msrb.mxu1 %v4787_v49 }
 0x637   : > { %v6657_v19 = vpop.f32.mrf.mxu1 }
 0x638   : > { %8088 = vst [vmem:[#allocation63_spill] sm:$0xff] %v6657_v19 }
 0x639   : > { %v6659_v20 = vpop.f32.mrf.mxu2 }
 0x63a   : > { %8089 = vst [vmem:[#allocation64_spill] sm:$0xff] %v6659_v20  ;;  %v4699_v20 = vld [vmem:[%s8022_s5 + $0x80] sm:$0xff] }
 0x63b   : > { %2935 = vmatpush.msrb.mxu3 %v4699_v20 }
 0x63f   : > { %v6679_v22 = vpop.f32.mrf.mxu1 }
 0x640   : > { %8090 = vst [vmem:[#allocation65_spill] sm:$0xff] %v6679_v22 }
 0x641   : > { %v6681_v25 = vpop.f32.mrf.mxu2 }
 0x642   : > { %8091 = vst [vmem:[#allocation66_spill] sm:$0xff] %v6681_v25 }
 0x647   : > { %v6683_v18 = vpop.f32.mrf.mxu1 }
 0x648   : > { %8092 = vst [vmem:[#allocation67_spill] sm:$0xff] %v6683_v18 }
 0x649   : > { %v6685_v47 = vpop.f32.mrf.mxu2 }
 0x64a   : > { %8093 = vst [vmem:[#allocation68_spill] sm:$0xff] %v6685_v47 }
 0x64f   : > { %v6687_v10 = vpop.f32.mrf.mxu1 }
 0x650   : > { %8094 = vst [vmem:[#allocation69_spill] sm:$0xff] %v6687_v10 }
 0x651   : > { %v6689_v21 = vpop.f32.mrf.mxu2 }
 0x652   : > { %8095 = vst [vmem:[#allocation70_spill] sm:$0xff] %v6689_v21 }
 0x657   : > { %v6694_v53 = vpop.f32.mrf.mxu1 }
 0x658   : > { %8096 = vst [vmem:[#allocation71_spill] sm:$0xff] %v6694_v53 }
 0x65f   : > { %v6698_v25 = vpop.f32.mrf.mxu1 }
 0x660   : > { %8097 = vst [vmem:[#allocation72_spill] sm:$0xff] %v6698_v25  ;;  %v4832_v25 = vld [vmem:[%s8022_s5 + $0xe8] sm:$0xff] }
 0x67c   : > { %v2866_v7 = vpop.f32.mrf.mxu2 }
 0x67d   : > { %v2867_v45 = vadd.f32 %v4983_v2, %v2866_v7  ;;  %v4746_v7 = vld [vmem:[%s8022_s5 + $0xb8] sm:$0xff] }
 0x67e   : > { %3123 = vmatpush.msra.mxu3 %v4746_v7  ;;  %v4743_v7 = vld [vmem:[%s8022_s5 + $0xa0] sm:$0xff] }
 0x67f   : > { %v2887_v22 = vmax.f32 %v2867_v45, 0.0  ;;  %v4834_v45 = vld [vmem:[%s8022_s5 + $0xf8] sm:$0xff] }
 0x680   : > { %3505 = vmatpush.msra.mxu1 %v4834_v45  ;;  %v4831_v45 = vld [vmem:[%s8022_s5 + $0xe0] sm:$0xff] }
 0x681   : > { %4703 = vmatmul.msk.f32.vlgmr.msrb.gmra.mxu3 %vm750_vm0, %v2887_v22  ;;  %4791 = vmatmul.msk.f32.vlgmr.msrb.gmra.mxu1 %vm750_vm0, %v2887_v22 }
 0x684   : > { %v2869_v49 = vpop.f32.mrf.mxu2 }
 0x685   : > { %v2870_v20 = vadd.f32 %v4983_v2, %v2869_v49  ;;  %v4745_v49 = vld [vmem:[%s8022_s5 + $0xb0] sm:$0xff] }
 0x686   : > { %3124 = vmatpush.msra.mxu3 %v4745_v49 }
 0x687   : > { %v2888_v47 = vmax.f32 %v2870_v20, 0.0  ;;  %v6713_v20 = vpop.f32.mrf.mxu1 }
 0x688   : > { %8098 = vst [vmem:[#allocation73_spill] sm:$0xff] %v6713_v20 }
 0x689   : > { %4704 = vmatmul.msk.f32.gmra.mxu3 %vm750_vm0, %v2888_v47  ;;  %4792 = vmatmul.msk.f32.gmra.mxu1 %vm750_vm0, %v2888_v47 }
 0x68c   : > { %v2872_v21 = vpop.f32.mrf.mxu2 }
 0x68d   : > { %v2873_v10 = vadd.f32 %v4983_v2, %v2872_v21  ;;  %v4744_v21 = vld [vmem:[%s8022_s5 + $0xa8] sm:$0xff] }
 0x68e   : > { %3125 = vmatpush.msra.mxu3 %v4744_v21 }
 0x68f   : > { %v2889_v18 = vmax.f32 %v2873_v10, 0.0  ;;  %v4833_v10 = vld [vmem:[%s8022_s5 + $0xf0] sm:$0xff]  ;;  %v6732_v49 = vpop.f32.mrf.mxu1 }
 0x690   : > { %3506 = vmatpush.msra.mxu1 %v4833_v10  ;;  %3126 = vmatpush.msra.mxu3 %v4743_v7  ;;  %8099 = vst [vmem:[#allocation74_spill] sm:$0xff] %v6732_v49 }
 0x691   : > { %4705 = vmatmul.msk.f32.gmra.mxu3 %vm750_vm0, %v2889_v18  ;;  %4793 = vmatmul.msk.f32.gmra.mxu1 %vm750_vm0, %v2889_v18 }
 0x692   : > { %3507 = vmatpush.msra.mxu1 %v4832_v25 }
 0x694   : > { %v2875_v53 = vpop.f32.mrf.mxu2  ;;  %3508 = vmatpush.msra.mxu1 %v4831_v45 }
 0x695   : > { %v2876_v19 = vadd.f32 %v4983_v2, %v2875_v53 }
 0x697   : > { %v2890_v20 = vmax.f32 %v2876_v19, 0.0  ;;  %v6736_v21 = vpop.f32.mrf.mxu1 }
 0x698   : > { %8100 = vst [vmem:[#allocation75_spill] sm:$0xff] %v6736_v21 }
 0x699   : > { %4706 = vmatmul.msk.f32.gmra.mxu3 %vm750_vm0, %v2890_v20  ;;  %4794 = vmatmul.msk.f32.gmra.mxu1 %vm750_vm0, %v2890_v20 }
 0x69c   : > { %v2878_v53 = vpop.f32.mrf.mxu2 }
 0x69d   : > { %v2879_v10 = vadd.f32 %v4983_v2, %v2878_v53 }
 0x69f   : > { %v2891_v57 = vmax.f32 %v2879_v10, 0.0  ;;  %v6740_v49 = vpop.f32.mrf.mxu1 }
 0x6a0   : > { %8101 = vst [vmem:[#allocation76_spill] sm:$0xff] %v6740_v49 }
 0x6a1   : > { %4707 = vmatmul.msk.f32.gmra.mxu3 %vm750_vm0, %v2891_v57  ;;  %4795 = vmatmul.msk.f32.gmra.mxu1 %vm750_vm0, %v2891_v57 }
 0x6a4   : > { %v2881_v32 = vpop.f32.mrf.mxu2 }
 0x6a5   : > { %v2882_v48 = vadd.f32 %v4983_v2, %v2881_v32 }
 0x6a7   : > { %v2892_v19 = vmax.f32 %v2882_v48, 0.0  ;;  %v6746_v32 = vpop.f32.mrf.mxu1 }
 0x6a8   : > { %8102 = vst [vmem:[#allocation77_spill] sm:$0xff] %v6746_v32 }
 0x6a9   : > { %4708 = vmatmul.msk.f32.gmra.mxu3 %vm750_vm0, %v2892_v19  ;;  %4796 = vmatmul.msk.f32.gmra.mxu1 %vm750_vm0, %v2892_v19 }
 0x6ac   : > { %v2884_v25 = vpop.f32.mrf.mxu2 }
 0x6ad   : > { %v2885_v7 = vadd.f32 %v4983_v2, %v2884_v25 }
 0x6af   : > { %v2893_v45 = vmax.f32 %v2885_v7, 0.0  ;;  %v6750_v48 = vpop.f32.mrf.mxu1  ;;  %v6772_v7 = vpop.f32.mrf.mxu0 }
 0x6b0   : > { %8103 = vst [vmem:[#allocation78_spill] sm:$0xff] %v6750_v48 }
 0x6b1   : > { %4709 = vmatmul.msk.f32.gmra.mxu3 %vm750_vm0, %v2893_v45  ;;  %4797 = vmatmul.msk.f32.gmra.mxu1 %vm750_vm0, %v2893_v45 }
 0x6b7   : > { %v6754_v2 = vpop.f32.mrf.mxu1 }
 0x6b8   : > { %8104 = vst [vmem:[#allocation79_spill] sm:$0xff] %v6754_v2  ;;  %v6774_v2 = vpop.f32.mrf.mxu0 }
 0x6b9   : > { %4747 = vmatmul.msk.f32.vlgmr.msra.gmra.mxu3 %vm750_vm0, %v2887_v22  ;;  %4835 = vmatmul.msk.f32.vlgmr.msra.gmra.mxu1 %vm750_vm0, %v2887_v22 }
 0x6bf   : > { %v6758_v53 = vpop.f32.mrf.mxu1 }
 0x6c0   : > { %8105 = vst [vmem:[#allocation80_spill] sm:$0xff] %v6758_v53  ;;  %v6776_v32 = vpop.f32.mrf.mxu0 }
 0x6c1   : > { %4748 = vmatmul.msk.f32.gmra.mxu3 %vm750_vm0, %v2888_v47  ;;  %4836 = vmatmul.msk.f32.gmra.mxu1 %vm750_vm0, %v2888_v47 }
 0x6c7   : > { %v6764_v47 = vpop.f32.mrf.mxu1 }
 0x6c8   : > { %8106 = vst [vmem:[#allocation81_spill] sm:$0xff] %v6764_v47 }
 0x6c9   : > { %4749 = vmatmul.msk.f32.gmra.mxu3 %vm750_vm0, %v2889_v18  ;;  %4837 = vmatmul.msk.f32.gmra.mxu1 %vm750_vm0, %v2889_v18 }
 0x6cf   : > { %v6768_v18 = vpop.f32.mrf.mxu1 }
 0x6d0   : > { %8107 = vst [vmem:[#allocation82_spill] sm:$0xff] %v6768_v18  ;;  %v6778_v18 = vpop.f32.mrf.mxu0 }
 0x6d1   : > { %4750 = vmatmul.msk.f32.gmra.mxu3 %vm750_vm0, %v2890_v20  ;;  %4838 = vmatmul.msk.f32.gmra.mxu1 %vm750_vm0, %v2890_v20 }
 0x6d7   : > { %v6770_v22 = vpop.f32.mrf.mxu1 }
 0x6d8   : > { %8108 = vst [vmem:[#allocation83_spill] sm:$0xff] %v6770_v22  ;;  %v6781_v63 = vpop.f32.mrf.mxu0 }
 0x6d9   : > { %4751 = vmatmul.msk.f32.gmra.mxu3 %vm750_vm0, %v2891_v57  ;;  %4839 = vmatmul.msk.f32.gmra.mxu1 %vm750_vm0, %v2891_v57 }
 0x6e0   : > { %v6786_v38 = vpop.f32.mrf.mxu0 }
 0x6e1   : > { %4752 = vmatmul.msk.f32.gmra.mxu3 %vm750_vm0, %v2892_v19  ;;  %4840 = vmatmul.msk.f32.gmra.mxu1 %vm750_vm0, %v2892_v19  ;;  %8109 = vst [vmem:[#allocation84_spill] sm:$0xff] %v6786_v38 }
 0x6e9   : > { %4753 = vmatmul.msk.f32.gmra.mxu3 %vm750_vm0, %v2893_v45  ;;  %4841 = vmatmul.msk.f32.gmra.mxu1 %vm750_vm0, %v2893_v45 }
 0x6fe   : > { %v3319_v20 = vpop.f32.mrf.mxu1 }
 0x704   : > { %v2937_v10 = vpop.f32.mrf.mxu3 }
 0x706   : > { %v3322_v25 = vpop.f32.mrf.mxu1 }
 0x70c   : > { %v2940_v57 = vpop.f32.mrf.mxu3 }
 0x70e   : > { %v3325_v53 = vpop.f32.mrf.mxu1 }
 0x714   : > { %v2943_v19 = vpop.f32.mrf.mxu3 }
 0x716   : > { %v3328_v48 = vpop.f32.mrf.mxu1 }
 0x71c   : > { %v2946_v47 = vpop.f32.mrf.mxu3 }
 0x71e   : > { %v3331_v49 = vpop.f32.mrf.mxu1 }
 0x724   : > { %v2949_v45 = vpop.f32.mrf.mxu3 }
 0x726   : > { %v3334_v21 = vpop.f32.mrf.mxu1 }
 0x72c   : > { %v2952_v22 = vpop.f32.mrf.mxu3 }
 0x72e   : > { %v3337_v27 = vpop.f32.mrf.mxu1 }
 0x72f   : > { %4798 = vmatpush.msk.msrb.mxu3 %vm1298_vm1, %v3337_v27  ;;  %v5127_v27 = vld [vmem:[%s8019_s2 + $0x200] sm:$0xff] }
 0x731   : > { %3353 = vmatpush.msrb.mxu3 %v3334_v21 }
 0x733   : > { %3354 = vmatpush.msrb.mxu3 %v3331_v49  ;;  %v5128_v49 = vld [vmem:[%s8019_s2] sm:$0xff] }
 0x734   : > { %v2955_v1 = vpop.f32.mrf.mxu3 }
 0x735   : > { %4710 = vmatpush.msk.msra.mxu2 %vm1298_vm1, %v2955_v1  ;;  %3355 = vmatpush.msrb.mxu3 %v3328_v48  ;;  %v5129_v48 = vld [vmem:[%s8019_s2 + $0x208] sm:$0xff] }
 0x736   : > { %v6784_v9 = vpop.f32.mrf.mxu1 }
 0x737   : > { %2971 = vmatpush.msra.mxu2 %v2952_v22  ;;  %3356 = vmatpush.msrb.mxu3 %v3325_v53  ;;  %v6802_v53 = vpop.f32.mrf.mxu0  ;;  %v5130_v22 = vld [vmem:[%s8019_s2 + $0x8] sm:$0xff] }
 0x738   : > { %8110 = vst [vmem:[#allocation85_spill] sm:$0xff] %v6802_v53 }
 0x739   : > { %2972 = vmatpush.msra.mxu2 %v2949_v45  ;;  %3357 = vmatpush.msrb.mxu3 %v3322_v25 }
 0x73b   : > { %2973 = vmatpush.msra.mxu2 %v2946_v47  ;;  %3358 = vmatpush.msrb.mxu3 %v3319_v20 }
 0x73c   : > { %v6788_v60 = vpop.f32.mrf.mxu3  ;;  %4799 = vmatmul.msk.f32.vlgmr.msrb.gmra.mxu3 %vm1201_vm2, %v5127_v27  ;;  %v5133_v27 = vld [vmem:[%s8019_s2 + $0x218] sm:$0xff] }
 0x73d   : > { %2974 = vmatpush.msra.mxu2 %v2943_v19  ;;  %v5132_v19 = vld [vmem:[%s8019_s2 + $0x10] sm:$0xff] }
 0x73e   : > { %v3513_v1 = vpop.f32.mrf.mxu1 }
 0x73f   : > { %2975 = vmatpush.msra.mxu2 %v2940_v57  ;;  %v6812_v57 = vpop.f32.mrf.mxu0 }
 0x740   : > { %8111 = vst [vmem:[#allocation86_spill] sm:$0xff] %v6812_v57 }
 0x741   : > { %2976 = vmatpush.msra.mxu2 %v2937_v10  ;;  %v5131_v10 = vld [vmem:[%s8019_s2 + $0x210] sm:$0xff] }
 0x742   : > { %4711 = vmatmul.msk.f32.vlgmr.msra.gmra.mxu2 %vm1201_vm2, %v5128_v49 }
 0x744   : > { %v3131_v21 = vpop.f32.mrf.mxu3  ;;  %4800 = vmatmul.msk.f32.gmra.mxu3 %vm1201_vm2, %v5129_v48 }
 0x746   : > { %v3516_v47 = vpop.f32.mrf.mxu1 }
 0x747   : > { %v6822_v48 = vpop.f32.mrf.mxu0 }
 0x748   : > { %8112 = vst [vmem:[#allocation87_spill] sm:$0xff] %v6822_v48 }
 0x74a   : > { %4712 = vmatmul.msk.f32.gmra.mxu2 %vm1201_vm2, %v5130_v22  ;;  %v5134_v22 = vld [vmem:[%s8019_s2 + $0x18] sm:$0xff] }
 0x74c   : > { %v3134_v20 = vpop.f32.mrf.mxu3  ;;  %4801 = vmatmul.msk.f32.gmra.mxu3 %vm1201_vm2, %v5131_v10 }
 0x74e   : > { %v3519_v25 = vpop.f32.mrf.mxu1 }
 0x74f   : > { %v6836_v48 = vpop.f32.mrf.mxu0 }
 0x750   : > { %8113 = vst [vmem:[#allocation88_spill] sm:$0xff] %v6836_v48  ;;  %v5139_v48 = vld [vmem:[%s8019_s2 + $0x230] sm:$0xff] }
 0x752   : > { %4713 = vmatmul.msk.f32.gmra.mxu2 %vm1201_vm2, %v5132_v19  ;;  %v5135_v19 = vld [vmem:[%s8019_s2 + $0x220] sm:$0xff] }
 0x754   : > { %v3137_v45 = vpop.f32.mrf.mxu3  ;;  %4802 = vmatmul.msk.f32.gmra.mxu3 %vm1201_vm2, %v5133_v27  ;;  %v5136_v27 = vld [vmem:[%s8019_s2 + $0x20] sm:$0xff] }
 0x756   : > { %v3522_v49 = vpop.f32.mrf.mxu1 }
 0x757   : > { %v6851_v36 = vpop.f32.mrf.mxu0 }
 0x758   : > { %8114 = vst [vmem:[#allocation89_spill] sm:$0xff] %v6851_v36 }
 0x75a   : > { %4714 = vmatmul.msk.f32.gmra.mxu2 %vm1201_vm2, %v5134_v22  ;;  %v5137_v22 = vld [vmem:[%s8019_s2 + $0x228] sm:$0xff] }
 0x75c   : > { %v3140_v10 = vpop.f32.mrf.mxu3  ;;  %4803 = vmatmul.msk.f32.gmra.mxu3 %vm1201_vm2, %v5135_v19  ;;  %v5138_v19 = vld [vmem:[%s8019_s2 + $0x28] sm:$0xff] }
 0x75e   : > { %v3525_v57 = vpop.f32.mrf.mxu1 }
 0x762   : > { %4715 = vmatmul.msk.f32.gmra.mxu2 %vm1201_vm2, %v5136_v27 }
 0x764   : > { %v3143_v53 = vpop.f32.mrf.mxu3  ;;  %4804 = vmatmul.msk.f32.gmra.mxu3 %vm1201_vm2, %v5137_v22  ;;  %v5152_v22 = vld [vmem:[%s8019_s2 + $0x110] sm:$0xff] }
 0x766   : > { %v3528_v38 = vpop.f32.mrf.mxu1 }
 0x767   : > { %4842 = vmatpush.msk.msrb.mxu1 %vm1298_vm1, %v3528_v38  ;;  %v5140_v38 = vld [vmem:[%s8019_s2 + $0x30] sm:$0xff] }
 0x769   : > { %3544 = vmatpush.msrb.mxu1 %v3525_v57  ;;  %v5141_v57 = vld [vmem:[%s8019_s2 + $0x300] sm:$0xff] }
 0x76a   : > { %4716 = vmatmul.msk.f32.gmra.mxu2 %vm1201_vm2, %v5138_v19 }
 0x76b   : > { %3545 = vmatpush.msrb.mxu1 %v3522_v49  ;;  %v5149_v49 = vld [vmem:[%s8019_s2 + $0x310] sm:$0xff] }
 0x76c   : > { %v3146_v27 = vpop.f32.mrf.mxu3  ;;  %4805 = vmatmul.msk.f32.gmra.mxu3 %vm1201_vm2, %v5139_v48  ;;  %v5150_v48 = vld [vmem:[%s8019_s2 + $0x248] sm:$0xff] }
 0x76d   : > { %4754 = vmatpush.msk.msra.mxu0 %vm1298_vm1, %v3146_v27  ;;  %3546 = vmatpush.msrb.mxu1 %v3519_v25  ;;  %v5147_v25 = vld [vmem:[%s8019_s2 + $0x40] sm:$0xff]  ;;  %v5153_v27 = vld [vmem:[%s8019_s2 + $0x318] sm:$0xff] }
 0x76f   : > { %3162 = vmatpush.msra.mxu0 %v3143_v53  ;;  %3547 = vmatpush.msrb.mxu1 %v3516_v47  ;;  %v5142_v53 = vld [vmem:[%s8019_s2 + $0x238] sm:$0xff]  ;;  %v5144_v47 = vld [vmem:[%s8019_s2 + $0x100] sm:$0xff] }
 0x771   : > { %3163 = vmatpush.msra.mxu0 %v3140_v10  ;;  %3548 = vmatpush.msrb.mxu1 %v3513_v1  ;;  %v6867_v1 = vpop.f32.mrf.mxu0  ;;  %v5151_v10 = vld [vmem:[%s8019_s2 + $0x48] sm:$0xff] }
 0x772   : > { %4717 = vmatmul.msk.f32.gmra.mxu2 %vm1201_vm2, %v5140_v38  ;;  %8115 = vst [vmem:[#allocation90_spill] sm:$0xff] %v6867_v1  ;;  %v5154_v38 = vld [vmem:[%s8019_s2 + $0x250] sm:$0xff] }
 0x773   : > { %3164 = vmatpush.msra.mxu0 %v3137_v45  ;;  %3549 = vmatpush.msrb.mxu1 %v6784_v9  ;;  %v5143_v9 = vld [vmem:[%s8019_s2 + $0x38] sm:$0xff]  ;;  %v5148_v45 = vld [vmem:[%s8019_s2 + $0x108] sm:$0xff] }
 0x774   : > { %4843 = vmatmul.msk.f32.vlgmr.msrb.gmra.mxu1 %vm1201_vm2, %v5141_v57  ;;  %4806 = vmatmul.msk.f32.gmra.mxu3 %vm1201_vm2, %v5142_v53  ;;  %v5155_v57 = vld [vmem:[%s8019_s2 + $0x50] sm:$0xff]  ;;  %v5156_v53 = vld [vmem:[%s8019_s2 + $0x118] sm:$0xff] }
 0x775   : > { %3165 = vmatpush.msra.mxu0 %v3134_v20  ;;  %v5145_v20 = vld [vmem:[%s8019_s2 + $0x308] sm:$0xff] }
 0x777   : > { %3166 = vmatpush.msra.mxu0 %v3131_v21 }
 0x779   : > { %3167 = vmatpush.msra.mxu0 %v6788_v60  ;;  %v5146_v60 = vld [vmem:[%s8019_s2 + $0x240] sm:$0xff]  ;;  %v6886_v21 = vpop.f32.mrf.mxu0 }
 0x77a   : > { %4718 = vmatmul.msk.f32.gmra.mxu2 %vm1201_vm2, %v5143_v9  ;;  %4755 = vmatmul.msk.f32.vlgmr.msra.gmra.mxu0 %vm1201_vm2, %v5144_v47  ;;  %8116 = vst [vmem:[#allocation91_spill] sm:$0xff] %v6886_v21  ;;  %v5157_v9 = vld [vmem:[%s8019_s2 + $0x320] sm:$0xff]  ;;  %v5158_v47 = vld [vmem:[%s8019_s2 + $0x258] sm:$0xff] }
 0x77c   : > { %4844 = vmatmul.msk.f32.gmra.mxu1 %vm1201_vm2, %v5145_v20  ;;  %4807 = vmatmul.msk.f32.gmra.mxu3 %vm1201_vm2, %v5146_v60  ;;  %v5159_v60 = vld [vmem:[%s8019_s2 + $0x58] sm:$0xff] }
 0x781   : > { %v6912_v19 = vpop.f32.mrf.mxu0 }
 0x782   : > { %4719 = vmatmul.msk.f32.gmra.mxu2 %vm1201_vm2, %v5147_v25  ;;  %4756 = vmatmul.msk.f32.gmra.mxu0 %vm1201_vm2, %v5148_v45  ;;  %8117 = vst [vmem:[#allocation92_spill] sm:$0xff] %v6912_v19  ;;  %v5160_v25 = vld [vmem:[%s8019_s2 + $0x120] sm:$0xff]  ;;  %v5161_v45 = vld [vmem:[%s8019_s2 + $0x328] sm:$0xff] }
 0x784   : > { %4845 = vmatmul.msk.f32.gmra.mxu1 %vm1201_vm2, %v5149_v49  ;;  %4808 = vmatmul.msk.f32.gmra.mxu3 %vm1201_vm2, %v5150_v48  ;;  %v5162_v49 = vld [vmem:[%s8019_s2 + $0x260] sm:$0xff] }
 0x789   : > { %v6938_v20 = vpop.f32.mrf.mxu0 }
 0x78a   : > { %4720 = vmatmul.msk.f32.gmra.mxu2 %vm1201_vm2, %v5151_v10  ;;  %4757 = vmatmul.msk.f32.gmra.mxu0 %vm1201_vm2, %v5152_v22  ;;  %8118 = vst [vmem:[#allocation93_spill] sm:$0xff] %v6938_v20  ;;  %v5163_v10 = vld [vmem:[%s8019_s2 + $0x60] sm:$0xff]  ;;  %v5164_v22 = vld [vmem:[%s8019_s2 + $0x128] sm:$0xff] }
 0x78c   : > { %4846 = vmatmul.msk.f32.gmra.mxu1 %vm1201_vm2, %v5153_v27  ;;  %4809 = vmatmul.msk.f32.gmra.mxu3 %vm1201_vm2, %v5154_v38  ;;  %v5165_v27 = vld [vmem:[%s8019_s2 + $0x330] sm:$0xff]  ;;  %v5166_v38 = vld [vmem:[%s8019_s2 + $0x268] sm:$0xff] }
 0x791   : > { %v6956_v48 = vpop.f32.mrf.mxu0 }
 0x792   : > { %4721 = vmatmul.msk.f32.gmra.mxu2 %vm1201_vm2, %v5155_v57  ;;  %4758 = vmatmul.msk.f32.gmra.mxu0 %vm1201_vm2, %v5156_v53  ;;  %8119 = vst [vmem:[#allocation94_spill] sm:$0xff] %v6956_v48  ;;  %v5167_v53 = vld [vmem:[%s8019_s2 + $0x68] sm:$0xff] }
 0x794   : > { %4847 = vmatmul.msk.f32.gmra.mxu1 %vm1201_vm2, %v5157_v9  ;;  %4810 = vmatmul.msk.f32.gmra.mxu3 %vm1201_vm2, %v5158_v47  ;;  %v5168_v9 = vld [vmem:[%s8019_s2 + $0x130] sm:$0xff]  ;;  %v5169_v47 = vld [vmem:[%s8019_s2 + $0x338] sm:$0xff] }
 0x799   : > { %v6974_v57 = vpop.f32.mrf.mxu0 }
 0x79a   : > { %4722 = vmatmul.msk.f32.gmra.mxu2 %vm1201_vm2, %v5159_v60  ;;  %4759 = vmatmul.msk.f32.gmra.mxu0 %vm1201_vm2, %v5160_v25  ;;  %8120 = vst [vmem:[#allocation95_spill] sm:$0xff] %v6974_v57  ;;  %v5170_v60 = vld [vmem:[%s8019_s2 + $0x270] sm:$0xff]  ;;  %v5198_v57 = vld [vmem:[%s8019_s2 + $0xa8] sm:$0xff] }
 0x79b   : > { %v5171_v25 = vld [vmem:[%s8019_s2 + $0x70] sm:$0xff] }
 0x79c   : > { %4848 = vmatmul.msk.f32.gmra.mxu1 %vm1201_vm2, %v5161_v45  ;;  %4811 = vmatmul.msk.f32.gmra.mxu3 %vm1201_vm2, %v5162_v49  ;;  %v5172_v45 = vld [vmem:[%s8019_s2 + $0x138] sm:$0xff] }
 0x7a1   : > { %v7000_v49 = vpop.f32.mrf.mxu0 }
 0x7a2   : > { %4723 = vmatmul.msk.f32.gmra.mxu2 %vm1201_vm2, %v5163_v10  ;;  %4760 = vmatmul.msk.f32.gmra.mxu0 %vm1201_vm2, %v5164_v22  ;;  %8121 = vst [vmem:[#allocation96_spill] sm:$0xff] %v7000_v49  ;;  %v5173_v10 = vld [vmem:[%s8019_s2 + $0x340] sm:$0xff]  ;;  %v5174_v22 = vld [vmem:[%s8019_s2 + $0x278] sm:$0xff] }
 0x7a4   : > { %4849 = vmatmul.msk.f32.gmra.mxu1 %vm1201_vm2, %v5165_v27  ;;  %4812 = vmatmul.msk.f32.gmra.mxu3 %vm1201_vm2, %v5166_v38  ;;  %v5175_v27 = vld [vmem:[%s8019_s2 + $0x78] sm:$0xff]  ;;  %v5176_v38 = vld [vmem:[%s8019_s2 + $0x140] sm:$0xff] }
 0x7aa   : > { %4724 = vmatmul.msk.f32.gmra.mxu2 %vm1201_vm2, %v5167_v53  ;;  %4761 = vmatmul.msk.f32.gmra.mxu0 %vm1201_vm2, %v5168_v9  ;;  %v5177_v53 = vld [vmem:[%s8019_s2 + $0x348] sm:$0xff]  ;;  %v5178_v9 = vld [vmem:[%s8019_s2 + $0x280] sm:$0xff] }
 0x7ac   : > { %4850 = vmatmul.msk.f32.gmra.mxu1 %vm1201_vm2, %v5169_v47  ;;  %4813 = vmatmul.msk.f32.gmra.mxu3 %vm1201_vm2, %v5170_v60  ;;  %v7026_v47 = vpop.f32.mrf.mxu0  ;;  %v5179_v60 = vld [vmem:[%s8019_s2 + $0x80] sm:$0xff] }
 0x7ad   : > { %8122 = vst [vmem:[#allocation97_spill] sm:$0xff] %v7026_v47 }
 0x7b2   : > { %4725 = vmatmul.msk.f32.gmra.mxu2 %vm1201_vm2, %v5171_v25  ;;  %4762 = vmatmul.msk.f32.gmra.mxu0 %vm1201_vm2, %v5172_v45  ;;  %v5180_v25 = vld [vmem:[%s8019_s2 + $0x148] sm:$0xff]  ;;  %v5181_v45 = vld [vmem:[%s8019_s2 + $0x350] sm:$0xff] }
 0x7b4   : > { %4851 = vmatmul.msk.f32.gmra.mxu1 %vm1201_vm2, %v5173_v10  ;;  %4814 = vmatmul.msk.f32.gmra.mxu3 %vm1201_vm2, %v5174_v22  ;;  %v5182_v10 = vld [vmem:[%s8019_s2 + $0x288] sm:$0xff] }
 0x7ba   : > { %4726 = vmatmul.msk.f32.gmra.mxu2 %vm1201_vm2, %v5175_v27  ;;  %4763 = vmatmul.msk.f32.gmra.mxu0 %vm1201_vm2, %v5176_v38  ;;  %v7044_v27 = vpop.f32.mrf.mxu0  ;;  %v5183_v38 = vld [vmem:[%s8019_s2 + $0x88] sm:$0xff] }
 0x7bb   : > { %8123 = vst [vmem:[#allocation98_spill] sm:$0xff] %v7044_v27  ;;  %v5194_v27 = vld [vmem:[%s8019_s2 + $0x2a0] sm:$0xff] }
 0x7bc   : > { %4852 = vmatmul.msk.f32.gmra.mxu1 %vm1201_vm2, %v5177_v53  ;;  %4815 = vmatmul.msk.f32.gmra.mxu3 %vm1201_vm2, %v5178_v9  ;;  %v5184_v53 = vld [vmem:[%s8019_s2 + $0x150] sm:$0xff]  ;;  %v5185_v9 = vld [vmem:[%s8019_s2 + $0x358] sm:$0xff] }
 0x7c2   : > { %4727 = vmatmul.msk.f32.gmra.mxu2 %vm1201_vm2, %v5179_v60  ;;  %4764 = vmatmul.msk.f32.gmra.mxu0 %vm1201_vm2, %v5180_v25  ;;  %v5186_v60 = vld [vmem:[%s8019_s2 + $0x290] sm:$0xff] }
 0x7c4   : > { %4853 = vmatmul.msk.f32.gmra.mxu1 %vm1201_vm2, %v5181_v45  ;;  %4816 = vmatmul.msk.f32.gmra.mxu3 %vm1201_vm2, %v5182_v10  ;;  %v7064_v45 = vpop.f32.mrf.mxu0  ;;  %v5187_v10 = vld [vmem:[%s8019_s2 + $0x90] sm:$0xff] }
 0x7c5   : > { %v2978_v22 = vpop.f32.mrf.mxu2  ;;  %8124 = vst [vmem:[#allocation99_spill] sm:$0xff] %v7064_v45  ;;  %v5191_v45 = vld [vmem:[%s8019_s2 + $0x98] sm:$0xff] }
 0x7c6   : > { %v3074_v20 = vadd.f32 %v2978_v22, %v6244_v54 }
 0x7ca   : > { %4728 = vmatmul.msk.f32.gmra.mxu2 %vm1201_vm2, %v5183_v38  ;;  %4765 = vmatmul.msk.f32.gmra.mxu0 %vm1201_vm2, %v5184_v53  ;;  %v5188_v38 = vld [vmem:[%s8019_s2 + $0x158] sm:$0xff]  ;;  %v5189_v53 = vld [vmem:[%s8019_s2 + $0x360] sm:$0xff] }
 0x7cc   : > { %4854 = vmatmul.msk.f32.gmra.mxu1 %vm1201_vm2, %v5185_v9  ;;  %4817 = vmatmul.msk.f32.gmra.mxu3 %vm1201_vm2, %v5186_v60  ;;  %v5190_v9 = vld [vmem:[%s8019_s2 + $0x298] sm:$0xff] }
 0x7cd   : > { %v7062_v25 = vpop.f32.mrf.mxu2 }
 0x7ce   : > { %v3075_v22 = vadd.f32 %v7062_v25, %v6267_v6  ;;  %v5208_v6 = vld [vmem:[%s8019_s2 + $0x188] sm:$0xff]  ;;  %v5209_v25 = vld [vmem:[%s8019_s2 + $0x390] sm:$0xff] }
 0x7d2   : > { %4729 = vmatmul.msk.f32.gmra.mxu2 %vm1201_vm2, %v5187_v10  ;;  %4766 = vmatmul.msk.f32.gmra.mxu0 %vm1201_vm2, %v5188_v38  ;;  %v3360_v10 = vpop.f32.mrf.mxu3  ;;  %v5192_v38 = vld [vmem:[%s8019_s2 + $0x160] sm:$0xff] }
 0x7d4   : > { %4855 = vmatmul.msk.f32.gmra.mxu1 %vm1201_vm2, %v5189_v53  ;;  %4818 = vmatmul.msk.f32.gmra.mxu3 %vm1201_vm2, %v5190_v9  ;;  %v7092_v53 = vpop.f32.mrf.mxu0  ;;  %v5193_v9 = vld [vmem:[%s8019_s2 + $0x368] sm:$0xff] }
 0x7d5   : > { %v7082_v60 = vpop.f32.mrf.mxu2  ;;  %8125 = vst [vmem:[#allocation100_spill] sm:$0xff] %v7092_v53  ;;  %v5196_v53 = vld [vmem:[%s8019_s2 + $0x168] sm:$0xff] }
 0x7da   : > { %4730 = vmatmul.msk.f32.gmra.mxu2 %vm1201_vm2, %v5191_v45  ;;  %4767 = vmatmul.msk.f32.gmra.mxu0 %vm1201_vm2, %v5192_v38  ;;  %v3363_v47 = vpop.f32.mrf.mxu3  ;;  %v5195_v38 = vld [vmem:[%s8019_s2 + $0xa0] sm:$0xff] }
 0x7dc   : > { %4856 = vmatmul.msk.f32.gmra.mxu1 %vm1201_vm2, %v5193_v9  ;;  %4819 = vmatmul.msk.f32.gmra.mxu3 %vm1201_vm2, %v5194_v27  ;;  %v5197_v9 = vld [vmem:[%s8019_s2 + $0x370] sm:$0xff]  ;;  %v7118_v27 = vpop.f32.mrf.mxu0 }
 0x7dd   : > { %v7102_v45 = vpop.f32.mrf.mxu2  ;;  %8126 = vst [vmem:[#allocation101_spill] sm:$0xff] %v7118_v27 }
 0x7e2   : > { %4731 = vmatmul.msk.f32.gmra.mxu2 %vm1201_vm2, %v5195_v38  ;;  %4768 = vmatmul.msk.f32.gmra.mxu0 %vm1201_vm2, %v5196_v53  ;;  %v3366_v38 = vpop.f32.mrf.mxu3  ;;  %v5199_v53 = vld [vmem:[%s8019_s2 + $0x170] sm:$0xff] }
 0x7e4   : > { %4857 = vmatmul.msk.f32.gmra.mxu1 %vm1201_vm2, %v5197_v9  ;;  %4820 = vmatmul.msk.f32.gmra.mxu3 %vm1201_vm2, %v6328_v43  ;;  %v5200_v43 = vld [vmem:[%s8019_s2 + $0x378] sm:$0xff]  ;;  %v7138_v27 = vpop.f32.mrf.mxu0 }
 0x7e5   : > { %v7120_v49 = vpop.f32.mrf.mxu2  ;;  %8127 = vst [vmem:[#allocation102_spill] sm:$0xff] %v7138_v27 }
 0x7ea   : > { %4732 = vmatmul.msk.f32.gmra.mxu2 %vm1201_vm2, %v5198_v57  ;;  %4769 = vmatmul.msk.f32.gmra.mxu0 %vm1201_vm2, %v5199_v53  ;;  %v7140_v57 = vpop.f32.mrf.mxu3  ;;  %v5201_v53 = vld [vmem:[%s8019_s2 + $0xb0] sm:$0xff] }
 0x7ec   : > { %4858 = vmatmul.msk.f32.gmra.mxu1 %vm1201_vm2, %v5200_v43  ;;  %4821 = vmatmul.msk.f32.gmra.mxu3 %vm1201_vm2, %v6354_v40  ;;  %v5202_v43 = vld [vmem:[%s8019_s2 + $0x178] sm:$0xff]  ;;  %v5203_v40 = vld [vmem:[%s8019_s2 + $0x380] sm:$0xff] }
 0x7ed   : > { %v7136_v9 = vpop.f32.mrf.mxu2 }
 0x7f1   : > { %v3551_v48 = vpop.f32.mrf.mxu1 }
 0x7f2   : > { %4733 = vmatmul.msk.f32.gmra.mxu2 %vm1201_vm2, %v5201_v53  ;;  %4770 = vmatmul.msk.f32.gmra.mxu0 %vm1201_vm2, %v5202_v43  ;;  %v7159_v21 = vpop.f32.mrf.mxu3  ;;  %v5204_v43 = vld [vmem:[%s8019_s2 + $0xb8] sm:$0xff] }
 0x7f4   : > { %4859 = vmatmul.msk.f32.gmra.mxu1 %vm1201_vm2, %v5203_v40  ;;  %4822 = vmatmul.msk.f32.gmra.mxu3 %vm1201_vm2, %v6374_v29  ;;  %v5205_v29 = vld [vmem:[%s8019_s2 + $0x180] sm:$0xff] }
 0x7f5   : > { %v7156_v27 = vpop.f32.mrf.mxu2 }
 0x7f7   : > { %v3169_v53 = vpop.f32.mrf.mxu0 }
 0x7f8   : > { %v3265_v19 = vadd.f32 %v3169_v53, %v3074_v20  ;;  %v5206_v20 = vld [vmem:[%s8019_s2 + $0x388] sm:$0xff] }
 0x7f9   : > { %v3554_v1 = vpop.f32.mrf.mxu1 }
 0x7fa   : > { %v3456_v36 = vadd.f32 %v3360_v10, %v3265_v19  ;;  %4734 = vmatmul.msk.f32.gmra.mxu2 %vm1201_vm2, %v5204_v43  ;;  %4771 = vmatmul.msk.f32.gmra.mxu0 %vm1201_vm2, %v5205_v29  ;;  %v5207_v29 = vld [vmem:[%s8019_s2 + $0xc0] sm:$0xff] }
 0x7fc   : > { %v7169_v54 = vadd.f32 %v3551_v48, %v3456_v36  ;;  %4860 = vmatmul.msk.f32.gmra.mxu1 %vm1201_vm2, %v5206_v20  ;;  %4823 = vmatmul.msk.f32.gmra.mxu3 %vm1201_vm2, %v6399_v24  ;;  %v7183_v48 = vpop.f32.mrf.mxu3  ;;  %v3076_v20 = vadd.f32 %v7082_v60, %v6288_v59  ;;  %v5211_v59 = vld [vmem:[%s8019_s2 + $0x190] sm:$0xff]  ;;  %v5212_v60 = vld [vmem:[%s8019_s2 + $0x398] sm:$0xff] }
 0x7fd   : > { %v7177_v19 = vpop.f32.mrf.mxu2 }
 0x7fe   : > { %v3680_v10 = vsel %vm3679_vm3, %v7169_v54, -inf }
 0x7ff   : > { %v3172_v40 = vpop.f32.mrf.mxu0  ;;  %3681 = vmax.xlane.f32.xlu0 %v3680_v10 }
 0x800   : > { %v3266_v36 = vadd.f32 %v3172_v40, %v3075_v22 }
 0x801   : > { %v3557_v53 = vpop.f32.mrf.mxu1 }
 0x802   : > { %v3457_v43 = vadd.f32 %v3363_v47, %v3266_v36  ;;  %4735 = vmatmul.msk.f32.gmra.mxu2 %vm1201_vm2, %v5207_v29  ;;  %4772 = vmatmul.msk.f32.gmra.mxu0 %vm1201_vm2, %v5208_v6  ;;  %v5210_v29 = vld [vmem:[%s8019_s2 + $0xc8] sm:$0xff] }
 0x804   : > { %v7193_v24 = vadd.f32 %v3554_v1, %v3457_v43  ;;  %4861 = vmatmul.msk.f32.gmra.mxu1 %vm1201_vm2, %v5209_v25  ;;  %4824 = vmatmul.msk.f32.gmra.mxu3 %vm1201_vm2, %v6417_v41  ;;  %v7207_v40 = vpop.f32.mrf.mxu3 }
 0x805   : > { %v7201_v47 = vpop.f32.mrf.mxu2 }
 0x806   : > { %v3683_v22 = vsel %vm3679_vm3, %v7193_v24, -inf }
 0x807   : > { %v3175_v10 = vpop.f32.mrf.mxu0  ;;  %3684 = vmax.xlane.f32.xlu0 %v3683_v22 }
 0x808   : > { %v3267_v1 = vadd.f32 %v3175_v10, %v3076_v20 }
 0x809   : > { %v3560_v36 = vpop.f32.mrf.mxu1 }
 0x80a   : > { %v3458_v43 = vadd.f32 %v3366_v38, %v3267_v1  ;;  %4736 = vmatmul.msk.f32.gmra.mxu2 %vm1201_vm2, %v5210_v29  ;;  %4773 = vmatmul.msk.f32.gmra.mxu0 %vm1201_vm2, %v5211_v59  ;;  %v3077_v38 = vadd.f32 %v7102_v45, %v6310_v33  ;;  %v5214_v33 = vld [vmem:[%s8019_s2 + $0x198] sm:$0xff] }
 0x80c   : > { %v7217_v41 = vadd.f32 %v3557_v53, %v3458_v43  ;;  %4862 = vmatmul.msk.f32.gmra.mxu1 %vm1201_vm2, %v5212_v60  ;;  %4825 = vmatmul.msk.f32.gmra.mxu3 %vm1201_vm2, %v6440_v34  ;;  %v7231_v22 = vpop.f32.mrf.mxu3  ;;  %v5213_v34 = vld [vmem:[%s8019_s2 + $0xd0] sm:$0xff]  ;;  %v5215_v43 = vld [vmem:[%s8019_s2 + $0x3a0] sm:$0xff] }
 0x80d   : > { %v7229_v25 = vpop.f32.mrf.mxu2 }
 0x80e   : > { %v3686_v6 = vsel %vm3679_vm3, %v7217_v41, -inf }
 0x80f   : > { %v3178_v20 = vpop.f32.mrf.mxu0  ;;  %3687 = vmax.xlane.f32.xlu1 %v3686_v6 }
 0x810   : > { %v3268_v53 = vadd.f32 %v3178_v20, %v3077_v38 }
 0x811   : > { %v3563_v10 = vpop.f32.mrf.mxu1 }
 0x812   : > { %v3459_v1 = vadd.f32 %v7140_v57, %v3268_v53  ;;  %4737 = vmatmul.msk.f32.gmra.mxu2 %vm1201_vm2, %v5213_v34  ;;  %4774 = vmatmul.msk.f32.gmra.mxu0 %vm1201_vm2, %v5214_v33  ;;  %v3078_v57 = vadd.f32 %v7120_v49, %v6333_v55  ;;  %v5217_v55 = vld [vmem:[%s8019_s2 + $0x1a0] sm:$0xff]  ;;  %v5218_v53 = vld [vmem:[%s8019_s2 + $0x3a8] sm:$0xff] }
 0x814   : > { %v7242_v45 = vadd.f32 %v3560_v36, %v3459_v1  ;;  %4863 = vmatmul.msk.f32.gmra.mxu1 %vm1201_vm2, %v5215_v43  ;;  %4826 = vmatmul.msk.f32.gmra.mxu3 %vm1201_vm2, %v6458_v37  ;;  %v7254_v36 = vpop.f32.mrf.mxu3  ;;  %v5216_v37 = vld [vmem:[%s8019_s2 + $0xd8] sm:$0xff] }
 0x815   : > { %v7256_v38 = vpop.f32.mrf.mxu2 }
 0x816   : > { %v3689_v29 = vsel %vm3679_vm3, %v7242_v45, -inf }
 0x817   : > { %v3181_v59 = vpop.f32.mrf.mxu0  ;;  %3690 = vmax.xlane.f32.xlu1 %v3689_v29  ;;  %v5219_v29 = vld [vmem:[%s8019_s2 + $0xe0] sm:$0xff] }
 0x818   : > { %v3269_v60 = vadd.f32 %v3181_v59, %v3078_v57  ;;  %v3080_v59 = vadd.f32 %v7156_v27, %v6378_v12  ;;  %v5223_v12 = vld [vmem:[%s8019_s2 + $0x1b0] sm:$0xff] }
 0x819   : > { %v3566_v6 = vpop.f32.mrf.mxu1 }
 0x81a   : > { %v3460_v20 = vadd.f32 %v7159_v21, %v3269_v60  ;;  %4738 = vmatmul.msk.f32.gmra.mxu2 %vm1201_vm2, %v5216_v37  ;;  %4775 = vmatmul.msk.f32.gmra.mxu0 %vm1201_vm2, %v5217_v55  ;;  %v3079_v21 = vadd.f32 %v7136_v9, %v6356_v4 }
 0x81c   : > { %v7267_v49 = vadd.f32 %v3563_v10, %v3460_v20  ;;  %4864 = vmatmul.msk.f32.gmra.mxu1 %vm1201_vm2, %v5218_v53  ;;  %4827 = vmatmul.msk.f32.gmra.mxu3 %vm1201_vm2, %v6481_v5  ;;  %v7279_v10 = vpop.f32.mrf.mxu3  ;;  %v5220_v5 = vld [vmem:[%s8019_s2 + $0x1a8] sm:$0xff] }
 0x81d   : > { %v7290_v4 = vpop.f32.mrf.mxu2 }
 0x81e   : > { %v3692_v1 = vsel %vm3679_vm3, %v7267_v49, -inf }
 0x81f   : > { %v3184_v34 = vpop.f32.mrf.mxu0  ;;  %3693 = vmax.xlane.f32.xlu2 %v3692_v1 }
 0x820   : > { %v3270_v33 = vadd.f32 %v3184_v34, %v3079_v21  ;;  %v5222_v21 = vld [vmem:[%s8019_s2 + $0xe8] sm:$0xff]  ;;  %v897_v34 = vadd.f32 %v6521_v15, %v5479_v3 }
 0x821   : > { %v3569_v43 = vpop.f32.mrf.mxu1 }
 0x822   : > { %v3461_v57 = vadd.f32 %v7183_v48, %v3270_v33  ;;  %4739 = vmatmul.msk.f32.gmra.mxu2 %vm1201_vm2, %v5219_v29  ;;  %4776 = vmatmul.msk.f32.gmra.mxu0 %vm1201_vm2, %v5220_v5  ;;  %v5221_v48 = vld [vmem:[%s8019_s2 + $0x3b0] sm:$0xff]  ;;  %v3081_v33 = vadd.f32 %v7177_v19, %v6402_v13 }
 0x823   : > { %v5225_v13 = vld [vmem:[%s8019_s2 + $0xf0] sm:$0xff] }
 0x824   : > { %v7292_v9 = vadd.f32 %v3566_v6, %v3461_v57  ;;  %4865 = vmatmul.msk.f32.gmra.mxu1 %vm1201_vm2, %v5221_v48  ;;  %4828 = vmatmul.msk.f32.gmra.mxu3 %vm1201_vm2, %v6501_v14  ;;  %v7304_v6 = vpop.f32.mrf.mxu3  ;;  %v2063_v14 = vadd.f32 %v6563_v0, %v6257_v50 }
 0x825   : > { %v7325_v1 = vpop.f32.mrf.mxu2 }
 0x826   : > { %v3695_v60 = vsel %vm3679_vm3, %v7292_v9, -inf  ;;  %v2383_v57 = vadd.f32 %v6772_v7, %v2063_v14 }
 0x827   : > { %v3187_v20 = vpop.f32.mrf.mxu0  ;;  %3696 = vmax.xlane.f32.xlu2 %v3695_v60 }
 0x828   : > { %v3271_v37 = vadd.f32 %v3187_v20, %v3080_v59  ;;  %v2682_v7 = vadd.f32 %v6625_v39, %v2383_v57 }
 0x829   : > { %v3572_v55 = vpop.f32.mrf.mxu1 }
 0x82a   : > { %v3462_v53 = vadd.f32 %v7207_v40, %v3271_v37  ;;  %4740 = vmatmul.msk.f32.gmra.mxu2 %vm1201_vm2, %v5222_v21  ;;  %4777 = vmatmul.msk.f32.gmra.mxu0 %vm1201_vm2, %v5223_v12  ;;  %v5224_v40 = vld [vmem:[%s8019_s2 + $0x3b8] sm:$0xff]  ;;  %v2065_v12 = vadd.f32 %v6579_v35, %v6300_v44 }
 0x82c   : > { %v7317_v27 = vadd.f32 %v3569_v43, %v3462_v53  ;;  %4866 = vmatmul.msk.f32.gmra.mxu1 %vm1201_vm2, %v5224_v40  ;;  %4829 = vmatmul.msk.f32.gmra.mxu3 %vm1201_vm2, %v6516_v23  ;;  %v1424_v43 = vadd.f32 %v6020_v42, %v897_v34  ;;  %v7335_v5 = vpop.f32.mrf.mxu3  ;;  %v5226_v42 = vld [vmem:[%s8019_s2 + $0x1b8] sm:$0xff]  ;;  %v899_v40 = vadd.f32 %v6521_v15, %v5493_v30  ;;  %v5231_v15 = vld [vmem:[%s8019_s2 + $0x1c8] sm:$0xff] }
 0x82d   : > { %v7360_v20 = vpop.f32.mrf.mxu2  ;;  %v2385_v35 = vadd.f32 %v6776_v32, %v2065_v12  ;;  %v8130_v12 = vld [vmem:[#allocation45_spill] sm:$0xff] }
 0x82e   : > { %v3698_v50 = vsel %vm3679_vm3, %v7317_v27, -inf  ;;  %v1744_v48 = vadd.f32 %v6276_v52, %v1424_v43  ;;  %v5227_v52 = vld [vmem:[%s8019_s2 + $0x3c0] sm:$0xff]  ;;  %v1426_v44 = vadd.f32 %v6056_v61, %v899_v40 }
 0x82f   : > { %v3190_v0 = vpop.f32.mrf.mxu0  ;;  %3699 = vmax.xlane.f32.xlu0 %v3698_v50  ;;  %v2684_v61 = vadd.f32 %v6636_v11, %v2385_v35 }
 0x830   : > { %v3272_v29 = vadd.f32 %v3190_v0, %v3081_v33  ;;  %v2064_v19 = vadd.f32 %v6572_v16, %v1744_v48 }
 0x831   : > { %v3575_v23 = vpop.f32.mrf.mxu1 }
 0x832   : > { %v3463_v3 = vadd.f32 %v7231_v22, %v3272_v29  ;;  %4741 = vmatmul.msk.f32.gmra.mxu2 %vm1201_vm2, %v5225_v13  ;;  %4778 = vmatmul.msk.f32.gmra.mxu0 %vm1201_vm2, %v5226_v42  ;;  %v3082_v22 = vadd.f32 %v7201_v47, %v2682_v7  ;;  %v2384_v16 = vadd.f32 %v6774_v2, %v2064_v19  ;;  %v5229_v47 = vld [vmem:[%s8019_s2 + $0x1c0] sm:$0xff]  ;;  %v5233_v7 = vld [vmem:[%s8019_s2 + $0x1d0] sm:$0xff] }
 0x833   : > { %v1746_v29 = vadd.f32 %v6319_v17, %v1426_v44  ;;  %v3084_v17 = vadd.f32 %v7256_v38, %v2684_v61  ;;  %v8134_v61 = vld [vmem:[#allocation46_spill] sm:$0xff] }
 0x834   : > { %v7349_v59 = vadd.f32 %v3572_v55, %v3463_v3  ;;  %4867 = vmatmul.msk.f32.gmra.mxu1 %vm1201_vm2, %v5227_v52  ;;  %4830 = vmatmul.msk.f32.gmra.mxu3 %vm1201_vm2, %v6536_v31  ;;  %v7363_v55 = vpop.f32.mrf.mxu3  ;;  %v5228_v31 = vld [vmem:[%s8019_s2 + $0xf8] sm:$0xff]  ;;  %v2683_v2 = vadd.f32 %v6631_v56, %v2384_v16  ;;  %v2067_v52 = vadd.f32 %v6590_v26, %v6345_v46 }
 0x835   : > { %v7392_v43 = vpop.f32.mrf.mxu2  ;;  %v2066_v32 = vadd.f32 %v6586_v51, %v1746_v29  ;;  %v5238_v29 = vld [vmem:[%s8019_s2 + $0x1e0] sm:$0xff] }
 0x836   : > { %v3701_v60 = vsel %vm3679_vm3, %v7349_v59, -inf  ;;  %v3083_v34 = vadd.f32 %v7229_v25, %v2683_v2  ;;  %v2387_v16 = vadd.f32 %v6781_v63, %v2067_v52  ;;  %v5237_v63 = vld [vmem:[%s8019_s2 + $0x3e0] sm:$0xff] }
 0x837   : > { %v3193_v39 = vpop.f32.mrf.mxu0  ;;  %3702 = vmax.xlane.f32.xlu1 %v3701_v60  ;;  %v2386_v3 = vadd.f32 %v6778_v18, %v2066_v32 }
 0x838   : > { %v3273_v37 = vadd.f32 %v3193_v39, %v3082_v22  ;;  %v5234_v22 = vld [vmem:[%s8019_s2 + $0x3d8] sm:$0xff] }
 0x839   : > { %v3578_v53 = vpop.f32.mrf.mxu1  ;;  %v2685_v19 = vadd.f32 %v6641_v8, %v2386_v3 }
 0x83a   : > { %v3464_v21 = vadd.f32 %v7254_v36, %v3273_v37  ;;  %4742 = vmatmul.msk.f32.gmra.mxu2 %vm1201_vm2, %v5228_v31  ;;  %4779 = vmatmul.msk.f32.gmra.mxu0 %vm1201_vm2, %v5229_v47  ;;  %v5230_v36 = vld [vmem:[%s8019_s2 + $0x3c8] sm:$0xff] }
 0x83b   : > { %v3085_v8 = vadd.f32 %v7290_v4, %v2685_v19  ;;  %v8129_v4 = vld [vmem:[#allocation57_spill] sm:$0xff] }
 0x83c   : > { %v7377_v14 = vadd.f32 %v3575_v23, %v3464_v21  ;;  %4868 = vmatmul.msk.f32.gmra.mxu1 %vm1201_vm2, %v5230_v36  ;;  %v7390_v0 = vpop.f32.mrf.mxu3  ;;  %v5232_v23 = vld [vmem:[%s8019_s2 + $0x3d0] sm:$0xff]  ;;  %v2686_v2 = vadd.f32 %v8129_v4, %v2387_v16 }
 0x83d   : > { %v7419_v38 = vpop.f32.mrf.mxu2  ;;  %v8138_v19 = vld [vmem:[#allocation85_spill] sm:$0xff] }
 0x83e   : > { %v3704_v33 = vsel %vm3679_vm3, %v7377_v14, -inf  ;;  %v8140_v16 = vld [vmem:[#allocation61_spill] sm:$0xff] }
 0x83f   : > { %v3196_v56 = vpop.f32.mrf.mxu0  ;;  %3705 = vmax.xlane.f32.xlu2 %v3704_v33  ;;  %v8131_v33 = vld [vmem:[#allocation84_spill] sm:$0xff] }
 0x840   : > { %v3274_v50 = vadd.f32 %v3196_v56, %v3083_v34 }
 0x841   : > { %v3581_v57 = vpop.f32.mrf.mxu1 }
 0x842   : > { %v3465_v30 = vadd.f32 %v7279_v10, %v3274_v50  ;;  %4780 = vmatmul.msk.f32.gmra.mxu0 %vm1201_vm2, %v5231_v15  ;;  %v8133_v15 = vld [vmem:[#allocation27_spill] sm:$0xff] }
 0x843   : > { %v2069_v32 = vadd.f32 %v8134_v61, %v8133_v15 }
 0x844   : > { %v7402_v25 = vadd.f32 %v3578_v53, %v3465_v30  ;;  %4869 = vmatmul.msk.f32.gmra.mxu1 %vm1201_vm2, %v5232_v23  ;;  %v7412_v13 = vpop.f32.mrf.mxu3 }
 0x845   : > { %v2389_v52 = vadd.f32 %v8138_v19, %v2069_v32 }
 0x846   : > { %v3707_v10 = vsel %vm3679_vm3, %v7402_v25, -inf }
 0x847   : > { %v3199_v48 = vpop.f32.mrf.mxu0  ;;  %3708 = vmax.xlane.f32.xlu0 %v3707_v10 }
 0x848   : > { %v3275_v11 = vadd.f32 %v3199_v48, %v3084_v17  ;;  %v5239_v17 = vld [vmem:[%s8019_s2 + $0x3e8] sm:$0xff] }
 0x849   : > { %v3584_v51 = vpop.f32.mrf.mxu1 }
 0x84a   : > { %v3466_v42 = vadd.f32 %v7304_v6, %v3275_v11  ;;  %4781 = vmatmul.msk.f32.gmra.mxu0 %vm1201_vm2, %v5233_v7  ;;  %v7433_v6 = vld [vmem:[%s8024_s7] ss:$0 sm:$0xff] }
 0x84b   : > { %v901_v60 = vadd.f32 %v7433_v6, %v5507_v58  ;;  %v5236_v58 = vld [vmem:[%s8019_s2 + $0x1d8] sm:$0xff] }
 0x84c   : > { %v7424_v18 = vadd.f32 %v3581_v57, %v3466_v42  ;;  %4870 = vmatmul.msk.f32.gmra.mxu1 %vm1201_vm2, %v5234_v22  ;;  %v7442_v53 = vpop.f32.mrf.mxu3  ;;  %v8137_v42 = vld [vmem:[#allocation25_spill] sm:$0xff] }
 0x84d   : > { %v1428_v39 = vadd.f32 %v6092_v62, %v901_v60 }
 0x84e   : > { %8128 = vst [vmem:[#allocation103_spill] sm:$0xff] %v7424_v18  ;;  %v3710_v46 = vsel %vm3679_vm3, %v7424_v18, -inf }
 0x84f   : > { %v3202_v26 = vpop.f32.mrf.mxu0  ;;  %3711 = vmax.xlane.f32.xlu1 %v3710_v46  ;;  %v1748_v31 = vadd.f32 %v6365_v28, %v1428_v39  ;;  %v7458_v28 = vpop.f32.mrf.mxu2 }
 0x850   : > { %v3276_v37 = vadd.f32 %v3202_v26, %v3085_v8  ;;  %v8139_v8 = vld [vmem:[#allocation28_spill] sm:$0xff] }
 0x851   : > { %v3587_v21 = vpop.f32.mrf.mxu1  ;;  %v2068_v62 = vadd.f32 %v8130_v12, %v1748_v31  ;;  %v8142_v12 = vld [vmem:[#allocation86_spill] sm:$0xff] }
 0x852   : > { %v3467_v47 = vadd.f32 %v7335_v5, %v3276_v37  ;;  %4782 = vmatmul.msk.f32.gmra.mxu0 %vm1201_vm2, %v5236_v58  ;;  %v3086_v5 = vadd.f32 %v7325_v1, %v2686_v2  ;;  %v8132_v1 = vld [vmem:[#allocation59_spill] sm:$0xff]  ;;  %v2688_v37 = vadd.f32 %v8140_v16, %v2389_v52  ;;  %v5241_v58 = vld [vmem:[%s8019_s2 + $0x3f0] sm:$0xff] }
 0x853   : > { %v2388_v56 = vadd.f32 %v8131_v33, %v2068_v62  ;;  %v5242_v33 = vld [vmem:[%s8019_s2 + $0x1f0] sm:$0xff] }
 0x854   : > { %v7452_v36 = vadd.f32 %v3584_v51, %v3467_v47  ;;  %4871 = vmatmul.msk.f32.gmra.mxu1 %vm1201_vm2, %v5237_v63  ;;  %v7464_v50 = vpop.f32.mrf.mxu3 }
 0x855   : > { %v2687_v30 = vadd.f32 %v8132_v1, %v2388_v56  ;;  %v5243_v1 = vld [vmem:[%s8019_s2 + $0x3f8] sm:$0xff] }
 0x856   : > { %v3713_v40 = vsel %vm3679_vm3, %v7452_v36, -inf }
 0x857   : > { %v3205_v34 = vpop.f32.mrf.mxu0  ;;  %3714 = vmax.xlane.f32.xlu2 %v3713_v40  ;;  %v3087_v48 = vadd.f32 %v7360_v20, %v2687_v30  ;;  %v7485_v11 = vpop.f32.mrf.mxu2  ;;  %v5240_v20 = vld [vmem:[%s8019_s2 + $0x1e8] sm:$0xff] }
 0x858   : > { %v3277_v44 = vadd.f32 %v3205_v34, %v3086_v5  ;;  %v8146_v30 = vld [vmem:[#allocation4_spill] sm:$0xff] }
 0x859   : > { %v3590_v35 = vpop.f32.mrf.mxu1  ;;  %v905_v15 = vadd.f32 %v7433_v6, %v8146_v30 }
 0x85a   : > { %v3468_v57 = vadd.f32 %v7363_v55, %v3277_v44  ;;  %4783 = vmatmul.msk.f32.gmra.mxu0 %vm1201_vm2, %v5238_v29  ;;  %v8136_v55 = vld [vmem:[#allocation3_spill] sm:$0xff]  ;;  %v8144_v44 = vld [vmem:[#allocation29_spill] sm:$0xff] }
 0x85b   : > { %v903_v10 = vadd.f32 %v7433_v6, %v8136_v55  ;;  %v8147_v55 = vld [vmem:[#allocation26_spill] sm:$0xff] }
 0x85c   : > { %v7474_v23 = vadd.f32 %v3587_v21, %v3468_v57  ;;  %4872 = vmatmul.msk.f32.gmra.mxu1 %vm1201_vm2, %v5239_v17  ;;  %v7495_v39 = vpop.f32.mrf.mxu3  ;;  %v8141_v21 = vld [vmem:[#allocation47_spill] sm:$0xff] }
 0x85d   : > { %v1430_v7 = vadd.f32 %v8137_v42, %v903_v10  ;;  %v1432_v10 = vadd.f32 %v8147_v55, %v905_v15 }
 0x85e   : > { %8135 = vst [vmem:[#allocation57_spill] sm:$0xff] %v7474_v23  ;;  %v3716_v3 = vsel %vm3679_vm3, %v7474_v23, -inf }
 0x85f   : > { %v3208_v51 = vpop.f32.mrf.mxu0  ;;  %3717 = vmax.xlane.f32.xlu0 %v3716_v3  ;;  %v1750_v46 = vadd.f32 %v8139_v8, %v1430_v7  ;;  %v7509_v5 = vpop.f32.mrf.mxu2  ;;  %v8149_v7 = vld [vmem:[#allocation30_spill] sm:$0xff] }
 0x860   : > { %v3278_v22 = vadd.f32 %v3208_v51, %v3087_v48  ;;  %v8148_v48 = vld [vmem:[#allocation87_spill] sm:$0xff]  ;;  %v1752_v19 = vadd.f32 %v8149_v7, %v1432_v10  ;;  %v8157_v7 = vld [vmem:[#allocation69_spill] sm:$0xff] }
 0x861   : > { %v3593_v60 = vpop.f32.mrf.mxu1  ;;  %v2070_v31 = vadd.f32 %v8141_v21, %v1750_v46  ;;  %v8150_v46 = vld [vmem:[#allocation65_spill] sm:$0xff] }
 0x862   : > { %v3469_v26 = vadd.f32 %v7390_v0, %v3278_v22  ;;  %4784 = vmatmul.msk.f32.gmra.mxu0 %vm1201_vm2, %v5240_v20  ;;  %v3088_v0 = vadd.f32 %v7392_v43, %v2688_v37  ;;  %v8143_v43 = vld [vmem:[#allocation63_spill] sm:$0xff]  ;;  %v5244_v22 = vld [vmem:[%s8019_s2 + $0x1f8] sm:$0xff]  ;;  %v8151_v20 = vld [vmem:[#allocation49_spill] sm:$0xff] }
 0x863   : > { %v2390_v62 = vadd.f32 %v8142_v12, %v2070_v31  ;;  %v2072_v16 = vadd.f32 %v8151_v20, %v1752_v19 }
 0x864   : > { %v7499_v47 = vadd.f32 %v3590_v35, %v3469_v26  ;;  %4873 = vmatmul.msk.f32.gmra.mxu1 %vm1201_vm2, %v5241_v58  ;;  %v8145_v35 = vld [vmem:[#allocation48_spill] sm:$0xff] }
 0x865   : > { %v2689_v56 = vadd.f32 %v8143_v43, %v2390_v62  ;;  %v2071_v57 = vadd.f32 %v8145_v35, %v8144_v44  ;;  %v8154_v43 = vld [vmem:[#allocation31_spill] sm:$0xff] }
 0x866   : > { %v3719_v4 = vsel %vm3679_vm3, %v7499_v47, -inf }
 0x867   : > { %v3211_v2 = vpop.f32.mrf.mxu0  ;;  %3720 = vmax.xlane.f32.xlu1 %v3719_v4  ;;  %v3089_v61 = vadd.f32 %v7419_v38, %v2689_v56  ;;  %v2391_v3 = vadd.f32 %v8148_v48, %v2071_v57  ;;  %v8152_v4 = vld [vmem:[#allocation88_spill] sm:$0xff]  ;;  %v8155_v56 = vld [vmem:[#allocation50_spill] sm:$0xff] }
 0x868   : > { %v3279_v63 = vadd.f32 %v3211_v2, %v3088_v0  ;;  %v2392_v2 = vadd.f32 %v8152_v4, %v2072_v16  ;;  %v2073_v44 = vadd.f32 %v8155_v56, %v8154_v43  ;;  %v8162_v43 = vld [vmem:[#allocation33_spill] sm:$0xff]  ;;  %v8163_v56 = vld [vmem:[#allocation52_spill] sm:$0xff] }
 0x869   : > { %v3596_v40 = vpop.f32.mrf.mxu1  ;;  %v2690_v26 = vadd.f32 %v8150_v46, %v2391_v3 }
 0x86a   : > { %v3470_v34 = vadd.f32 %v7412_v13, %v3279_v63  ;;  %4785 = vmatmul.msk.f32.gmra.mxu0 %vm1201_vm2, %v5242_v33  ;;  %v7525_v13 = vpop.f32.mrf.mxu3 }
 0x86b   : > { %v3090_v21 = vadd.f32 %v7458_v28, %v2690_v26  ;;  %v8153_v28 = vld [vmem:[#allocation67_spill] sm:$0xff] }
 0x86c   : > { %v7519_v29 = vadd.f32 %v3593_v60, %v3470_v34  ;;  %4874 = vmatmul.msk.f32.gmra.mxu1 %vm1201_vm2, %v5243_v1  ;;  %v7542_v60 = vpop.f32.mrf.mxu2  ;;  %v2691_v33 = vadd.f32 %v8153_v28, %v2392_v2  ;;  %v8161_v28 = vld [vmem:[#allocation71_spill] sm:$0xff] }
 0x86e   : > { %v3722_v32 = vsel %vm3679_vm3, %v7519_v29, -inf  ;;  %v3091_v15 = vadd.f32 %v7485_v11, %v2691_v33 }
 0x86f   : > { %v3214_v17 = vpop.f32.mrf.mxu0  ;;  %3723 = vmax.xlane.f32.xlu2 %v3722_v32 }
 0x870   : > { %v3280_v51 = vadd.f32 %v3214_v17, %v3089_v61  ;;  %v8156_v17 = vld [vmem:[#allocation89_spill] sm:$0xff] }
 0x871   : > { %v3599_v42 = vpop.f32.mrf.mxu1  ;;  %v2393_v55 = vadd.f32 %v8156_v17, %v2073_v44  ;;  %v2075_v44 = vadd.f32 %v8163_v56, %v8162_v43  ;;  %v8164_v17 = vld [vmem:[#allocation91_spill] sm:$0xff] }
 0x872   : > { %v3471_v52 = vadd.f32 %v7442_v53, %v3280_v51  ;;  %4786 = vmatmul.msk.f32.gmra.mxu0 %vm1201_vm2, %v5244_v22  ;;  %v7540_v38 = vpop.xlane.xlu0 %3681  ;;  %v7553_v0 = vpop.f32.mrf.mxu3  ;;  %v8159_v22 = vld [vmem:[#allocation51_spill] sm:$0xff] }
 0x873   : > { %v3776_v8 = vsub.f32 %v7169_v54, %v7540_v38  ;;  %v2692_v19 = vadd.f32 %v8157_v7, %v2393_v55  ;;  %v2395_v55 = vadd.f32 %v8164_v17, %v2075_v44  ;;  %v8171_v44 = vld [vmem:[#allocation35_spill] sm:$0xff]  ;;  %v8173_v17 = vld [vmem:[#allocation54_spill] sm:$0xff] }
 0x874   : > { %v7548_v37 = vadd.f32 %v3596_v40, %v3471_v52  ;;  %v3038_v1 = vpop.f32.mrf.mxu2  ;;  %v8158_v52 = vld [vmem:[#allocation32_spill] sm:$0xff] }
 0x875   : > { %v3808_v53 = vmul.f32 1.442695, %v3776_v8  ;;  %v2074_v8 = vadd.f32 %v8159_v22, %v8158_v52  ;;  %v3092_v16 = vadd.f32 %v7509_v5, %v2692_v19  ;;  %v8165_v19 = vld [vmem:[#allocation72_spill] sm:$0xff]  ;;  %v8166_v22 = vld [vmem:[#allocation34_spill] sm:$0xff] }
 0x876   : > { %v3725_v31 = vsel %vm3679_vm3, %v7548_v37, -inf  ;;  %v2694_v52 = vadd.f32 %v8165_v19, %v2395_v55  ;;  %v8174_v19 = vld [vmem:[#allocation6_spill] sm:$0xff] }
 0x877   : > { %4984 = vpow2.f32 %v3808_v53  ;;  %v3217_v58 = vpop.f32.mrf.mxu0  ;;  %3726 = vmax.xlane.f32.xlu0 %v3725_v31 }
 0x878   : > { %v3281_v12 = vadd.f32 %v3217_v58, %v3090_v21  ;;  %v8160_v58 = vld [vmem:[#allocation90_spill] sm:$0xff] }
 0x879   : > { %v3602_v62 = vpop.f32.mrf.mxu1  ;;  %v2394_v4 = vadd.f32 %v8160_v58, %v2074_v8  ;;  %v8167_v8 = vld [vmem:[#allocation53_spill] sm:$0xff] }
 0x87a   : > { %v3472_v63 = vadd.f32 %v7464_v50, %v3281_v12  ;;  %v7557_v34 = vpop.xlane.xlu0 %3684  ;;  %v3420_v3 = vpop.f32.mrf.mxu3 }
 0x87b   : > { %v3777_v40 = vsub.f32 %v7193_v24, %v7557_v34  ;;  %v2693_v33 = vadd.f32 %v8161_v28, %v2394_v4  ;;  %v3094_v4 = vadd.f32 %v3038_v1, %v2694_v52  ;;  %v911_v52 = vadd.f32 %v7433_v6, %v8174_v19  ;;  %v8181_v19 = vld [vmem:[#allocation17_spill] sm:$0xff] }
 0x87c   : > { %v7564_v35 = vadd.f32 %v3599_v42, %v3472_v63  ;;  %v3041_v21 = vpop.f32.mrf.mxu2 }
 0x87d   : > { %v4985_v57 = vpop.eup %4984  ;;  %v3810_v30 = vmul.f32 1.442695, %v3777_v40 }
 0x87e   : > { %v3872_v61 = vsel %vm3679_vm3, %v4985_v57, 0.0  ;;  %v3728_v50 = vsel %vm3679_vm3, %v7564_v35, -inf }
 0x87f   : > { %4986 = vpow2.f32 %v3810_v30  ;;  %v3220_v32 = vpop.f32.mrf.mxu0  ;;  %3873 = vadd.xlane.f32.xlu2 %v3872_v61  ;;  %3729 = vmax.xlane.f32.xlu1 %v3728_v50  ;;  %v3093_v61 = vadd.f32 %v7542_v60, %v2693_v33 }
 0x880   : > { %v3282_v10 = vadd.f32 %v3220_v32, %v3091_v15 }
 0x881   : > { %v3605_v48 = vpop.f32.mrf.mxu1 }
 0x882   : > { %v3473_v51 = vadd.f32 %v7495_v39, %v3282_v10  ;;  %v7572_v42 = vpop.xlane.xlu1 %3687  ;;  %v3423_v40 = vpop.f32.mrf.mxu3 }
 0x883   : > { %v3778_v11 = vsub.f32 %v7217_v41, %v7572_v42 }
 0x884   : > { %v7579_v46 = vadd.f32 %v3602_v62, %v3473_v51  ;;  %v3044_v51 = vpop.f32.mrf.mxu2 }
 0x885   : > { %v4987_v26 = vpop.eup %4986  ;;  %v3812_v20 = vmul.f32 1.442695, %v3778_v11 }
 0x886   : > { %v3875_v53 = vsel %vm3679_vm3, %v4987_v26, 0.0  ;;  %v3731_v39 = vsel %vm3679_vm3, %v7579_v46, -inf  ;;  %v2076_v26 = vadd.f32 %v8167_v8, %v8166_v22 }
 0x887   : > { %4988 = vpow2.f32 %v3812_v20  ;;  %v3223_v31 = vpop.f32.mrf.mxu0  ;;  %3876 = vadd.xlane.f32.xlu0 %v3875_v53  ;;  %3732 = vmax.xlane.f32.xlu2 %v3731_v39 }
 0x888   : > { %v3283_v2 = vadd.f32 %v3223_v31, %v3092_v16  ;;  %v8168_v31 = vld [vmem:[#allocation5_spill] sm:$0xff] }
 0x889   : > { %v3608_v12 = vpop.f32.mrf.mxu1  ;;  %v910_v58 = vadd.f32 %v7433_v6, %v8168_v31 }
 0x88a   : > { %v3474_v62 = vadd.f32 %v7525_v13, %v3283_v2  ;;  %v7587_v63 = vpop.xlane.xlu1 %3690  ;;  %v3426_v39 = vpop.f32.mrf.mxu3 }
 0x88b   : > { %v3779_v5 = vsub.f32 %v7242_v45, %v7587_v63 }
 0x88c   : > { %v7594_v57 = vadd.f32 %v3605_v48, %v3474_v62  ;;  %v3047_v1 = vpop.f32.mrf.mxu2 }
 0x88d   : > { %v4989_v30 = vpop.eup %4988  ;;  %v3814_v15 = vmul.f32 1.442695, %v3779_v5  ;;  %v8169_v5 = vld [vmem:[#allocation15_spill] sm:$0xff] }
 0x88e   : > { %v3878_v50 = vsel %vm3679_vm3, %v4989_v30, 0.0  ;;  %v3734_v13 = vsel %vm3679_vm3, %v7594_v57, -inf  ;;  %v1437_v28 = vadd.f32 %v8169_v5, %v910_v58 }
 0x88f   : > { %4990 = vpow2.f32 %v3814_v15  ;;  %v3226_v32 = vpop.f32.mrf.mxu0  ;;  %3879 = vadd.xlane.f32.xlu1 %v3878_v50  ;;  %3735 = vmax.xlane.f32.xlu0 %v3734_v13  ;;  %v8172_v13 = vld [vmem:[#allocation73_spill] sm:$0xff] }
 0x890   : > { %v3284_v10 = vadd.f32 %v3226_v32, %v3093_v61  ;;  %v1757_v30 = vadd.f32 %v8171_v44, %v1437_v28 }
 0x891   : > { %v3611_v11 = vpop.f32.mrf.mxu1 }
 0x892   : > { %v3475_v48 = vadd.f32 %v7553_v0, %v3284_v10  ;;  %v7602_v7 = vpop.xlane.xlu2 %3693  ;;  %v2077_v55 = vadd.f32 %v8173_v17, %v1757_v30 }
 0x893   : > { %v3780_v60 = vsub.f32 %v7267_v49, %v7602_v7 }
 0x894   : > { %v7609_v20 = vadd.f32 %v3608_v12, %v3475_v48  ;;  %v8170_v12 = vld [vmem:[#allocation92_spill] sm:$0xff] }
 0x895   : > { %v4991_v16 = vpop.eup %4990  ;;  %v3816_v53 = vmul.f32 1.442695, %v3780_v60  ;;  %v2396_v33 = vadd.f32 %v8170_v12, %v2076_v26  ;;  %v8178_v12 = vld [vmem:[#allocation74_spill] sm:$0xff] }
 0x896   : > { %v3737_v0 = vsel %vm3679_vm3, %v7609_v20, -inf  ;;  %v3881_v2 = vsel %vm3679_vm3, %v4991_v16, 0.0  ;;  %v3429_v16 = vpop.f32.mrf.mxu3 }
 0x897   : > { %4992 = vpow2.f32 %v3816_v53  ;;  %v3229_v62 = vpop.f32.mrf.mxu0  ;;  %3738 = vmax.xlane.f32.xlu1 %v3737_v0  ;;  %3882 = vadd.xlane.f32.xlu2 %v3881_v2  ;;  %v2695_v32 = vadd.f32 %v8172_v13, %v2396_v33  ;;  %v8175_v53 = vld [vmem:[#allocation16_spill] sm:$0xff] }
 0x898   : > { %v3285_v43 = vadd.f32 %v3229_v62, %v3094_v4  ;;  %v1438_v31 = vadd.f32 %v8175_v53, %v911_v52  ;;  %v8177_v2 = vld [vmem:[#allocation36_spill] sm:$0xff]  ;;  %v8183_v53 = vld [vmem:[#allocation37_spill] sm:$0xff] }
 0x899   : > { %v3614_v56 = vpop.f32.mrf.mxu1  ;;  %v3095_v22 = vadd.f32 %v3041_v21, %v2695_v32  ;;  %v8180_v32 = vld [vmem:[#allocation7_spill] sm:$0xff] }
 0x89a   : > { %v3476_v15 = vadd.f32 %v3420_v3, %v3285_v43  ;;  %v7619_v61 = vpop.xlane.xlu2 %3696  ;;  %v1758_v62 = vadd.f32 %v8177_v2, %v1438_v31  ;;  %v8179_v43 = vld [vmem:[#allocation55_spill] sm:$0xff]  ;;  %v912_v17 = vadd.f32 %v7433_v6, %v8180_v32 }
 0x89b   : > { %v3781_v50 = vsub.f32 %v7292_v9, %v7619_v61 }
 0x89c   : > { %v7625_v10 = vadd.f32 %v3611_v11, %v3476_v15  ;;  %v8176_v11 = vld [vmem:[#allocation93_spill] sm:$0xff]  ;;  %v2078_v44 = vadd.f32 %v8179_v43, %v1758_v62  ;;  %v1439_v52 = vadd.f32 %v8181_v19, %v912_v17  ;;  %v8185_v62 = vld [vmem:[#allocation56_spill] sm:$0xff] }
 0x89d   : > { %v4993_v48 = vpop.eup %4992  ;;  %v3818_v60 = vmul.f32 1.442695, %v3781_v50  ;;  %v2397_v58 = vadd.f32 %v8176_v11, %v2077_v55  ;;  %v3050_v50 = vpop.f32.mrf.mxu2  ;;  %v8186_v43 = vld [vmem:[#allocation8_spill] sm:$0xff] }
 0x89e   : > { %v3884_v3 = vsel %vm3679_vm3, %v4993_v48, 0.0  ;;  %v3740_v8 = vsel %vm3679_vm3, %v7625_v10, -inf  ;;  %v1759_v31 = vadd.f32 %v8183_v53, %v1439_v52  ;;  %v8189_v52 = vld [vmem:[#allocation38_spill] sm:$0xff] }
 0x89f   : > { %4994 = vpow2.f32 %v3818_v60  ;;  %v3232_v26 = vpop.f32.mrf.mxu0  ;;  %3885 = vadd.xlane.f32.xlu0 %v3884_v3  ;;  %3741 = vmax.xlane.f32.xlu2 %v3740_v8  ;;  %v2696_v33 = vadd.f32 %v8178_v12, %v2397_v58 }
 0x8a0   : > { %v3286_v4 = vadd.f32 %v3232_v26, %v3095_v22  ;;  %v3432_v26 = vpop.f32.mrf.mxu3 }
 0x8a1   : > { %v3617_v0 = vpop.f32.mrf.mxu1  ;;  %v3096_v55 = vadd.f32 %v3044_v51, %v2696_v33 }
 0x8a2   : > { %v3477_v5 = vadd.f32 %v3423_v40, %v3286_v4  ;;  %v7635_v21 = vpop.xlane.xlu0 %3699  ;;  %v8184_v4 = vld [vmem:[#allocation75_spill] sm:$0xff] }
 0x8a3   : > { %v3782_v28 = vsub.f32 %v7317_v27, %v7635_v21 }
 0x8a4   : > { %v7641_v30 = vadd.f32 %v3614_v56, %v3477_v5  ;;  %v8182_v56 = vld [vmem:[#allocation94_spill] sm:$0xff]  ;;  %v2079_v5 = vadd.f32 %v8185_v62, %v1759_v31  ;;  %v8190_v31 = vld [vmem:[#allocation76_spill] sm:$0xff] }
 0x8a5   : > { %v4995_v15 = vpop.eup %4994  ;;  %v3820_v13 = vmul.f32 1.442695, %v3782_v28  ;;  %v2398_v22 = vadd.f32 %v8182_v56, %v2078_v44  ;;  %v913_v44 = vadd.f32 %v7433_v6, %v8186_v43  ;;  %v3053_v32 = vpop.f32.mrf.mxu2 }
 0x8a6   : > { %v3887_v40 = vsel %vm3679_vm3, %v4995_v15, 0.0  ;;  %v3743_v48 = vsel %vm3679_vm3, %v7641_v30, -inf }
 0x8a7   : > { %4996 = vpow2.f32 %v3820_v13  ;;  %v3235_v60 = vpop.f32.mrf.mxu0  ;;  %3888 = vadd.xlane.f32.xlu1 %v3887_v40  ;;  %3744 = vmax.xlane.f32.xlu0 %v3743_v48  ;;  %v2697_v2 = vadd.f32 %v8184_v4, %v2398_v22 }
 0x8a8   : > { %v3287_v3 = vadd.f32 %v3235_v60, %v3096_v55  ;;  %v8187_v55 = vld [vmem:[#allocation18_spill] sm:$0xff]  ;;  %v3435_v53 = vpop.f32.mrf.mxu3 }
 0x8a9   : > { %v3620_v8 = vpop.f32.mrf.mxu1  ;;  %v3097_v15 = vadd.f32 %v3047_v1, %v2697_v2  ;;  %v1440_v40 = vadd.f32 %v8187_v55, %v913_v44 }
 0x8aa   : > { %v3478_v11 = vadd.f32 %v3426_v39, %v3287_v3  ;;  %v7651_v51 = vpop.xlane.xlu1 %3702 }
 0x8ab   : > { %v3783_v58 = vsub.f32 %v7349_v59, %v7651_v51  ;;  %v1760_v56 = vadd.f32 %v8189_v52, %v1440_v40 }
 0x8ac   : > { %v7657_v28 = vadd.f32 %v3617_v0, %v3478_v11  ;;  %v8188_v0 = vld [vmem:[#allocation95_spill] sm:$0xff] }
 0x8ad   : > { %v4997_v12 = vpop.eup %4996  ;;  %v3822_v33 = vmul.f32 1.442695, %v3783_v58  ;;  %v2399_v48 = vadd.f32 %v8188_v0, %v2079_v5  ;;  %v8191_v58 = vld [vmem:[#allocation58_spill] sm:$0xff]  ;;  %v8192_v5 = vld [vmem:[#allocation9_spill] sm:$0xff]  ;;  %v3056_v40 = vpop.f32.mrf.mxu2 }
 0x8ae   : > { %v3746_v39 = vsel %vm3679_vm3, %v7657_v28, -inf  ;;  %v3890_v13 = vsel %vm3679_vm3, %v4997_v12, 0.0  ;;  %v2080_v4 = vadd.f32 %v8191_v58, %v1760_v56 }
 0x8af   : > { %4998 = vpow2.f32 %v3822_v33  ;;  %v3238_v17 = vpop.f32.mrf.mxu0  ;;  %3747 = vmax.xlane.f32.xlu1 %v3746_v39  ;;  %3891 = vadd.xlane.f32.xlu2 %v3890_v13  ;;  %v2698_v11 = vadd.f32 %v8190_v31, %v2399_v48  ;;  %v914_v33 = vadd.f32 %v7433_v6, %v8192_v5  ;;  %v8193_v39 = vld [vmem:[#allocation19_spill] sm:$0xff]  ;;  %v8197_v31 = vld [vmem:[#allocation60_spill] sm:$0xff]  ;;  %v8198_v5 = vld [vmem:[#allocation10_spill] sm:$0xff] }
 0x8b0   : > { %v3288_v60 = vadd.f32 %v3238_v17, %v3097_v15  ;;  %v8194_v17 = vld [vmem:[#allocation96_spill] sm:$0xff]  ;;  %v8195_v48 = vld [vmem:[#allocation39_spill] sm:$0xff] }
 0x8b1   : > { %v3623_v19 = vpop.f32.mrf.mxu1  ;;  %v3098_v43 = vadd.f32 %v3050_v50, %v2698_v11  ;;  %v1441_v13 = vadd.f32 %v8193_v39, %v914_v33  ;;  %v915_v33 = vadd.f32 %v7433_v6, %v8198_v5 }
 0x8b2   : > { %v3479_v22 = vadd.f32 %v3429_v16, %v3288_v60  ;;  %v7667_v1 = vpop.xlane.xlu2 %3705 }
 0x8b3   : > { %v3784_v3 = vsub.f32 %v7377_v14, %v7667_v1  ;;  %v1761_v60 = vadd.f32 %v8195_v48, %v1441_v13 }
 0x8b4   : > { %v7673_v2 = vadd.f32 %v3620_v8, %v3479_v22  ;;  %v2400_v8 = vadd.f32 %v8194_v17, %v2080_v4  ;;  %v8196_v22 = vld [vmem:[#allocation77_spill] sm:$0xff]  ;;  %v3438_v4 = vpop.f32.mrf.mxu3 }
 0x8b5   : > { %v4999_v62 = vpop.eup %4998  ;;  %v3824_v12 = vmul.f32 1.442695, %v3784_v3  ;;  %v2081_v11 = vadd.f32 %v8197_v31, %v1761_v60  ;;  %v8203_v31 = vld [vmem:[#allocation62_spill] sm:$0xff] }
 0x8b6   : > { %v3893_v16 = vsel %vm3679_vm3, %v4999_v62, 0.0  ;;  %v3749_v44 = vsel %vm3679_vm3, %v7673_v2, -inf  ;;  %v2699_v3 = vadd.f32 %v8196_v22, %v2400_v8  ;;  %v8202_v22 = vld [vmem:[#allocation78_spill] sm:$0xff] }
 0x8b7   : > { %5000 = vpow2.f32 %v3824_v12  ;;  %v3241_v15 = vpop.f32.mrf.mxu0  ;;  %3894 = vadd.xlane.f32.xlu0 %v3893_v16  ;;  %3750 = vmax.xlane.f32.xlu2 %v3749_v44 }
 0x8b8   : > { %v3289_v55 = vadd.f32 %v3241_v15, %v3098_v43  ;;  %v3099_v43 = vadd.f32 %v3053_v32, %v2699_v3  ;;  %v8199_v15 = vld [vmem:[#allocation20_spill] sm:$0xff]  ;;  %v3059_v32 = vpop.f32.mrf.mxu2 }
 0x8b9   : > { %v3626_v0 = vpop.f32.mrf.mxu1  ;;  %v1442_v39 = vadd.f32 %v8199_v15, %v915_v33 }
 0x8ba   : > { %v3480_v52 = vadd.f32 %v3432_v26, %v3289_v55  ;;  %v7683_v50 = vpop.xlane.xlu0 %3708  ;;  %v8201_v55 = vld [vmem:[#allocation40_spill] sm:$0xff] }
 0x8bb   : > { %v3785_v56 = vsub.f32 %v7402_v25, %v7683_v50  ;;  %v1762_v48 = vadd.f32 %v8201_v55, %v1442_v39  ;;  %v8205_v39 = vld [vmem:[#allocation21_spill] sm:$0xff] }
 0x8bc   : > { %v7689_v58 = vadd.f32 %v3623_v19, %v3480_v52  ;;  %v8200_v19 = vld [vmem:[#allocation97_spill] sm:$0xff]  ;;  %v3441_v15 = vpop.f32.mrf.mxu3 }
 0x8bd   : > { %v5001_v62 = vpop.eup %5000  ;;  %v3826_v12 = vmul.f32 1.442695, %v3785_v56  ;;  %v2401_v13 = vadd.f32 %v8200_v19, %v2081_v11  ;;  %v8204_v11 = vld [vmem:[#allocation11_spill] sm:$0xff] }
 0x8be   : > { %v3896_v26 = vsel %vm3679_vm3, %v5001_v62, 0.0  ;;  %v3752_v16 = vsel %vm3679_vm3, %v7689_v58, -inf  ;;  %v2082_v62 = vadd.f32 %v8203_v31, %v1762_v48  ;;  %v8207_v48 = vld [vmem:[#allocation41_spill] sm:$0xff] }
 0x8bf   : > { %5002 = vpow2.f32 %v3826_v12  ;;  %v3244_v44 = vpop.f32.mrf.mxu0  ;;  %3897 = vadd.xlane.f32.xlu1 %v3896_v26  ;;  %3753 = vmax.xlane.f32.xlu0 %v3752_v16  ;;  %v2700_v3 = vadd.f32 %v8202_v22, %v2401_v13 }
 0x8c0   : > { %v3290_v17 = vadd.f32 %v3244_v44, %v3099_v43  ;;  %v916_v43 = vadd.f32 %v7433_v6, %v8204_v11 }
 0x8c1   : > { %v3629_v8 = vpop.f32.mrf.mxu1  ;;  %v3100_v26 = vadd.f32 %v3056_v40, %v2700_v3  ;;  %v8208_v40 = vld [vmem:[#allocation79_spill] sm:$0xff]  ;;  %v8209_v3 = vld [vmem:[#allocation64_spill] sm:$0xff] }
 0x8c2   : > { %v3481_v60 = vadd.f32 %v3435_v53, %v3290_v17  ;;  %v7699_v52 = vpop.xlane.xlu1 %3711  ;;  %v1443_v19 = vadd.f32 %v8205_v39, %v916_v43  ;;  %v8212_v39 = vld [vmem:[#allocation99_spill] sm:$0xff] }
 0x8c3   : > { %v3786_v56 = vsub.f32 %v7424_v18, %v7699_v52 }
 0x8c4   : > { %v7705_v12 = vadd.f32 %v3626_v0, %v3481_v60  ;;  %v8206_v0 = vld [vmem:[#allocation98_spill] sm:$0xff]  ;;  %v1763_v60 = vadd.f32 %v8207_v48, %v1443_v19 }
 0x8c5   : > { %v5003_v5 = vpop.eup %5002  ;;  %v3828_v33 = vmul.f32 1.442695, %v3786_v56  ;;  %v2402_v13 = vadd.f32 %v8206_v0, %v2082_v62  ;;  %v3444_v0 = vpop.f32.mrf.mxu3 }
 0x8c6   : > { %v3755_v53 = vsel %vm3679_vm3, %v7705_v12, -inf  ;;  %v3899_v16 = vsel %vm3679_vm3, %v5003_v5, 0.0  ;;  %v2083_v31 = vadd.f32 %v8209_v3, %v1763_v60 }
 0x8c7   : > { %5004 = vpow2.f32 %v3828_v33  ;;  %v3247_v44 = vpop.f32.mrf.mxu0  ;;  %3756 = vmax.xlane.f32.xlu1 %v3755_v53  ;;  %3900 = vadd.xlane.f32.xlu2 %v3899_v16  ;;  %v2701_v22 = vadd.f32 %v8208_v40, %v2402_v13  ;;  %v3062_v33 = vpop.f32.mrf.mxu2  ;;  %v8210_v53 = vld [vmem:[#allocation12_spill] sm:$0xff]  ;;  %v8213_v13 = vld [vmem:[#allocation42_spill] sm:$0xff] }
 0x8c8   : > { %v3291_v17 = vadd.f32 %v3247_v44, %v3100_v26  ;;  %v917_v16 = vadd.f32 %v7433_v6, %v8210_v53  ;;  %v2403_v19 = vadd.f32 %v8212_v39, %v2083_v31  ;;  %v8215_v40 = vld [vmem:[#allocation66_spill] sm:$0xff]  ;;  %v8219_v39 = vld [vmem:[#allocation43_spill] sm:$0xff] }
 0x8c9   : > { %v3632_v55 = vpop.f32.mrf.mxu1  ;;  %v3101_v18 = vadd.f32 %v3059_v32, %v2701_v22 }
 0x8ca   : > { %v3482_v56 = vadd.f32 %v3438_v4, %v3291_v17  ;;  %v8211_v4 = vld [vmem:[#allocation22_spill] sm:$0xff] }
 0x8cb   : > { %v1444_v44 = vadd.f32 %v8211_v4, %v917_v16 }
 0x8cc   : > { %v7717_v11 = vadd.f32 %v3629_v8, %v3482_v56  ;;  %v8214_v56 = vld [vmem:[#allocation80_spill] sm:$0xff] }
 0x8cd   : > { %v5005_v5 = vpop.eup %5004  ;;  %v1764_v17 = vadd.f32 %v8213_v13, %v1444_v44  ;;  %v2702_v32 = vadd.f32 %v8214_v56, %v2403_v19  ;;  %v3447_v13 = vpop.f32.mrf.mxu3 }
 0x8ce   : > { %v3902_v43 = vsel %vm3679_vm3, %v5005_v5, 0.0  ;;  %v3758_v62 = vsel %vm3679_vm3, %v7717_v11, -inf  ;;  %v8216_v5 = vld [vmem:[#allocation13_spill] sm:$0xff] }
 0x8cf   : > { %v3250_v26 = vpop.f32.mrf.mxu0  ;;  %3903 = vadd.xlane.f32.xlu0 %v3902_v43  ;;  %3759 = vmax.xlane.f32.xlu2 %v3758_v62  ;;  %v2084_v22 = vadd.f32 %v8215_v40, %v1764_v17  ;;  %v918_v53 = vadd.f32 %v7433_v6, %v8216_v5  ;;  %v3102_v43 = vadd.f32 %v3062_v33, %v2702_v32  ;;  %v3065_v31 = vpop.f32.mrf.mxu2  ;;  %v8217_v62 = vld [vmem:[#allocation23_spill] sm:$0xff]  ;;  %v8220_v17 = vld [vmem:[#allocation81_spill] sm:$0xff]  ;;  %v8221_v33 = vld [vmem:[#allocation68_spill] sm:$0xff] }
 0x8d0   : > { %v3292_v8 = vadd.f32 %v3250_v26, %v3101_v18 }
 0x8d1   : > { %v3635_v60 = vpop.f32.mrf.mxu1  ;;  %v1445_v26 = vadd.f32 %v8217_v62, %v918_v53  ;;  %v8222_v53 = vld [vmem:[#allocation14_spill] sm:$0xff] }
 0x8d2   : > { %v3483_v48 = vadd.f32 %v3441_v15, %v3292_v8  ;;  %v8218_v15 = vld [vmem:[#allocation100_spill] sm:$0xff]  ;;  %v7738_v8 = vpop.xlane.xlu0 %3717 }
 0x8d3   : > { %v2404_v4 = vadd.f32 %v8218_v15, %v2084_v22  ;;  %v1765_v19 = vadd.f32 %v8219_v39, %v1445_v26  ;;  %v3788_v40 = vsub.f32 %v7474_v23, %v7738_v8  ;;  %v919_v22 = vadd.f32 %v7433_v6, %v8222_v53  ;;  %v8224_v26 = vld [vmem:[#allocation101_spill] sm:$0xff]  ;;  %v8225_v39 = vld [vmem:[#allocation44_spill] sm:$0xff] }
 0x8d4   : > { %v7729_v3 = vadd.f32 %v3632_v55, %v3483_v48 }
 0x8d5   : > { %v2703_v48 = vadd.f32 %v8220_v17, %v2404_v4  ;;  %v2085_v56 = vadd.f32 %v8221_v33, %v1765_v19  ;;  %v8227_v33 = vld [vmem:[#allocation70_spill] sm:$0xff] }
 0x8d6   : > { %v3761_v16 = vsel %vm3679_vm3, %v7729_v3, -inf }
 0x8d7   : > { %v3253_v18 = vpop.f32.mrf.mxu0  ;;  %3762 = vmax.xlane.f32.xlu0 %v3761_v16  ;;  %v2405_v15 = vadd.f32 %v8224_v26, %v2085_v56 }
 0x8d8   : > { %v3293_v44 = vadd.f32 %v3253_v18, %v3102_v43  ;;  %v3103_v43 = vadd.f32 %v3065_v31, %v2703_v48  ;;  %v8226_v31 = vld [vmem:[#allocation82_spill] sm:$0xff] }
 0x8d9   : > { %v3638_v5 = vpop.f32.mrf.mxu1  ;;  %v2704_v48 = vadd.f32 %v8226_v31, %v2405_v15 }
 0x8da   : > { %v3484_v55 = vadd.f32 %v3444_v0, %v3293_v44  ;;  %v8223_v0 = vld [vmem:[#allocation24_spill] sm:$0xff]  ;;  %v3832_v44 = vmul.f32 1.442695, %v3788_v40  ;;  %v7755_v17 = vpop.xlane.xlu1 %3720 }
 0x8db   : > { %v1446_v62 = vadd.f32 %v8223_v0, %v919_v22  ;;  %v3789_v56 = vsub.f32 %v7499_v47, %v7755_v17  ;;  %v3450_v22 = vpop.f32.mrf.mxu3  ;;  %v8228_v0 = vld [vmem:[#allocation102_spill] sm:$0xff] }
 0x8dc   : > { %v7742_v32 = vadd.f32 %v3635_v60, %v3484_v55  ;;  %v3068_v60 = vpop.f32.mrf.mxu2  ;;  %v7753_v55 = vpop.xlane.xlu2 %3714  ;;  %5006 = vpow2.f32 %v3832_v44 }
 0x8dd   : > { %v1766_v19 = vadd.f32 %v8225_v39, %v1446_v62  ;;  %v3834_v26 = vmul.f32 1.442695, %v3789_v56 }
 0x8de   : > { %v3764_v16 = vsel %vm3679_vm3, %v7742_v32, -inf }
 0x8df   : > { %v3256_v18 = vpop.f32.mrf.mxu0  ;;  %3765 = vmax.xlane.f32.xlu1 %v3764_v16  ;;  %v2086_v53 = vadd.f32 %v8227_v33, %v1766_v19  ;;  %v8229_v19 = vld [vmem:[#allocation83_spill] sm:$0xff]  ;;  %5008 = vpow2.f32 %v3834_v26 }
 0x8e0   : > { %v3294_v4 = vadd.f32 %v3256_v18, %v3103_v43  ;;  %v3104_v43 = vadd.f32 %v3068_v60, %v2704_v48  ;;  %v3787_v48 = vsub.f32 %v7452_v36, %v7753_v55 }
 0x8e1   : > { %v3641_v18 = vpop.f32.mrf.mxu1 }
 0x8e2   : > { %v3485_v6 = vadd.f32 %v3447_v13, %v3294_v4  ;;  %v2406_v13 = vadd.f32 %v8228_v0, %v2086_v53  ;;  %v5007_v44 = vpop.eup %5006 }
 0x8e4   : > { %v7759_v23 = vadd.f32 %v3638_v5, %v3485_v6  ;;  %v7766_v15 = vpop.xlane.xlu2 %3723  ;;  %v3071_v39 = vpop.f32.mrf.mxu2  ;;  %v2705_v6 = vadd.f32 %v8229_v19, %v2406_v13 }
 0x8e5   : > { %v3790_v19 = vsub.f32 %v7519_v29, %v7766_v15 }
 0x8e6   : > { %v3767_v40 = vsel %vm3679_vm3, %v7759_v23, -inf  ;;  %v3105_v53 = vadd.f32 %v3071_v39, %v2705_v6 }
 0x8e7   : > { %v3259_v16 = vpop.f32.mrf.mxu0  ;;  %3768 = vmax.xlane.f32.xlu2 %v3767_v40  ;;  %v3453_v40 = vpop.f32.mrf.mxu3 }
 0x8e8   : > { %v3295_v62 = vadd.f32 %v3259_v16, %v3104_v43 }
 0x8e9   : > { %v3644_v0 = vpop.f32.mrf.mxu1 }
 0x8ea   : > { %v3486_v5 = vadd.f32 %v3450_v22, %v3295_v62  ;;  %v7768_v4 = vpop.xlane.xlu0 %3726  ;;  %v3908_v22 = vsel %vm3679_vm3, %v5007_v44, 0.0 }
 0x8eb   : > { %v3791_v60 = vsub.f32 %v7548_v37, %v7768_v4 }
 0x8ec   : > { %v7773_v31 = vadd.f32 %v3641_v18, %v3486_v5  ;;  %v3830_v18 = vmul.f32 1.442695, %v3787_v48  ;;  %v5009_v5 = vpop.eup %5008 }
 0x8ed   : > { %v3838_v33 = vmul.f32 1.442695, %v3791_v60  ;;  %v3911_v48 = vsel %vm3679_vm3, %v5009_v5, 0.0 }
 0x8ee   : > { %v3770_v56 = vsel %vm3679_vm3, %v7773_v31, -inf }
 0x8ef   : > { %5010 = vpow2.f32 %v3838_v33  ;;  %v3262_v43 = vpop.f32.mrf.mxu0  ;;  %3771 = vmax.xlane.f32.xlu0 %v3770_v56  ;;  %3909 = vadd.xlane.f32.xlu2 %v3908_v22  ;;  %v3836_v22 = vmul.f32 1.442695, %v3790_v19 }
 0x8f0   : > { %v3296_v16 = vadd.f32 %v3262_v43, %v3105_v53 }
 0x8f2   : > { %v3487_v13 = vadd.f32 %v3453_v40, %v3296_v16  ;;  %v3874_v62 = vpop.xlane.xlu2 %3873  ;;  %v7782_v26 = vpop.xlane.xlu1 %3729 }
 0x8f3   : > { %5012 = vlog2.f32 %v3874_v62  ;;  %v3792_v44 = vsub.f32 %v7564_v35, %v7782_v26 }
 0x8f4   : > { %v7786_v39 = vadd.f32 %v3644_v0, %v3487_v13  ;;  %5014 = vpow2.f32 %v3830_v18 }
 0x8f5   : > { %v5011_v60 = vpop.eup %5010  ;;  %v3840_v6 = vmul.f32 1.442695, %v3792_v44 }
 0x8f6   : > { %v3773_v33 = vsel %vm3679_vm3, %v7786_v39, -inf  ;;  %v3917_v53 = vsel %vm3679_vm3, %v5011_v60, 0.0 }
 0x8f7   : > { %5016 = vpow2.f32 %v3840_v6  ;;  %3912 = vadd.xlane.f32.xlu0 %v3911_v48  ;;  %3774 = vmax.xlane.f32.xlu1 %v3773_v33 }
 0x8f8   : > { %3918 = vadd.xlane.f32.xlu2 %v3917_v53 }
 0x8f9   : > { %v5013_v56 = vpop.eup %5012 }
 0x8fa   : > { %v3969_v43 = vmul.f32 0.6931472, %v5013_v56  ;;  %v3877_v40 = vpop.xlane.xlu0 %3876  ;;  %v7796_v16 = vpop.xlane.xlu2 %3732 }
 0x8fb   : > { %v5015_v18 = vpop.eup %5014  ;;  %5018 = vlog2.f32 %v3877_v40  ;;  %v3793_v62 = vsub.f32 %v7579_v46, %v7796_v16 }
 0x8fc   : > { %v4032_v0 = vadd.f32 %v3969_v43, %v7540_v38  ;;  %5020 = vpow2.f32 %v3836_v22  ;;  %v3905_v60 = vsel %vm3679_vm3, %v5015_v18, 0.0 }
 0x8fd   : > { %v5017_v13 = vpop.eup %5016  ;;  %v3842_v19 = vmul.f32 1.442695, %v3793_v62 }
 0x8fe   : > { %v4064_v5 = vsub.f32 %v7169_v54, %v4032_v0  ;;  %v3920_v44 = vsel %vm3679_vm3, %v5017_v13, 0.0 }
 0x8ff   : > { %3921 = vadd.xlane.f32.xlu0 %v3920_v44  ;;  %3906 = vadd.xlane.f32.xlu1 %v3905_v60 }
 0x900   : > { %4096 = vst.msk [vmem:[%s7802_s17] sm:$0xff] %vm3679_vm3, %v4064_v5 }
 0x901   : > { %v5019_v38 = vpop.eup %5018 }
 0x902   : > { %v3971_v6 = vmul.f32 0.6931472, %v5019_v38  ;;  %v3880_v48 = vpop.xlane.xlu1 %3879  ;;  %v7811_v33 = vpop.xlane.xlu0 %3735 }
 0x903   : > { %v5021_v53 = vpop.eup %5020  ;;  %5022 = vlog2.f32 %v3880_v48  ;;  %v3794_v54 = vsub.f32 %v7594_v57, %v7811_v33 }
 0x904   : > { %v4033_v56 = vadd.f32 %v3971_v6, %v7557_v34  ;;  %5024 = vpow2.f32 %v3842_v19  ;;  %v3914_v40 = vsel %vm3679_vm3, %v5021_v53, 0.0 }
 0x905   : > { %v3844_v22 = vmul.f32 1.442695, %v3794_v54 }
 0x906   : > { %v4065_v43 = vsub.f32 %v7193_v24, %v4033_v56 }
 0x907   : > { %5026 = vpow2.f32 %v3844_v22  ;;  %3915 = vadd.xlane.f32.xlu1 %v3914_v40 }
 0x908   : > { %4097 = vst.msk [vmem:[%s7802_s17 + $0x8] sm:$0xff] %vm3679_vm3, %v4065_v43 }
 0x909   : > { %v5023_v18 = vpop.eup %5022 }
 0x90a   : > { %v3973_v0 = vmul.f32 0.6931472, %v5023_v18  ;;  %v7820_v13 = vpop.xlane.xlu1 %3738  ;;  %v3883_v62 = vpop.xlane.xlu2 %3882 }
 0x90b   : > { %v5025_v5 = vpop.eup %5024  ;;  %v3795_v34 = vsub.f32 %v7609_v20, %v7820_v13  ;;  %5028 = vlog2.f32 %v3883_v62 }
 0x90c   : > { %v4034_v44 = vadd.f32 %v3973_v0, %v7572_v42  ;;  %v3923_v6 = vsel %vm3679_vm3, %v5025_v5, 0.0 }
 0x90d   : > { %v5027_v24 = vpop.eup %5026  ;;  %v3846_v60 = vmul.f32 1.442695, %v3795_v34 }
 0x90e   : > { %v4066_v38 = vsub.f32 %v7217_v41, %v4034_v44  ;;  %v3926_v19 = vsel %vm3679_vm3, %v5027_v24, 0.0 }
 0x90f   : > { %5030 = vpow2.f32 %v3846_v60  ;;  %3927 = vadd.xlane.f32.xlu2 %v3926_v19  ;;  %3924 = vadd.xlane.f32.xlu1 %v3923_v6 }
 0x910   : > { %4098 = vst.msk [vmem:[%s7802_s17 + $0x10] sm:$0xff] %vm3679_vm3, %v4066_v38 }
 0x911   : > { %v5029_v48 = vpop.eup %5028 }
 0x912   : > { %v3975_v53 = vmul.f32 0.6931472, %v5029_v48  ;;  %v3886_v54 = vpop.xlane.xlu0 %3885  ;;  %v7830_v56 = vpop.xlane.xlu2 %3741 }
 0x913   : > { %5032 = vlog2.f32 %v3886_v54  ;;  %v3796_v42 = vsub.f32 %v7625_v10, %v7830_v56 }
 0x914   : > { %v4035_v41 = vadd.f32 %v3975_v53, %v7587_v63 }
 0x915   : > { %v5031_v22 = vpop.eup %5030  ;;  %v3848_v43 = vmul.f32 1.442695, %v3796_v42 }
 0x916   : > { %v4067_v40 = vsub.f32 %v7242_v45, %v4035_v41  ;;  %v3929_v18 = vsel %vm3679_vm3, %v5031_v22, 0.0 }
 0x917   : > { %5034 = vpow2.f32 %v3848_v43  ;;  %3930 = vadd.xlane.f32.xlu0 %v3929_v18 }
 0x918   : > { %4099 = vst.msk [vmem:[%s7802_s17 + $0x18] sm:$0xff] %vm3679_vm3, %v4067_v40 }
 0x919   : > { %v5033_v0 = vpop.eup %5032 }
 0x91a   : > { %v3977_v62 = vmul.f32 0.6931472, %v5033_v0  ;;  %v3889_v5 = vpop.xlane.xlu1 %3888  ;;  %v7839_v34 = vpop.xlane.xlu0 %3744 }
 0x91b   : > { %5036 = vlog2.f32 %v3889_v5  ;;  %v3797_v63 = vsub.f32 %v7641_v30, %v7839_v34 }
 0x91c   : > { %v4036_v44 = vadd.f32 %v3977_v62, %v7602_v7 }
 0x91d   : > { %v5035_v24 = vpop.eup %5034  ;;  %v3850_v45 = vmul.f32 1.442695, %v3797_v63 }
 0x91e   : > { %v4068_v60 = vsub.f32 %v7267_v49, %v4036_v44  ;;  %v3932_v38 = vsel %vm3679_vm3, %v5035_v24, 0.0 }
 0x91f   : > { %5038 = vpow2.f32 %v3850_v45  ;;  %3933 = vadd.xlane.f32.xlu1 %v3932_v38 }
 0x920   : > { %4100 = vst.msk [vmem:[%s7802_s17 + $0x20] sm:$0xff] %vm3679_vm3, %v4068_v60 }
 0x921   : > { %v5037_v19 = vpop.eup %5036 }
 0x922   : > { %v3979_v6 = vmul.f32 0.6931472, %v5037_v19  ;;  %v7848_v48 = vpop.xlane.xlu1 %3747  ;;  %v3892_v53 = vpop.xlane.xlu2 %3891 }
 0x923   : > { %v3798_v54 = vsub.f32 %v7657_v28, %v7848_v48  ;;  %5040 = vlog2.f32 %v3892_v53 }
 0x924   : > { %v4037_v7 = vadd.f32 %v3979_v6, %v7619_v61 }
 0x925   : > { %v5039_v42 = vpop.eup %5038  ;;  %v3852_v49 = vmul.f32 1.442695, %v3798_v54 }
 0x926   : > { %v4069_v41 = vsub.f32 %v7292_v9, %v4037_v7  ;;  %v3935_v22 = vsel %vm3679_vm3, %v5039_v42, 0.0 }
 0x927   : > { %5042 = vpow2.f32 %v3852_v49  ;;  %3936 = vadd.xlane.f32.xlu2 %v3935_v22 }
 0x928   : > { %4101 = vst.msk [vmem:[%s7802_s17 + $0x28] sm:$0xff] %vm3679_vm3, %v4069_v41 }
 0x929   : > { %v5041_v43 = vpop.eup %5040 }
 0x92a   : > { %v3981_v40 = vmul.f32 0.6931472, %v5041_v43  ;;  %v3895_v18 = vpop.xlane.xlu0 %3894  ;;  %v7857_v0 = vpop.xlane.xlu2 %3750 }
 0x92b   : > { %5044 = vlog2.f32 %v3895_v18  ;;  %v3799_v61 = vsub.f32 %v7673_v2, %v7857_v0 }
 0x92c   : > { %v4038_v62 = vadd.f32 %v3981_v40, %v7635_v21 }
 0x92d   : > { %v5043_v5 = vpop.eup %5042  ;;  %v3854_v9 = vmul.f32 1.442695, %v3799_v61 }
 0x92e   : > { %v4070_v63 = vsub.f32 %v7317_v27, %v4038_v62  ;;  %v3938_v44 = vsel %vm3679_vm3, %v5043_v5, 0.0 }
 0x92f   : > { %5046 = vpow2.f32 %v3854_v9  ;;  %3939 = vadd.xlane.f32.xlu0 %v3938_v44 }
 0x930   : > { %4102 = vst.msk [vmem:[%s7802_s17 + $0x30] sm:$0xff] %vm3679_vm3, %v4070_v63 }
 0x931   : > { %v5045_v24 = vpop.eup %5044 }
 0x932   : > { %v3983_v45 = vmul.f32 0.6931472, %v5045_v24  ;;  %v3898_v60 = vpop.xlane.xlu1 %3897  ;;  %v7866_v38 = vpop.xlane.xlu0 %3753 }
 0x933   : > { %5048 = vlog2.f32 %v3898_v60  ;;  %v3800_v21 = vsub.f32 %v7689_v58, %v7866_v38 }
 0x934   : > { %v4039_v19 = vadd.f32 %v3983_v45, %v7651_v51 }
 0x935   : > { %v5047_v6 = vpop.eup %5046  ;;  %v3856_v27 = vmul.f32 1.442695, %v3800_v21 }
 0x936   : > { %v4071_v53 = vsub.f32 %v7349_v59, %v4039_v19  ;;  %v3941_v54 = vsel %vm3679_vm3, %v5047_v6, 0.0 }
 0x937   : > { %5050 = vpow2.f32 %v3856_v27  ;;  %3942 = vadd.xlane.f32.xlu1 %v3941_v54  ;;  %v8230_v54 = vld [vmem:[#allocation103_spill] sm:$0xff] }
 0x938   : > { %4103 = vst.msk [vmem:[%s7802_s17 + $0x38] sm:$0xff] %vm3679_vm3, %v4071_v53 }
 0x939   : > { %v5049_v7 = vpop.eup %5048 }
 0x93a   : > { %v3985_v42 = vmul.f32 0.6931472, %v5049_v7  ;;  %v7875_v49 = vpop.xlane.xlu1 %3756  ;;  %v3901_v41 = vpop.xlane.xlu2 %3900 }
 0x93b   : > { %v3801_v22 = vsub.f32 %v7705_v12, %v7875_v49  ;;  %5052 = vlog2.f32 %v3901_v41 }
 0x93c   : > { %v4040_v51 = vadd.f32 %v3985_v42, %v7667_v1 }
 0x93d   : > { %v5051_v43 = vpop.eup %5050  ;;  %v3858_v59 = vmul.f32 1.442695, %v3801_v22 }
 0x93e   : > { %v4072_v40 = vsub.f32 %v7377_v14, %v4040_v51  ;;  %v3944_v18 = vsel %vm3679_vm3, %v5051_v43, 0.0 }
 0x93f   : > { %5054 = vpow2.f32 %v3858_v59  ;;  %3945 = vadd.xlane.f32.xlu2 %v3944_v18 }
 0x940   : > { %4104 = vst.msk [vmem:[%s7802_s17 + $0x40] sm:$0xff] %vm3679_vm3, %v4072_v40 }
 0x941   : > { %v5053_v61 = vpop.eup %5052 }
 0x942   : > { %v3987_v62 = vmul.f32 0.6931472, %v5053_v61  ;;  %v3904_v5 = vpop.xlane.xlu0 %3903  ;;  %v7884_v9 = vpop.xlane.xlu2 %3759 }
 0x943   : > { %5056 = vlog2.f32 %v3904_v5  ;;  %v3802_v1 = vsub.f32 %v7717_v11, %v7884_v9 }
 0x944   : > { %v4041_v63 = vadd.f32 %v3987_v62, %v7683_v50 }
 0x945   : > { %v5055_v44 = vpop.eup %5054  ;;  %v3860_v14 = vmul.f32 1.442695, %v3802_v1 }
 0x946   : > { %v4073_v24 = vsub.f32 %v7402_v25, %v4041_v63  ;;  %v3947_v45 = vsel %vm3679_vm3, %v5055_v44, 0.0 }
 0x947   : > { %5058 = vpow2.f32 %v3860_v14  ;;  %3948 = vadd.xlane.f32.xlu0 %v3947_v45 }
 0x948   : > { %4105 = vst.msk [vmem:[%s7802_s17 + $0x48] sm:$0xff] %vm3679_vm3, %v4073_v24 }
 0x949   : > { %v5057_v60 = vpop.eup %5056 }
 0x94a   : > { %v3989_v21 = vmul.f32 0.6931472, %v5057_v60  ;;  %v7893_v19 = vpop.xlane.xlu0 %3762 }
 0x94b   : > { %v3803_v6 = vsub.f32 %v7729_v3, %v7893_v19 }
 0x94c   : > { %v4042_v50 = vadd.f32 %v3989_v21, %v7699_v52 }
 0x94d   : > { %v5059_v27 = vpop.eup %5058  ;;  %v3862_v53 = vmul.f32 1.442695, %v3803_v6 }
 0x94e   : > { %v4074_v25 = vsub.f32 %v8230_v54, %v4042_v50  ;;  %v3950_v7 = vsel %vm3679_vm3, %v5059_v27, 0.0 }
 0x94f   : > { %5060 = vpow2.f32 %v3862_v53  ;;  %3951 = vadd.xlane.f32.xlu1 %v3950_v7 }
 0x950   : > { %4106 = vst.msk [vmem:[%s7802_s17 + $0x50] sm:$0xff] %vm3679_vm3, %v4074_v25  ;;  %v8231_v25 = vld [vmem:[#allocation57_spill] sm:$0xff] }
 0x952   : > { %v7902_v42 = vpop.xlane.xlu1 %3765 }
 0x953   : > { %v3804_v41 = vsub.f32 %v7742_v32, %v7902_v42 }
 0x955   : > { %v5061_v22 = vpop.eup %5060  ;;  %v3864_v51 = vmul.f32 1.442695, %v3804_v41 }
 0x956   : > { %v3953_v43 = vsel %vm3679_vm3, %v5061_v22, 0.0 }
 0x957   : > { %5062 = vpow2.f32 %v3864_v51  ;;  %3954 = vadd.xlane.f32.xlu2 %v3953_v43 }
 0x95a   : > { %v7907_v52 = vpop.xlane.xlu2 %3768 }
 0x95b   : > { %v3805_v59 = vsub.f32 %v7759_v23, %v7907_v52 }
 0x95d   : > { %v5063_v40 = vpop.eup %5062  ;;  %v3866_v18 = vmul.f32 1.442695, %v3805_v59 }
 0x95e   : > { %v3956_v61 = vsel %vm3679_vm3, %v5063_v40, 0.0 }
 0x95f   : > { %5064 = vpow2.f32 %v3866_v18  ;;  %3957 = vadd.xlane.f32.xlu0 %v3956_v61 }
 0x962   : > { %v7912_v62 = vpop.xlane.xlu0 %3771  ;;  %v3910_v5 = vpop.xlane.xlu2 %3909 }
 0x963   : > { %v3806_v1 = vsub.f32 %v7773_v31, %v7912_v62  ;;  %5066 = vlog2.f32 %v3910_v5 }
 0x965   : > { %v5065_v63 = vpop.eup %5064  ;;  %v3868_v44 = vmul.f32 1.442695, %v3806_v1 }
 0x966   : > { %v3959_v14 = vsel %vm3679_vm3, %v5065_v63, 0.0 }
 0x967   : > { %5068 = vpow2.f32 %v3868_v44  ;;  %3960 = vadd.xlane.f32.xlu1 %v3959_v14 }
 0x969   : > { %v5067_v24 = vpop.eup %5066 }
 0x96a   : > { %v3993_v45 = vmul.f32 0.6931472, %v5067_v24  ;;  %v3913_v60 = vpop.xlane.xlu0 %3912  ;;  %v7917_v21 = vpop.xlane.xlu1 %3774 }
 0x96b   : > { %5070 = vlog2.f32 %v3913_v60  ;;  %v3807_v6 = vsub.f32 %v7786_v39, %v7917_v21  ;;  %v3919_v50 = vpop.xlane.xlu2 %3918 }
 0x96c   : > { %v4044_v27 = vadd.f32 %v3993_v45, %v7738_v8  ;;  %5072 = vlog2.f32 %v3919_v50 }
 0x96d   : > { %v5069_v53 = vpop.eup %5068  ;;  %v3870_v54 = vmul.f32 1.442695, %v3807_v6 }
 0x96e   : > { %v4076_v7 = vsub.f32 %v8231_v25, %v4044_v27  ;;  %v3962_v41 = vsel %vm3679_vm3, %v5069_v53, 0.0 }
 0x96f   : > { %5074 = vpow2.f32 %v3870_v54  ;;  %3963 = vadd.xlane.f32.xlu2 %v3962_v41 }
 0x970   : > { %4108 = vst.msk [vmem:[%s7802_s17 + $0x60] sm:$0xff] %vm3679_vm3, %v4076_v7 }
 0x971   : > { %v5071_v22 = vpop.eup %5070 }
 0x972   : > { %v5073_v51 = vpop.eup %5072  ;;  %v3995_v43 = vmul.f32 0.6931472, %v5071_v22  ;;  %v3922_v59 = vpop.xlane.xlu0 %3921 }
 0x973   : > { %v3907_v40 = vpop.xlane.xlu1 %3906  ;;  %v3999_v18 = vmul.f32 0.6931472, %v5073_v51  ;;  %5076 = vlog2.f32 %v3922_v59 }
 0x974   : > { %v4045_v8 = vadd.f32 %v3995_v43, %v7755_v17  ;;  %5078 = vlog2.f32 %v3907_v40 }
 0x975   : > { %v5075_v61 = vpop.eup %5074  ;;  %v4047_v5 = vadd.f32 %v3999_v18, %v7768_v4 }
 0x976   : > { %v4077_v1 = vsub.f32 %v7499_v47, %v4045_v8  ;;  %v3965_v63 = vsel %vm3679_vm3, %v5075_v61, 0.0 }
 0x977   : > { %v4079_v44 = vsub.f32 %v7548_v37, %v4047_v5  ;;  %3966 = vadd.xlane.f32.xlu0 %v3965_v63 }
 0x978   : > { %4109 = vst.msk [vmem:[%s7802_s17 + $0x68] sm:$0xff] %vm3679_vm3, %v4077_v1 }
 0x979   : > { %v5077_v14 = vpop.eup %5076  ;;  %4111 = vst.msk [vmem:[%s7802_s17 + $0x78] sm:$0xff] %vm3679_vm3, %v4079_v44 }
 0x97a   : > { %v5079_v24 = vpop.eup %5078  ;;  %v4001_v17 = vmul.f32 0.6931472, %v5077_v14 }
 0x97b   : > { %v3916_v45 = vpop.xlane.xlu1 %3915  ;;  %v3991_v60 = vmul.f32 0.6931472, %v5079_v24 }
 0x97c   : > { %5080 = vlog2.f32 %v3916_v45  ;;  %v4048_v47 = vadd.f32 %v4001_v17, %v7782_v26 }
 0x97d   : > { %v4043_v4 = vadd.f32 %v3991_v60, %v7753_v55 }
 0x97e   : > { %v4080_v6 = vsub.f32 %v7564_v35, %v4048_v47 }
 0x97f   : > { %v4075_v37 = vsub.f32 %v7452_v36, %v4043_v4 }
 0x980   : > { %4112 = vst.msk [vmem:[%s7802_s17 + $0x80] sm:$0xff] %vm3679_vm3, %v4080_v6 }
 0x981   : > { %4107 = vst.msk [vmem:[%s7802_s17 + $0x58] sm:$0xff] %vm3679_vm3, %v4075_v37 }
 0x982   : > { %v5081_v50 = vpop.eup %5080  ;;  %v3928_v54 = vpop.xlane.xlu2 %3927 }
 0x983   : > { %v3997_v27 = vmul.f32 0.6931472, %v5081_v50  ;;  %v3925_v53 = vpop.xlane.xlu1 %3924 }
 0x984   : > { %5082 = vlog2.f32 %v3925_v53 }
 0x985   : > { %v4046_v25 = vadd.f32 %v3997_v27, %v7766_v15  ;;  %5084 = vlog2.f32 %v3928_v54 }
 0x987   : > { %v4078_v55 = vsub.f32 %v7519_v29, %v4046_v25 }
 0x989   : > { %4110 = vst.msk [vmem:[%s7802_s17 + $0x70] sm:$0xff] %vm3679_vm3, %v4078_v55 }
 0x98a   : > { %v5083_v35 = vpop.eup %5082  ;;  %v3931_v7 = vpop.xlane.xlu0 %3930 }
 0x98b   : > { %v5085_v36 = vpop.eup %5084  ;;  %v4003_v26 = vmul.f32 0.6931472, %v5083_v35  ;;  %5086 = vlog2.f32 %v3931_v7 }
 0x98c   : > { %v4005_v41 = vmul.f32 0.6931472, %v5085_v36 }
 0x98d   : > { %v4049_v22 = vadd.f32 %v4003_v26, %v7796_v16 }
 0x98e   : > { %v4050_v51 = vadd.f32 %v4005_v41, %v7811_v33 }
 0x98f   : > { %v4081_v43 = vsub.f32 %v7579_v46, %v4049_v22 }
 0x990   : > { %v4082_v15 = vsub.f32 %v7594_v57, %v4050_v51 }
 0x991   : > { %4113 = vst.msk [vmem:[%s7802_s17 + $0x88] sm:$0xff] %vm3679_vm3, %v4081_v43  ;;  %v5087_v29 = vpop.eup %5086 }
 0x992   : > { %4114 = vst.msk [vmem:[%s7802_s17 + $0x90] sm:$0xff] %vm3679_vm3, %v4082_v15  ;;  %v4007_v59 = vmul.f32 0.6931472, %v5087_v29  ;;  %v3934_v40 = vpop.xlane.xlu1 %3933 }
 0x993   : > { %5088 = vlog2.f32 %v3934_v40 }
 0x994   : > { %v4051_v18 = vadd.f32 %v4007_v59, %v7820_v13 }
 0x996   : > { %v4083_v16 = vsub.f32 %v7609_v20, %v4051_v18 }
 0x998   : > { %4115 = vst.msk [vmem:[%s7802_s17 + $0x98] sm:$0xff] %vm3679_vm3, %v4083_v16 }
 0x999   : > { %v5089_v33 = vpop.eup %5088 }
 0x99a   : > { %v4009_v46 = vmul.f32 0.6931472, %v5089_v33  ;;  %v3937_v8 = vpop.xlane.xlu2 %3936 }
 0x99b   : > { %5090 = vlog2.f32 %v3937_v8 }
 0x99c   : > { %v4052_v57 = vadd.f32 %v4009_v46, %v7830_v56 }
 0x99e   : > { %v4084_v61 = vsub.f32 %v7625_v10, %v4052_v57 }
 0x9a0   : > { %4116 = vst.msk [vmem:[%s7802_s17 + $0xa0] sm:$0xff] %vm3679_vm3, %v4084_v61 }
 0x9a1   : > { %v5091_v5 = vpop.eup %5090 }
 0x9a2   : > { %v4011_v1 = vmul.f32 0.6931472, %v5091_v5  ;;  %v3940_v63 = vpop.xlane.xlu0 %3939 }
 0x9a3   : > { %5092 = vlog2.f32 %v3940_v63 }
 0x9a4   : > { %v4053_v13 = vadd.f32 %v4011_v1, %v7839_v34 }
 0x9a6   : > { %v4085_v20 = vsub.f32 %v7641_v30, %v4053_v13 }
 0x9a8   : > { %4117 = vst.msk [vmem:[%s7802_s17 + $0xa8] sm:$0xff] %vm3679_vm3, %v4085_v20 }
 0x9a9   : > { %v5093_v44 = vpop.eup %5092 }
 0x9aa   : > { %v4013_v14 = vmul.f32 0.6931472, %v5093_v44  ;;  %v3943_v24 = vpop.xlane.xlu1 %3942 }
 0x9ab   : > { %5094 = vlog2.f32 %v3943_v24 }
 0x9ac   : > { %v4054_v56 = vadd.f32 %v4013_v14, %v7848_v48 }
 0x9ae   : > { %v4086_v10 = vsub.f32 %v7657_v28, %v4054_v56 }
 0x9b0   : > { %4118 = vst.msk [vmem:[%s7802_s17 + $0xb0] sm:$0xff] %vm3679_vm3, %v4086_v10 }
 0x9b1   : > { %v5095_v17 = vpop.eup %5094 }
 0x9b2   : > { %v4015_v45 = vmul.f32 0.6931472, %v5095_v17  ;;  %v3946_v60 = vpop.xlane.xlu2 %3945 }
 0x9b3   : > { %5096 = vlog2.f32 %v3946_v60 }
 0x9b4   : > { %v4055_v34 = vadd.f32 %v4015_v45, %v7857_v0 }
 0x9b6   : > { %v4087_v30 = vsub.f32 %v7673_v2, %v4055_v34 }
 0x9b8   : > { %4119 = vst.msk [vmem:[%s7802_s17 + $0xb8] sm:$0xff] %vm3679_vm3, %v4087_v30 }
 0x9b9   : > { %v5097_v47 = vpop.eup %5096 }
 0x9ba   : > { %v4017_v4 = vmul.f32 0.6931472, %v5097_v47  ;;  %v3949_v6 = vpop.xlane.xlu0 %3948 }
 0x9bb   : > { %5098 = vlog2.f32 %v3949_v6 }
 0x9bc   : > { %v4056_v48 = vadd.f32 %v4017_v4, %v7866_v38 }
 0x9be   : > { %v4088_v28 = vsub.f32 %v7689_v58, %v4056_v48 }
 0x9c0   : > { %4120 = vst.msk [vmem:[%s7802_s17 + $0xc0] sm:$0xff] %vm3679_vm3, %v4088_v28 }
 0x9c1   : > { %v5099_v37 = vpop.eup %5098 }
 0x9c2   : > { %v4019_v50 = vmul.f32 0.6931472, %v5099_v37  ;;  %v3952_v27 = vpop.xlane.xlu1 %3951 }
 0x9c3   : > { %5100 = vlog2.f32 %v3952_v27 }
 0x9c4   : > { %v4057_v0 = vadd.f32 %v4019_v50, %v7875_v49 }
 0x9c6   : > { %v4089_v2 = vsub.f32 %v7705_v12, %v4057_v0 }
 0x9c8   : > { %4121 = vst.msk [vmem:[%s7802_s17 + $0xc8] sm:$0xff] %vm3679_vm3, %v4089_v2 }
 0x9c9   : > { %v5101_v53 = vpop.eup %5100 }
 0x9ca   : > { %v4021_v54 = vmul.f32 0.6931472, %v5101_v53  ;;  %v3955_v25 = vpop.xlane.xlu2 %3954 }
 0x9cb   : > { %5102 = vlog2.f32 %v3955_v25 }
 0x9cc   : > { %v4058_v38 = vadd.f32 %v4021_v54, %v7884_v9 }
 0x9ce   : > { %v4090_v58 = vsub.f32 %v7717_v11, %v4058_v38 }
 0x9d0   : > { %4122 = vst.msk [vmem:[%s7802_s17 + $0xd0] sm:$0xff] %vm3679_vm3, %v4090_v58 }
 0x9d1   : > { %v5103_v55 = vpop.eup %5102 }
 0x9d2   : > { %v4023_v35 = vmul.f32 0.6931472, %v5103_v55  ;;  %v3958_v36 = vpop.xlane.xlu0 %3957 }
 0x9d3   : > { %5104 = vlog2.f32 %v3958_v36 }
 0x9d4   : > { %v4059_v49 = vadd.f32 %v4023_v35, %v7893_v19 }
 0x9d6   : > { %v4091_v12 = vsub.f32 %v7729_v3, %v4059_v49 }
 0x9d8   : > { %4123 = vst.msk [vmem:[%s7802_s17 + $0xd8] sm:$0xff] %vm3679_vm3, %v4091_v12 }
 0x9d9   : > { %v5105_v26 = vpop.eup %5104 }
 0x9da   : > { %v4025_v7 = vmul.f32 0.6931472, %v5105_v26  ;;  %v3961_v41 = vpop.xlane.xlu1 %3960 }
 0x9db   : > { %5106 = vlog2.f32 %v3961_v41 }
 0x9dc   : > { %v4060_v9 = vadd.f32 %v4025_v7, %v7902_v42 }
 0x9de   : > { %v4092_v11 = vsub.f32 %v7742_v32, %v4060_v9 }
 0x9e0   : > { %4124 = vst.msk [vmem:[%s7802_s17 + $0xe0] sm:$0xff] %vm3679_vm3, %v4092_v11 }
 0x9e1   : > { %v5107_v22 = vpop.eup %5106 }
 0x9e2   : > { %v4027_v51 = vmul.f32 0.6931472, %v5107_v22  ;;  %v3964_v43 = vpop.xlane.xlu2 %3963 }
 0x9e3   : > { %5108 = vlog2.f32 %v3964_v43 }
 0x9e4   : > { %v4061_v3 = vadd.f32 %v4027_v51, %v7907_v52 }
 0x9e6   : > { %v4093_v19 = vsub.f32 %v7759_v23, %v4061_v3 }
 0x9e8   : > { %4125 = vst.msk [vmem:[%s7802_s17 + $0xe8] sm:$0xff] %vm3679_vm3, %v4093_v19 }
 0x9e9   : > { %v5109_v15 = vpop.eup %5108 }
 0x9ea   : > { %v4029_v29 = vmul.f32 0.6931472, %v5109_v15  ;;  %v3967_v59 = vpop.xlane.xlu0 %3966 }
 0x9eb   : > { %5110 = vlog2.f32 %v3967_v59 }
 0x9ec   : > { %v4062_v42 = vadd.f32 %v4029_v29, %v7912_v62 }
 0x9ee   : > { %v4094_v32 = vsub.f32 %v7773_v31, %v4062_v42 }
 0x9f0   : > { %4126 = vst.msk [vmem:[%s7802_s17 + $0xf0] sm:$0xff] %vm3679_vm3, %v4094_v32 }
 0x9f1   : > { %v5111_v40 = vpop.eup %5110 }
 0x9f2   : > { %v4031_v18 = vmul.f32 0.6931472, %v5111_v40 }
 0x9f4   : > { %v4063_v16 = vadd.f32 %v4031_v18, %v7917_v21 }
 0x9f6   : > { %v4095_v52 = vsub.f32 %v7786_v39, %v4063_v16 }
 0x9f8   : > { %4127 = vst.msk [vmem:[%s7802_s17 + $0xf8] sm:$0xff] %vm3679_vm3, %v4095_v52 }
 0x9f9 PF: > { %p15_p9 = scmp.ge.s32.totalorder %s5331_s9, 4   ;;  %s8232_s27 = smov %s5263_s28 }
 0x9fa   : > { %s8233_s28 = smov %s5340_s12  ;;  %s8234_s29 = smov %s5331_s9 }
 0x9fb   :  { %17 = sbr.rel (!%p15_p9) target bundleno = 2 (0x2), region = 142 }

</bundles_post_ra>
